<compile_context>
chip_gen: v7x
topology: tpu7x:2x2x1
jax: 0.10.0
libtpu: 0.0.40
codegen_flags: <defaults>
</compile_context>

<pallas_src>
import math
import functools

import jax
import jax.numpy as jnp
from jax.experimental import pallas as pl
from jax.experimental.pallas import tpu as pltpu


# ---------------------------------------------------------------------------
# Slot maps for the packed per-block parameter slabs.
# ---------------------------------------------------------------------------
# blk_sq_w : (depth, 4, D, D)  -- the four square per-block matrices
SQ_ATTN_WO, SQ_TIME_W, SQ_CROSS_WV, SQ_CROSS_WO = range(4)
# blk_vec  : (depth, 12, D)    -- every per-block length-D vector (LN g/b + biases)
(V_N1G, V_N1B, V_ATTN_BO, V_TIME_B, V_COND_B, V_NCG, V_NCB,
 V_CROSS_BV, V_CROSS_BO, V_N2G, V_N2B, V_FFN_B2) = range(12)


# ---------------------------------------------------------------------------
# In-kernel helpers (only primitives Mosaic lowers: dot, exp, rsqrt, where, ...).
# ---------------------------------------------------------------------------

def _erf(z):
    # Abramowitz & Stegun 7.1.26, |err| < 1.5e-7 (~f32 eps).  Mosaic has no erf
    # primitive; this keeps nn.GELU()'s exact-erf semantics to float32 round-off
    # using only exp / VPU ops (exp rides the EUP slot).
    a1, a2, a3, a4, a5 = 0.254829592, -0.284496736, 1.421413741, -1.453152027, 1.061405429
    az = jnp.abs(z)
    t = 1.0 / (1.0 + 0.3275911 * az)
    poly = t * (a1 + t * (a2 + t * (a3 + t * (a4 + t * a5))))
    e = 1.0 - poly * jnp.exp(-az * az)
    return jnp.where(z < 0, -e, e)


def _gelu(x):
    return 0.5 * x * (1.0 + _erf(x * (1.0 / math.sqrt(2.0))))


def _layer_norm(x, g, b, eps=1e-5):
    mean = jnp.mean(x, axis=-1, keepdims=True)
    var = jnp.mean(jnp.square(x - mean), axis=-1, keepdims=True)   # biased var (torch LN)
    return (x - mean) * jax.lax.rsqrt(var + eps) * g + b


# ---------------------------------------------------------------------------
# The fused whole-forward kernel.  One grid step == Bb batch elements.
# ---------------------------------------------------------------------------

def _dit_kernel(emb_ref, xp_ref, cond_ref, *rest, tree, heads, depth, Bb, S,
                use_cond, cond_scalar):
    out_ref = rest[-1]
    p = jax.tree_util.tree_unflatten(tree, rest[:-1])   # dict of param Refs

    D = p["patch_w"].shape[-1]
    Dh = D // heads
    scale = 1.0 / math.sqrt(Dh)

    def row(m, i):                       # (1, D) row slice of a loaded vector slab
        return m[i:i + 1, :]

    # ---- time MLP: Linear -> ReLU -> Linear (sinusoidal features precomputed) ----
    t = jnp.dot(emb_ref[0], p["tmlp_w1"][...],
                preferred_element_type=jnp.float32) + p["tmlp_b1"][...]
    t = jnp.maximum(t, 0.0)
    t = jnp.dot(t, p["tmlp_w2"][...],
                preferred_element_type=jnp.float32) + p["tmlp_b2"][...]          # (Bb, D)

    # ---- patch embedding (im2col matmul, batch folded into M) + pos embedding ----
    x = (jnp.dot(xp_ref[0], p["patch_w"][...], preferred_element_type=jnp.float32)
         + p["patch_b"][...] + p["pos_tiled"][...])                              # (Bb*S, D)

    expand = p["expand"][...] if Bb > 1 else None     # (Bb*S, Bb) one-hot row->batch map
    cond = cond_ref[0]                                # (Bb, Cd)

    for d in range(depth):
        vecs = p["blk_vec"][d]                        # (12, D)

        # -- self-attention: LN -> fused QKV matmul -> per-(batch, head) SDPA --
        xn = _layer_norm(x, row(vecs, V_N1G), row(vecs, V_N1B))
        qkv = (jnp.dot(xn, p["blk_qkv_w"][d], preferred_element_type=jnp.float32)
               + p["blk_qkv_b"][d])                   # (Bb*S, 3D)
        q = qkv[:, 0:D] * scale          # torch scales q (post in-proj) by 1/sqrt(Dh)
        k = qkv[:, D:2 * D]
        v = qkv[:, 2 * D:3 * D]
        wo = p["blk_sq_w"][d, SQ_ATTN_WO]             # (D, D) out-projection

        pieces = []
        for bi in range(Bb):             # batches must not mix inside SDPA
            rs = slice(bi * S, (bi + 1) * S)
            qb, kb, vb = q[rs], k[rs], v[rs]
            ob = jnp.zeros((S, D), jnp.float32)
            for h in range(heads):
                hs = slice(h * Dh, (h + 1) * Dh)
                s = jax.lax.dot_general(qb[:, hs], kb[:, hs], (((1,), (1,)), ((), ())),
                                        preferred_element_type=jnp.float32)      # (S, S)
                s = s - jnp.max(s, axis=-1, keepdims=True)
                e = jnp.exp(s)
                pr = e * pl.reciprocal(jnp.sum(e, axis=-1, keepdims=True), approx=True)
                oh = jnp.dot(pr, vb[:, hs], preferred_element_type=jnp.float32)   # (S, Dh)
                # out-projection folded per head (sublane-aligned row slice of Wo):
                # no lane-dim head concat, no extra (S, D) materialization.
                ob = ob + jnp.dot(oh, wo[h * Dh:(h + 1) * Dh, :],
                                  preferred_element_type=jnp.float32)
            pieces.append(ob)
        attn = pieces[0] if Bb == 1 else jnp.concatenate(pieces, axis=0)          # (Bb*S, D)
        x = x + attn

        # -- fused per-batch row add: attn out-proj bias + time cond + cross attn --
        add_row = (row(vecs, V_ATTN_BO)
                   + jnp.dot(t, p["blk_sq_w"][d, SQ_TIME_W],
                             preferred_element_type=jnp.float32)
                   + row(vecs, V_TIME_B))                                         # (Bb, D)
        if use_cond:
            # Cross-attention specialized for a single key/value token (T == 1):
            # softmax over one key == 1, so MHA(query, c, c) reduces to
            # out_proj(v_proj(LN(condition_mlp(c)))), broadcast over the sequence
            # (eval mode: attention dropout is identity).
            if cond_scalar:
                cproj = cond * p["blk_cond_w"][d] + row(vecs, V_COND_B)   # (Bb,1)*(1,D)
            else:
                cproj = (jnp.dot(cond, p["blk_cond_w"][d],
                                 preferred_element_type=jnp.float32)
                         + row(vecs, V_COND_B))
            cn = _layer_norm(cproj, row(vecs, V_NCG), row(vecs, V_NCB))
            vcr = (jnp.dot(cn, p["blk_sq_w"][d, SQ_CROSS_WV],
                           preferred_element_type=jnp.float32)
                   + row(vecs, V_CROSS_BV))
            add_row = (add_row
                       + jnp.dot(vcr, p["blk_sq_w"][d, SQ_CROSS_WO],
                                 preferred_element_type=jnp.float32)
                       + row(vecs, V_CROSS_BO))
        if Bb == 1:
            x = x + add_row
        else:
            # one-hot (Bb*S, Bb) @ (Bb, D): per-batch sublane broadcast on the idle MXU
            x = x + jnp.dot(expand, add_row, preferred_element_type=jnp.float32)

        # -- FFN: LN -> W1 -> exact-erf GELU -> W2, fused --
        xn2 = _layer_norm(x, row(vecs, V_N2G), row(vecs, V_N2B))
        hmid = _gelu(jnp.dot(xn2, p["blk_ffn_w1"][d],
                             preferred_element_type=jnp.float32) + p["blk_ffn_b1"][d])
        x = x + (jnp.dot(hmid, p["blk_ffn_w2"][d],
                         preferred_element_type=jnp.float32) + row(vecs, V_FFN_B2))

    # ---- final norm + to_pixels (128-lane padded output -> unmasked full stores) ----
    xf = _layer_norm(x, p["norm_g"][...], p["norm_b"][...])
    out_ref[0] = (jnp.dot(xf, p["pix_w"][...], preferred_element_type=jnp.float32)
                  + p["pix_b"][...]).astype(out_ref.dtype)


# ---------------------------------------------------------------------------
# Wrapper: layout-only glue + a single pallas_call.
# ---------------------------------------------------------------------------

def simple_dit_forward(params, x, timestep, condition, cfg):
    B, C, H, W = x.shape
    ps = cfg["patch_size"]
    heads = cfg["heads"]
    out_dim = cfg["out_dim"]
    te = cfg["time_emb_dim"]
    depth = cfg["depth"]
    hp, wp = H // ps, W // ps
    S = hp * wp
    Cp = C * ps * ps
    P = ps * ps * out_dim
    Ppad = max(128, ((P + 127) // 128) * 128)     # lane-dense output columns

    # batch rows per grid step: fill the MXU M dimension (target Bb*S ~= 128 rows)
    Bb = max(1, min(B, max(1, 128 // S)))
    if (Bb * S) % 8 != 0 and Bb != B:             # keep blocks sublane-aligned
        Bb = B
    G = -(-B // Bb)                                # grid steps
    Bpad = G * Bb

    # Sinusoidal time features (tiny (B, te) slab -- pure data prep, like im2col).
    half = te // 2
    freqs = jnp.exp(jnp.arange(half, dtype=jnp.float32) * -(math.log(10000.0) / (half - 1)))
    ang = timestep.astype(jnp.float32)[:, None] * freqs[None, :]
    emb = jnp.concatenate([jnp.sin(ang), jnp.cos(ang)], axis=-1)        # (B, te)

    # im2col: Conv2d(k=ps, stride=ps) == per-patch linear over (C, ps, ps).
    xp = x.reshape(B, C, hp, ps, wp, ps).transpose(0, 2, 4, 1, 3, 5).reshape(B, S, Cp)

    use_cond = condition is not None
    cond = (condition.astype(jnp.float32).reshape(B, -1) if use_cond
            else jnp.zeros((B, 1), jnp.float32))
    Cd = cond.shape[-1]

    # pad batch up to a multiple of Bb (padded rows are discarded after the kernel)
    if Bpad != B:
        padb = Bpad - B
        emb = jnp.concatenate([emb, jnp.zeros((padb, te), emb.dtype)], 0)
        xp = jnp.concatenate([xp, jnp.zeros((padb, S, Cp), xp.dtype)], 0)
        cond = jnp.concatenate([cond, jnp.zeros((padb, Cd), cond.dtype)], 0)

    emb = emb.reshape(G, Bb, te)
    xp = xp.reshape(G, Bb * S, Cp)
    cond = cond.reshape(G, Bb, Cd)

    # kernel-side parameter dict (a few stacked slabs + layout-derived constants)
    kp = dict(params)
    kp["pos_tiled"] = jnp.tile(kp.pop("pos_embed"), (Bb, 1))                     # (Bb*S, D)
    kp["expand"] = jnp.repeat(jnp.eye(Bb, dtype=jnp.float32), S, axis=0)         # (Bb*S, Bb)
    kp["pix_w"] = jnp.pad(kp["pix_w"], ((0, 0), (0, Ppad - P)))                  # lane-dense
    kp["pix_b"] = jnp.pad(kp["pix_b"], ((0, 0), (0, Ppad - P)))

    leaves, tree = jax.tree_util.tree_flatten(kp)

    def _const_map(ndim):
        return lambda b: (0,) * ndim

    in_specs = [
        pl.BlockSpec((1, Bb, te), lambda b: (b, 0, 0)),            # time features
        pl.BlockSpec((1, Bb * S, Cp), lambda b: (b, 0, 0)),        # patch tokens
        pl.BlockSpec((1, Bb, Cd), lambda b: (b, 0, 0)),            # condition
    ] + [pl.BlockSpec(leaf.shape, _const_map(leaf.ndim)) for leaf in leaves]

    kern = functools.partial(_dit_kernel, tree=tree, heads=heads, depth=depth,
                             Bb=Bb, S=S, use_cond=use_cond, cond_scalar=(Cd == 1))

    out = pl.pallas_call(
        kern,
        out_shape=jax.ShapeDtypeStruct((G, Bb * S, Ppad), jnp.float32),
        grid=(G,),
        in_specs=in_specs,
        out_specs=pl.BlockSpec((1, Bb * S, Ppad), lambda b: (b, 0, 0)),
        compiler_params=pltpu.CompilerParams(dimension_semantics=("parallel",)),
    )(emb, xp, cond, *leaves)

    # slice away lane padding / batch padding, then unpatchify (same as PyTorch ref)
    out = out.reshape(Bpad, S, Ppad)[:B, :, :P]
    out = out.reshape(B, hp, wp, ps, ps, out_dim).transpose(0, 5, 1, 3, 2, 4)
    return out.reshape(B, out_dim, H, W)


# ---------------------------------------------------------------------------
# Deterministic synthetic parameters, already packed into the kernel slabs.
# (When porting real nn.Module weights: qkv_w[d] = in_proj_weight.T with columns
#  [q|k|v]; blk_sq_w[d] = [attn.out_proj.W.T, time_mlp.W.T, cross.v_proj.W.T,
#  cross.out_proj.W.T]; patch_w = conv weight reshaped to (C*p*p, D); blk_vec
#  rows follow the V_* slot map above.)
# ---------------------------------------------------------------------------

def init_params(cfg, seed=0):
    state = [jax.random.PRNGKey(seed)]

    def nk():
        state[0], k = jax.random.split(state[0])
        return k

    def w(*shape):
        return jax.random.normal(nk(), shape, jnp.float32) * 0.02

    D = cfg["embed_dim"]
    Cd = cfg["condition_dim"]
    C = cfg["image_channels"]
    ps = cfg["patch_size"]
    mlp = int(D * cfg["mlp_ratio"])
    S = (cfg["img_h"] // ps) * (cfg["img_w"] // ps)
    te = cfg["time_emb_dim"]
    P = ps * ps * cfg["out_dim"]
    depth = cfg["depth"]

    ones = lambda: jnp.ones((D,), jnp.float32)
    zeros = lambda: jnp.zeros((D,), jnp.float32)

    def vec_slab():
        return jnp.stack([
            ones(), zeros(),        # V_N1G, V_N1B     (norm1 gamma/beta)
            w(D),                   # V_ATTN_BO        (attn out-proj bias)
            w(D),                   # V_TIME_B         (time_mlp bias)
            w(D),                   # V_COND_B         (condition_mlp bias)
            ones(), zeros(),        # V_NCG, V_NCB     (norm_cross gamma/beta)
            w(D),                   # V_CROSS_BV       (cross v-proj bias)
            w(D),                   # V_CROSS_BO       (cross out-proj bias)
            ones(), zeros(),        # V_N2G, V_N2B     (norm2 gamma/beta)
            w(D),                   # V_FFN_B2         (ffn second bias)
        ])                          # (12, D)

    return {
        "tmlp_w1": w(te, te), "tmlp_b1": w(1, te),
        "tmlp_w2": w(te, D), "tmlp_b2": w(1, D),
        "patch_w": w(C * ps * ps, D), "patch_b": w(1, D),
        "pos_embed": w(S, D),
        # per-block slabs, stacked over depth (few large DMAs instead of ~54 tiny ones)
        "blk_qkv_w": w(depth, D, 3 * D), "blk_qkv_b": w(depth, 1, 3 * D),
        "blk_sq_w": w(depth, 4, D, D),        # [attn_wo | time_w | cross_wv | cross_wo]
        "blk_cond_w": w(depth, Cd, D),
        "blk_ffn_w1": w(depth, D, mlp), "blk_ffn_b1": w(depth, 1, mlp),
        "blk_ffn_w2": w(depth, mlp, D),
        "blk_vec": jnp.stack([vec_slab() for _ in range(depth)]),   # (depth, 12, D)
        "norm_g": jnp.ones((1, D), jnp.float32), "norm_b": jnp.zeros((1, D), jnp.float32),
        "pix_w": w(D, P), "pix_b": w(1, P),
    }


# ---------------------------------------------------------------------------
# Main
# ---------------------------------------------------------------------------

if __name__ == "__main__":
    cfg = dict(
        image_channels=1, out_dim=1,
        img_h=16, img_w=16, patch_size=4,
        embed_dim=64, condition_dim=1,
        depth=2, heads=4, mlp_ratio=4,
        time_emb_dim=32,
    )

    params = init_params(cfg, seed=0)

    key = jax.random.PRNGKey(0)
    kx, kt, kc = jax.random.split(key, 3)
    x = jax.random.normal(kx, (2, cfg["image_channels"], cfg["img_h"], cfg["img_w"]),
                          dtype=jnp.float32)
    timestep = jax.random.randint(kt, (2,), 0, 1000).astype(jnp.float32)
    condition = jax.random.normal(kc, (2, cfg["condition_dim"]), dtype=jnp.float32)

    fwd = jax.jit(lambda p, xi, ti, ci: simple_dit_forward(p, xi, ti, ci, cfg))
    y = fwd(params, x, timestep, condition)
    jax.block_until_ready(y)

    assert y.shape == (2, cfg["out_dim"], cfg["img_h"], cfg["img_w"]), y.shape
    assert bool(jnp.all(jnp.isfinite(y)))
    print("KERNEL_OK")
</pallas_src>

<mosaic_0001>
module attributes {stable_mosaic.version = 11 : i64} {
  func.func @_dit_kernel(%arg0: i32, %arg1: memref<1x2x32xf32, #tpu.memory_space<vmem>>, %arg2: memref<1x32x16xf32, #tpu.memory_space<vmem>>, %arg3: memref<1x2x1xf32, #tpu.memory_space<vmem>>, %arg4: memref<2x1x64xf32, #tpu.memory_space<vmem>>, %arg5: memref<2x1x256xf32, #tpu.memory_space<vmem>>, %arg6: memref<2x64x256xf32, #tpu.memory_space<vmem>>, %arg7: memref<2x256x64xf32, #tpu.memory_space<vmem>>, %arg8: memref<2x1x192xf32, #tpu.memory_space<vmem>>, %arg9: memref<2x64x192xf32, #tpu.memory_space<vmem>>, %arg10: memref<2x4x64x64xf32, #tpu.memory_space<vmem>>, %arg11: memref<2x12x64xf32, #tpu.memory_space<vmem>>, %arg12: memref<32x2xf32, #tpu.memory_space<vmem>>, %arg13: memref<1x64xf32, #tpu.memory_space<vmem>>, %arg14: memref<1x64xf32, #tpu.memory_space<vmem>>, %arg15: memref<1x64xf32, #tpu.memory_space<vmem>>, %arg16: memref<16x64xf32, #tpu.memory_space<vmem>>, %arg17: memref<1x128xf32, #tpu.memory_space<vmem>>, %arg18: memref<64x128xf32, #tpu.memory_space<vmem>>, %arg19: memref<32x64xf32, #tpu.memory_space<vmem>>, %arg20: memref<1x32xf32, #tpu.memory_space<vmem>>, %arg21: memref<1x64xf32, #tpu.memory_space<vmem>>, %arg22: memref<32x32xf32, #tpu.memory_space<vmem>>, %arg23: memref<32x64xf32, #tpu.memory_space<vmem>>, %arg24: memref<1x32x128xf32, #tpu.memory_space<vmem>>) attributes {dimension_semantics = [#tpu.dimension_semantics<parallel>], iteration_bounds = array<i64: 1>, scalar_prefetch = 0 : i64, scratch_operands = 0 : i64, tpu.core_type = #tpu.core_type<tc>, window_params = [{transform_indices = @transform_0, window_bounds = array<i64: 1, 2, 32>}, {transform_indices = @transform_1, window_bounds = array<i64: 1, 32, 16>}, {transform_indices = @transform_2, window_bounds = array<i64: 1, 2, 1>}, {pipeline_mode = #tpu.pipeline_mode<synchronous>, transform_indices = @transform_3, window_bounds = array<i64: 2, 1, 64>}, {pipeline_mode = #tpu.pipeline_mode<synchronous>, transform_indices = @transform_4, window_bounds = array<i64: 2, 1, 256>}, {pipeline_mode = #tpu.pipeline_mode<synchronous>, transform_indices = @transform_5, window_bounds = array<i64: 2, 64, 256>}, {pipeline_mode = #tpu.pipeline_mode<synchronous>, transform_indices = @transform_6, window_bounds = array<i64: 2, 256, 64>}, {pipeline_mode = #tpu.pipeline_mode<synchronous>, transform_indices = @transform_7, window_bounds = array<i64: 2, 1, 192>}, {pipeline_mode = #tpu.pipeline_mode<synchronous>, transform_indices = @transform_8, window_bounds = array<i64: 2, 64, 192>}, {pipeline_mode = #tpu.pipeline_mode<synchronous>, transform_indices = @transform_9, window_bounds = array<i64: 2, 4, 64, 64>}, {pipeline_mode = #tpu.pipeline_mode<synchronous>, transform_indices = @transform_10, window_bounds = array<i64: 2, 12, 64>}, {pipeline_mode = #tpu.pipeline_mode<synchronous>, transform_indices = @transform_11, window_bounds = array<i64: 32, 2>}, {pipeline_mode = #tpu.pipeline_mode<synchronous>, transform_indices = @transform_12, window_bounds = array<i64: 1, 64>}, {pipeline_mode = #tpu.pipeline_mode<synchronous>, transform_indices = @transform_13, window_bounds = array<i64: 1, 64>}, {pipeline_mode = #tpu.pipeline_mode<synchronous>, transform_indices = @transform_14, window_bounds = array<i64: 1, 64>}, {pipeline_mode = #tpu.pipeline_mode<synchronous>, transform_indices = @transform_15, window_bounds = array<i64: 16, 64>}, {pipeline_mode = #tpu.pipeline_mode<synchronous>, transform_indices = @transform_16, window_bounds = array<i64: 1, 128>}, {pipeline_mode = #tpu.pipeline_mode<synchronous>, transform_indices = @transform_17, window_bounds = array<i64: 64, 128>}, {pipeline_mode = #tpu.pipeline_mode<synchronous>, transform_indices = @transform_18, window_bounds = array<i64: 32, 64>}, {pipeline_mode = #tpu.pipeline_mode<synchronous>, transform_indices = @transform_19, window_bounds = array<i64: 1, 32>}, {pipeline_mode = #tpu.pipeline_mode<synchronous>, transform_indices = @transform_20, window_bounds = array<i64: 1, 64>}, {pipeline_mode = #tpu.pipeline_mode<synchronous>, transform_indices = @transform_21, window_bounds = array<i64: 32, 32>}, {pipeline_mode = #tpu.pipeline_mode<synchronous>, transform_indices = @transform_22, window_bounds = array<i64: 32, 64>}, {transform_indices = @transform_23, window_bounds = array<i64: 1, 32, 128>}]} {
    %c0 = arith.constant 0 : index
    %c0_0 = arith.constant 0 : index
    %c0_1 = arith.constant 0 : index
    %0 = vector.load %arg1[%c0, %c0_0, %c0_1] : memref<1x2x32xf32, #tpu.memory_space<vmem>>, vector<1x2x32xf32>
    %1 = vector.shape_cast %0 : vector<1x2x32xf32> to vector<2x32xf32>
    %c0_2 = arith.constant 0 : index
    %c0_3 = arith.constant 0 : index
    %2 = vector.load %arg22[%c0_2, %c0_3] : memref<32x32xf32, #tpu.memory_space<vmem>>, vector<32x32xf32>
    %cst = arith.constant dense<0.000000e+00> : vector<2x32xf32>
    %3 = tpu.matmul %1, %2, %cst {dimension_numbers = #tpu.dot_dimension_numbers<[1], [0], [0], [1], [0, 0, 1, 1], [], []>} : vector<2x32xf32>, vector<32x32xf32>, vector<2x32xf32> -> vector<2x32xf32>
    %c0_4 = arith.constant 0 : index
    %c0_5 = arith.constant 0 : index
    %4 = vector.load %arg20[%c0_4, %c0_5] : memref<1x32xf32, #tpu.memory_space<vmem>>, vector<1x32xf32>
    %5 = vector.broadcast %4 : vector<1x32xf32> to vector<2x32xf32>
    %6 = arith.addf %3, %5 : vector<2x32xf32>
    %cst_6 = arith.constant 0.000000e+00 : f32
    %7 = vector.broadcast %cst_6 : f32 to vector<2x32xf32>
    %8 = arith.maximumf %6, %7 : vector<2x32xf32>
    %c0_7 = arith.constant 0 : index
    %c0_8 = arith.constant 0 : index
    %9 = vector.load %arg23[%c0_7, %c0_8] : memref<32x64xf32, #tpu.memory_space<vmem>>, vector<32x64xf32>
    %cst_9 = arith.constant dense<0.000000e+00> : vector<2x64xf32>
    %10 = tpu.matmul %8, %9, %cst_9 {dimension_numbers = #tpu.dot_dimension_numbers<[1], [0], [0], [1], [0, 0, 1, 1], [], []>} : vector<2x32xf32>, vector<32x64xf32>, vector<2x64xf32> -> vector<2x64xf32>
    %c0_10 = arith.constant 0 : index
    %c0_11 = arith.constant 0 : index
    %11 = vector.load %arg21[%c0_10, %c0_11] : memref<1x64xf32, #tpu.memory_space<vmem>>, vector<1x64xf32>
    %12 = vector.broadcast %11 : vector<1x64xf32> to vector<2x64xf32>
    %13 = arith.addf %10, %12 : vector<2x64xf32>
    %c0_12 = arith.constant 0 : index
    %c0_13 = arith.constant 0 : index
    %c0_14 = arith.constant 0 : index
    %14 = vector.load %arg2[%c0_12, %c0_13, %c0_14] : memref<1x32x16xf32, #tpu.memory_space<vmem>>, vector<1x32x16xf32>
    %15 = vector.shape_cast %14 : vector<1x32x16xf32> to vector<32x16xf32>
    %c0_15 = arith.constant 0 : index
    %c0_16 = arith.constant 0 : index
    %16 = vector.load %arg16[%c0_15, %c0_16] : memref<16x64xf32, #tpu.memory_space<vmem>>, vector<16x64xf32>
    %cst_17 = arith.constant dense<0.000000e+00> : vector<32x64xf32>
    %17 = tpu.matmul %15, %16, %cst_17 {dimension_numbers = #tpu.dot_dimension_numbers<[1], [0], [0], [1], [0, 0, 1, 1], [], []>} : vector<32x16xf32>, vector<16x64xf32>, vector<32x64xf32> -> vector<32x64xf32>
    %c0_18 = arith.constant 0 : index
    %c0_19 = arith.constant 0 : index
    %18 = vector.load %arg15[%c0_18, %c0_19] : memref<1x64xf32, #tpu.memory_space<vmem>>, vector<1x64xf32>
    %19 = vector.broadcast %18 : vector<1x64xf32> to vector<32x64xf32>
    %20 = arith.addf %17, %19 : vector<32x64xf32>
    %c0_20 = arith.constant 0 : index
    %c0_21 = arith.constant 0 : index
    %21 = vector.load %arg19[%c0_20, %c0_21] : memref<32x64xf32, #tpu.memory_space<vmem>>, vector<32x64xf32>
    %22 = arith.addf %20, %21 : vector<32x64xf32>
    %c0_22 = arith.constant 0 : index
    %c0_23 = arith.constant 0 : index
    %23 = vector.load %arg12[%c0_22, %c0_23] : memref<32x2xf32, #tpu.memory_space<vmem>>, vector<32x2xf32>
    %c0_24 = arith.constant 0 : index
    %c0_25 = arith.constant 0 : index
    %c0_26 = arith.constant 0 : index
    %24 = vector.load %arg3[%c0_24, %c0_25, %c0_26] : memref<1x2x1xf32, #tpu.memory_space<vmem>>, vector<1x2x1xf32>
    %25 = vector.shape_cast %24 : vector<1x2x1xf32> to vector<2x1xf32>
    %c0_27 = arith.constant 0 : index
    %c0_28 = arith.constant 0 : index
    %c0_29 = arith.constant 0 : index
    %26 = vector.load %arg11[%c0_27, %c0_28, %c0_29] : memref<2x12x64xf32, #tpu.memory_space<vmem>>, vector<1x12x64xf32>
    %27 = vector.shape_cast %26 : vector<1x12x64xf32> to vector<12x64xf32>
    %28 = vector.extract_strided_slice %27 {offsets = [0, 0], sizes = [1, 64], strides = [1, 1]} : vector<12x64xf32> to vector<1x64xf32>
    %29 = vector.extract_strided_slice %27 {offsets = [1, 0], sizes = [1, 64], strides = [1, 1]} : vector<12x64xf32> to vector<1x64xf32>
    %cst_30 = arith.constant dense<0.000000e+00> : vector<32xf32>
    %30 = vector.multi_reduction <add>, %22, %cst_30 [1] : vector<32x64xf32> to vector<32xf32>
    %31 = vector.shape_cast %30 : vector<32xf32> to vector<32x1xf32>
    %cst_31 = arith.constant 6.400000e+01 : f32
    %32 = vector.broadcast %cst_31 : f32 to vector<32x1xf32>
    %33 = arith.divf %31, %32 : vector<32x1xf32>
    %34 = vector.broadcast %33 : vector<32x1xf32> to vector<32x64xf32>
    %35 = arith.subf %22, %34 : vector<32x64xf32>
    %36 = arith.mulf %35, %35 : vector<32x64xf32>
    %cst_32 = arith.constant dense<0.000000e+00> : vector<32xf32>
    %37 = vector.multi_reduction <add>, %36, %cst_32 [1] : vector<32x64xf32> to vector<32xf32>
    %38 = vector.shape_cast %37 : vector<32xf32> to vector<32x1xf32>
    %cst_33 = arith.constant 6.400000e+01 : f32
    %39 = vector.broadcast %cst_33 : f32 to vector<32x1xf32>
    %40 = arith.divf %38, %39 : vector<32x1xf32>
    %41 = vector.broadcast %33 : vector<32x1xf32> to vector<32x64xf32>
    %42 = arith.subf %22, %41 : vector<32x64xf32>
    %cst_34 = arith.constant 9.99999974E-6 : f32
    %43 = vector.broadcast %cst_34 : f32 to vector<32x1xf32>
    %44 = arith.addf %40, %43 : vector<32x1xf32>
    %45 = math.rsqrt %44 : vector<32x1xf32>
    %46 = vector.broadcast %45 : vector<32x1xf32> to vector<32x64xf32>
    %47 = arith.mulf %42, %46 : vector<32x64xf32>
    %48 = vector.broadcast %28 : vector<1x64xf32> to vector<32x64xf32>
    %49 = arith.mulf %47, %48 : vector<32x64xf32>
    %50 = vector.broadcast %29 : vector<1x64xf32> to vector<32x64xf32>
    %51 = arith.addf %49, %50 : vector<32x64xf32>
    %c0_35 = arith.constant 0 : index
    %c0_36 = arith.constant 0 : index
    %c0_37 = arith.constant 0 : index
    %52 = vector.load %arg9[%c0_35, %c0_36, %c0_37] : memref<2x64x192xf32, #tpu.memory_space<vmem>>, vector<1x64x192xf32>
    %53 = vector.shape_cast %52 : vector<1x64x192xf32> to vector<64x192xf32>
    %cst_38 = arith.constant dense<0.000000e+00> : vector<32x192xf32>
    %54 = tpu.matmul %51, %53, %cst_38 {dimension_numbers = #tpu.dot_dimension_numbers<[1], [0], [0], [1], [0, 0, 1, 1], [], []>} : vector<32x64xf32>, vector<64x192xf32>, vector<32x192xf32> -> vector<32x192xf32>
    %c0_39 = arith.constant 0 : index
    %c0_40 = arith.constant 0 : index
    %c0_41 = arith.constant 0 : index
    %55 = vector.load %arg8[%c0_39, %c0_40, %c0_41] : memref<2x1x192xf32, #tpu.memory_space<vmem>>, vector<1x1x192xf32>
    %56 = vector.shape_cast %55 : vector<1x1x192xf32> to vector<1x192xf32>
    %57 = vector.broadcast %56 : vector<1x192xf32> to vector<32x192xf32>
    %58 = arith.addf %54, %57 : vector<32x192xf32>
    %59 = vector.extract_strided_slice %58 {offsets = [0, 0], sizes = [32, 64], strides = [1, 1]} : vector<32x192xf32> to vector<32x64xf32>
    %cst_42 = arith.constant 2.500000e-01 : f32
    %60 = vector.broadcast %cst_42 : f32 to vector<32x64xf32>
    %61 = arith.mulf %59, %60 : vector<32x64xf32>
    %62 = vector.extract_strided_slice %58 {offsets = [0, 64], sizes = [32, 64], strides = [1, 1]} : vector<32x192xf32> to vector<32x64xf32>
    %63 = vector.extract_strided_slice %58 {offsets = [0, 128], sizes = [32, 64], strides = [1, 1]} : vector<32x192xf32> to vector<32x64xf32>
    %c0_43 = arith.constant 0 : index
    %c0_44 = arith.constant 0 : index
    %c0_45 = arith.constant 0 : index
    %c0_46 = arith.constant 0 : index
    %64 = vector.load %arg10[%c0_43, %c0_44, %c0_45, %c0_46] : memref<2x4x64x64xf32, #tpu.memory_space<vmem>>, vector<1x1x64x64xf32>
    %65 = vector.shape_cast %64 : vector<1x1x64x64xf32> to vector<64x64xf32>
    %66 = vector.extract_strided_slice %61 {offsets = [0, 0], sizes = [16, 64], strides = [1, 1]} : vector<32x64xf32> to vector<16x64xf32>
    %67 = vector.extract_strided_slice %62 {offsets = [0, 0], sizes = [16, 64], strides = [1, 1]} : vector<32x64xf32> to vector<16x64xf32>
    %68 = vector.extract_strided_slice %63 {offsets = [0, 0], sizes = [16, 64], strides = [1, 1]} : vector<32x64xf32> to vector<16x64xf32>
    %cst_47 = arith.constant 0.000000e+00 : f32
    %69 = vector.broadcast %cst_47 : f32 to vector<16x64xf32>
    %70 = vector.extract_strided_slice %66 {offsets = [0, 0], sizes = [16, 16], strides = [1, 1]} : vector<16x64xf32> to vector<16x16xf32>
    %71 = vector.extract_strided_slice %67 {offsets = [0, 0], sizes = [16, 16], strides = [1, 1]} : vector<16x64xf32> to vector<16x16xf32>
    %cst_48 = arith.constant dense<0.000000e+00> : vector<16x16xf32>
    %72 = tpu.matmul %70, %71, %cst_48 {dimension_numbers = #tpu.dot_dimension_numbers<[1], [1], [0], [0], [0, 0, 1, 0], [], []>} : vector<16x16xf32>, vector<16x16xf32>, vector<16x16xf32> -> vector<16x16xf32>
    %cst_49 = arith.constant dense<0xFF800000> : vector<16xf32>
    %73 = vector.multi_reduction <maximumf>, %72, %cst_49 [1] : vector<16x16xf32> to vector<16xf32>
    %74 = vector.shape_cast %73 : vector<16xf32> to vector<16x1xf32>
    %75 = vector.broadcast %74 : vector<16x1xf32> to vector<16x16xf32>
    %76 = arith.subf %72, %75 : vector<16x16xf32>
    %77 = math.exp %76 : vector<16x16xf32>
    %cst_50 = arith.constant dense<0.000000e+00> : vector<16xf32>
    %78 = vector.multi_reduction <add>, %77, %cst_50 [1] : vector<16x16xf32> to vector<16xf32>
    %79 = vector.shape_cast %78 : vector<16xf32> to vector<16x1xf32>
    %80 = tpu.reciprocal %79 {approx = true} : vector<16x1xf32> -> vector<16x1xf32>
    %81 = vector.broadcast %80 : vector<16x1xf32> to vector<16x16xf32>
    %82 = arith.mulf %77, %81 : vector<16x16xf32>
    %83 = vector.extract_strided_slice %68 {offsets = [0, 0], sizes = [16, 16], strides = [1, 1]} : vector<16x64xf32> to vector<16x16xf32>
    %cst_51 = arith.constant dense<0.000000e+00> : vector<16x16xf32>
    %84 = tpu.matmul %82, %83, %cst_51 {dimension_numbers = #tpu.dot_dimension_numbers<[1], [0], [0], [1], [0, 0, 1, 1], [], []>} : vector<16x16xf32>, vector<16x16xf32>, vector<16x16xf32> -> vector<16x16xf32>
    %85 = vector.extract_strided_slice %65 {offsets = [0, 0], sizes = [16, 64], strides = [1, 1]} : vector<64x64xf32> to vector<16x64xf32>
    %cst_52 = arith.constant dense<0.000000e+00> : vector<16x64xf32>
    %86 = tpu.matmul %84, %85, %cst_52 {dimension_numbers = #tpu.dot_dimension_numbers<[1], [0], [0], [1], [0, 0, 1, 1], [], []>} : vector<16x16xf32>, vector<16x64xf32>, vector<16x64xf32> -> vector<16x64xf32>
    %87 = arith.addf %69, %86 : vector<16x64xf32>
    %88 = vector.extract_strided_slice %66 {offsets = [0, 16], sizes = [16, 16], strides = [1, 1]} : vector<16x64xf32> to vector<16x16xf32>
    %89 = vector.extract_strided_slice %67 {offsets = [0, 16], sizes = [16, 16], strides = [1, 1]} : vector<16x64xf32> to vector<16x16xf32>
    %cst_53 = arith.constant dense<0.000000e+00> : vector<16x16xf32>
    %90 = tpu.matmul %88, %89, %cst_53 {dimension_numbers = #tpu.dot_dimension_numbers<[1], [1], [0], [0], [0, 0, 1, 0], [], []>} : vector<16x16xf32>, vector<16x16xf32>, vector<16x16xf32> -> vector<16x16xf32>
    %cst_54 = arith.constant dense<0xFF800000> : vector<16xf32>
    %91 = vector.multi_reduction <maximumf>, %90, %cst_54 [1] : vector<16x16xf32> to vector<16xf32>
    %92 = vector.shape_cast %91 : vector<16xf32> to vector<16x1xf32>
    %93 = vector.broadcast %92 : vector<16x1xf32> to vector<16x16xf32>
    %94 = arith.subf %90, %93 : vector<16x16xf32>
    %95 = math.exp %94 : vector<16x16xf32>
    %cst_55 = arith.constant dense<0.000000e+00> : vector<16xf32>
    %96 = vector.multi_reduction <add>, %95, %cst_55 [1] : vector<16x16xf32> to vector<16xf32>
    %97 = vector.shape_cast %96 : vector<16xf32> to vector<16x1xf32>
    %98 = tpu.reciprocal %97 {approx = true} : vector<16x1xf32> -> vector<16x1xf32>
    %99 = vector.broadcast %98 : vector<16x1xf32> to vector<16x16xf32>
    %100 = arith.mulf %95, %99 : vector<16x16xf32>
    %101 = vector.extract_strided_slice %68 {offsets = [0, 16], sizes = [16, 16], strides = [1, 1]} : vector<16x64xf32> to vector<16x16xf32>
    %cst_56 = arith.constant dense<0.000000e+00> : vector<16x16xf32>
    %102 = tpu.matmul %100, %101, %cst_56 {dimension_numbers = #tpu.dot_dimension_numbers<[1], [0], [0], [1], [0, 0, 1, 1], [], []>} : vector<16x16xf32>, vector<16x16xf32>, vector<16x16xf32> -> vector<16x16xf32>
    %103 = vector.extract_strided_slice %65 {offsets = [16, 0], sizes = [16, 64], strides = [1, 1]} : vector<64x64xf32> to vector<16x64xf32>
    %cst_57 = arith.constant dense<0.000000e+00> : vector<16x64xf32>
    %104 = tpu.matmul %102, %103, %cst_57 {dimension_numbers = #tpu.dot_dimension_numbers<[1], [0], [0], [1], [0, 0, 1, 1], [], []>} : vector<16x16xf32>, vector<16x64xf32>, vector<16x64xf32> -> vector<16x64xf32>
    %105 = arith.addf %87, %104 : vector<16x64xf32>
    %106 = vector.extract_strided_slice %66 {offsets = [0, 32], sizes = [16, 16], strides = [1, 1]} : vector<16x64xf32> to vector<16x16xf32>
    %107 = vector.extract_strided_slice %67 {offsets = [0, 32], sizes = [16, 16], strides = [1, 1]} : vector<16x64xf32> to vector<16x16xf32>
    %cst_58 = arith.constant dense<0.000000e+00> : vector<16x16xf32>
    %108 = tpu.matmul %106, %107, %cst_58 {dimension_numbers = #tpu.dot_dimension_numbers<[1], [1], [0], [0], [0, 0, 1, 0], [], []>} : vector<16x16xf32>, vector<16x16xf32>, vector<16x16xf32> -> vector<16x16xf32>
    %cst_59 = arith.constant dense<0xFF800000> : vector<16xf32>
    %109 = vector.multi_reduction <maximumf>, %108, %cst_59 [1] : vector<16x16xf32> to vector<16xf32>
    %110 = vector.shape_cast %109 : vector<16xf32> to vector<16x1xf32>
    %111 = vector.broadcast %110 : vector<16x1xf32> to vector<16x16xf32>
    %112 = arith.subf %108, %111 : vector<16x16xf32>
    %113 = math.exp %112 : vector<16x16xf32>
    %cst_60 = arith.constant dense<0.000000e+00> : vector<16xf32>
    %114 = vector.multi_reduction <add>, %113, %cst_60 [1] : vector<16x16xf32> to vector<16xf32>
    %115 = vector.shape_cast %114 : vector<16xf32> to vector<16x1xf32>
    %116 = tpu.reciprocal %115 {approx = true} : vector<16x1xf32> -> vector<16x1xf32>
    %117 = vector.broadcast %116 : vector<16x1xf32> to vector<16x16xf32>
    %118 = arith.mulf %113, %117 : vector<16x16xf32>
    %119 = vector.extract_strided_slice %68 {offsets = [0, 32], sizes = [16, 16], strides = [1, 1]} : vector<16x64xf32> to vector<16x16xf32>
    %cst_61 = arith.constant dense<0.000000e+00> : vector<16x16xf32>
    %120 = tpu.matmul %118, %119, %cst_61 {dimension_numbers = #tpu.dot_dimension_numbers<[1], [0], [0], [1], [0, 0, 1, 1], [], []>} : vector<16x16xf32>, vector<16x16xf32>, vector<16x16xf32> -> vector<16x16xf32>
    %121 = vector.extract_strided_slice %65 {offsets = [32, 0], sizes = [16, 64], strides = [1, 1]} : vector<64x64xf32> to vector<16x64xf32>
    %cst_62 = arith.constant dense<0.000000e+00> : vector<16x64xf32>
    %122 = tpu.matmul %120, %121, %cst_62 {dimension_numbers = #tpu.dot_dimension_numbers<[1], [0], [0], [1], [0, 0, 1, 1], [], []>} : vector<16x16xf32>, vector<16x64xf32>, vector<16x64xf32> -> vector<16x64xf32>
    %123 = arith.addf %105, %122 : vector<16x64xf32>
    %124 = vector.extract_strided_slice %66 {offsets = [0, 48], sizes = [16, 16], strides = [1, 1]} : vector<16x64xf32> to vector<16x16xf32>
    %125 = vector.extract_strided_slice %67 {offsets = [0, 48], sizes = [16, 16], strides = [1, 1]} : vector<16x64xf32> to vector<16x16xf32>
    %cst_63 = arith.constant dense<0.000000e+00> : vector<16x16xf32>
    %126 = tpu.matmul %124, %125, %cst_63 {dimension_numbers = #tpu.dot_dimension_numbers<[1], [1], [0], [0], [0, 0, 1, 0], [], []>} : vector<16x16xf32>, vector<16x16xf32>, vector<16x16xf32> -> vector<16x16xf32>
    %cst_64 = arith.constant dense<0xFF800000> : vector<16xf32>
    %127 = vector.multi_reduction <maximumf>, %126, %cst_64 [1] : vector<16x16xf32> to vector<16xf32>
    %128 = vector.shape_cast %127 : vector<16xf32> to vector<16x1xf32>
    %129 = vector.broadcast %128 : vector<16x1xf32> to vector<16x16xf32>
    %130 = arith.subf %126, %129 : vector<16x16xf32>
    %131 = math.exp %130 : vector<16x16xf32>
    %cst_65 = arith.constant dense<0.000000e+00> : vector<16xf32>
    %132 = vector.multi_reduction <add>, %131, %cst_65 [1] : vector<16x16xf32> to vector<16xf32>
    %133 = vector.shape_cast %132 : vector<16xf32> to vector<16x1xf32>
    %134 = tpu.reciprocal %133 {approx = true} : vector<16x1xf32> -> vector<16x1xf32>
    %135 = vector.broadcast %134 : vector<16x1xf32> to vector<16x16xf32>
    %136 = arith.mulf %131, %135 : vector<16x16xf32>
    %137 = vector.extract_strided_slice %68 {offsets = [0, 48], sizes = [16, 16], strides = [1, 1]} : vector<16x64xf32> to vector<16x16xf32>
    %cst_66 = arith.constant dense<0.000000e+00> : vector<16x16xf32>
    %138 = tpu.matmul %136, %137, %cst_66 {dimension_numbers = #tpu.dot_dimension_numbers<[1], [0], [0], [1], [0, 0, 1, 1], [], []>} : vector<16x16xf32>, vector<16x16xf32>, vector<16x16xf32> -> vector<16x16xf32>
    %139 = vector.extract_strided_slice %65 {offsets = [48, 0], sizes = [16, 64], strides = [1, 1]} : vector<64x64xf32> to vector<16x64xf32>
    %cst_67 = arith.constant dense<0.000000e+00> : vector<16x64xf32>
    %140 = tpu.matmul %138, %139, %cst_67 {dimension_numbers = #tpu.dot_dimension_numbers<[1], [0], [0], [1], [0, 0, 1, 1], [], []>} : vector<16x16xf32>, vector<16x64xf32>, vector<16x64xf32> -> vector<16x64xf32>
    %141 = arith.addf %123, %140 : vector<16x64xf32>
    %142 = vector.extract_strided_slice %61 {offsets = [16, 0], sizes = [16, 64], strides = [1, 1]} : vector<32x64xf32> to vector<16x64xf32>
    %143 = vector.extract_strided_slice %62 {offsets = [16, 0], sizes = [16, 64], strides = [1, 1]} : vector<32x64xf32> to vector<16x64xf32>
    %144 = vector.extract_strided_slice %63 {offsets = [16, 0], sizes = [16, 64], strides = [1, 1]} : vector<32x64xf32> to vector<16x64xf32>
    %cst_68 = arith.constant 0.000000e+00 : f32
    %145 = vector.broadcast %cst_68 : f32 to vector<16x64xf32>
    %146 = vector.extract_strided_slice %142 {offsets = [0, 0], sizes = [16, 16], strides = [1, 1]} : vector<16x64xf32> to vector<16x16xf32>
    %147 = vector.extract_strided_slice %143 {offsets = [0, 0], sizes = [16, 16], strides = [1, 1]} : vector<16x64xf32> to vector<16x16xf32>
    %cst_69 = arith.constant dense<0.000000e+00> : vector<16x16xf32>
    %148 = tpu.matmul %146, %147, %cst_69 {dimension_numbers = #tpu.dot_dimension_numbers<[1], [1], [0], [0], [0, 0, 1, 0], [], []>} : vector<16x16xf32>, vector<16x16xf32>, vector<16x16xf32> -> vector<16x16xf32>
    %cst_70 = arith.constant dense<0xFF800000> : vector<16xf32>
    %149 = vector.multi_reduction <maximumf>, %148, %cst_70 [1] : vector<16x16xf32> to vector<16xf32>
    %150 = vector.shape_cast %149 : vector<16xf32> to vector<16x1xf32>
    %151 = vector.broadcast %150 : vector<16x1xf32> to vector<16x16xf32>
    %152 = arith.subf %148, %151 : vector<16x16xf32>
    %153 = math.exp %152 : vector<16x16xf32>
    %cst_71 = arith.constant dense<0.000000e+00> : vector<16xf32>
    %154 = vector.multi_reduction <add>, %153, %cst_71 [1] : vector<16x16xf32> to vector<16xf32>
    %155 = vector.shape_cast %154 : vector<16xf32> to vector<16x1xf32>
    %156 = tpu.reciprocal %155 {approx = true} : vector<16x1xf32> -> vector<16x1xf32>
    %157 = vector.broadcast %156 : vector<16x1xf32> to vector<16x16xf32>
    %158 = arith.mulf %153, %157 : vector<16x16xf32>
    %159 = vector.extract_strided_slice %144 {offsets = [0, 0], sizes = [16, 16], strides = [1, 1]} : vector<16x64xf32> to vector<16x16xf32>
    %cst_72 = arith.constant dense<0.000000e+00> : vector<16x16xf32>
    %160 = tpu.matmul %158, %159, %cst_72 {dimension_numbers = #tpu.dot_dimension_numbers<[1], [0], [0], [1], [0, 0, 1, 1], [], []>} : vector<16x16xf32>, vector<16x16xf32>, vector<16x16xf32> -> vector<16x16xf32>
    %161 = vector.extract_strided_slice %65 {offsets = [0, 0], sizes = [16, 64], strides = [1, 1]} : vector<64x64xf32> to vector<16x64xf32>
    %cst_73 = arith.constant dense<0.000000e+00> : vector<16x64xf32>
    %162 = tpu.matmul %160, %161, %cst_73 {dimension_numbers = #tpu.dot_dimension_numbers<[1], [0], [0], [1], [0, 0, 1, 1], [], []>} : vector<16x16xf32>, vector<16x64xf32>, vector<16x64xf32> -> vector<16x64xf32>
    %163 = arith.addf %145, %162 : vector<16x64xf32>
    %164 = vector.extract_strided_slice %142 {offsets = [0, 16], sizes = [16, 16], strides = [1, 1]} : vector<16x64xf32> to vector<16x16xf32>
    %165 = vector.extract_strided_slice %143 {offsets = [0, 16], sizes = [16, 16], strides = [1, 1]} : vector<16x64xf32> to vector<16x16xf32>
    %cst_74 = arith.constant dense<0.000000e+00> : vector<16x16xf32>
    %166 = tpu.matmul %164, %165, %cst_74 {dimension_numbers = #tpu.dot_dimension_numbers<[1], [1], [0], [0], [0, 0, 1, 0], [], []>} : vector<16x16xf32>, vector<16x16xf32>, vector<16x16xf32> -> vector<16x16xf32>
    %cst_75 = arith.constant dense<0xFF800000> : vector<16xf32>
    %167 = vector.multi_reduction <maximumf>, %166, %cst_75 [1] : vector<16x16xf32> to vector<16xf32>
    %168 = vector.shape_cast %167 : vector<16xf32> to vector<16x1xf32>
    %169 = vector.broadcast %168 : vector<16x1xf32> to vector<16x16xf32>
    %170 = arith.subf %166, %169 : vector<16x16xf32>
    %171 = math.exp %170 : vector<16x16xf32>
    %cst_76 = arith.constant dense<0.000000e+00> : vector<16xf32>
    %172 = vector.multi_reduction <add>, %171, %cst_76 [1] : vector<16x16xf32> to vector<16xf32>
    %173 = vector.shape_cast %172 : vector<16xf32> to vector<16x1xf32>
    %174 = tpu.reciprocal %173 {approx = true} : vector<16x1xf32> -> vector<16x1xf32>
    %175 = vector.broadcast %174 : vector<16x1xf32> to vector<16x16xf32>
    %176 = arith.mulf %171, %175 : vector<16x16xf32>
    %177 = vector.extract_strided_slice %144 {offsets = [0, 16], sizes = [16, 16], strides = [1, 1]} : vector<16x64xf32> to vector<16x16xf32>
    %cst_77 = arith.constant dense<0.000000e+00> : vector<16x16xf32>
    %178 = tpu.matmul %176, %177, %cst_77 {dimension_numbers = #tpu.dot_dimension_numbers<[1], [0], [0], [1], [0, 0, 1, 1], [], []>} : vector<16x16xf32>, vector<16x16xf32>, vector<16x16xf32> -> vector<16x16xf32>
    %179 = vector.extract_strided_slice %65 {offsets = [16, 0], sizes = [16, 64], strides = [1, 1]} : vector<64x64xf32> to vector<16x64xf32>
    %cst_78 = arith.constant dense<0.000000e+00> : vector<16x64xf32>
    %180 = tpu.matmul %178, %179, %cst_78 {dimension_numbers = #tpu.dot_dimension_numbers<[1], [0], [0], [1], [0, 0, 1, 1], [], []>} : vector<16x16xf32>, vector<16x64xf32>, vector<16x64xf32> -> vector<16x64xf32>
    %181 = arith.addf %163, %180 : vector<16x64xf32>
    %182 = vector.extract_strided_slice %142 {offsets = [0, 32], sizes = [16, 16], strides = [1, 1]} : vector<16x64xf32> to vector<16x16xf32>
    %183 = vector.extract_strided_slice %143 {offsets = [0, 32], sizes = [16, 16], strides = [1, 1]} : vector<16x64xf32> to vector<16x16xf32>
    %cst_79 = arith.constant dense<0.000000e+00> : vector<16x16xf32>
    %184 = tpu.matmul %182, %183, %cst_79 {dimension_numbers = #tpu.dot_dimension_numbers<[1], [1], [0], [0], [0, 0, 1, 0], [], []>} : vector<16x16xf32>, vector<16x16xf32>, vector<16x16xf32> -> vector<16x16xf32>
    %cst_80 = arith.constant dense<0xFF800000> : vector<16xf32>
    %185 = vector.multi_reduction <maximumf>, %184, %cst_80 [1] : vector<16x16xf32> to vector<16xf32>
    %186 = vector.shape_cast %185 : vector<16xf32> to vector<16x1xf32>
    %187 = vector.broadcast %186 : vector<16x1xf32> to vector<16x16xf32>
    %188 = arith.subf %184, %187 : vector<16x16xf32>
    %189 = math.exp %188 : vector<16x16xf32>
    %cst_81 = arith.constant dense<0.000000e+00> : vector<16xf32>
    %190 = vector.multi_reduction <add>, %189, %cst_81 [1] : vector<16x16xf32> to vector<16xf32>
    %191 = vector.shape_cast %190 : vector<16xf32> to vector<16x1xf32>
    %192 = tpu.reciprocal %191 {approx = true} : vector<16x1xf32> -> vector<16x1xf32>
    %193 = vector.broadcast %192 : vector<16x1xf32> to vector<16x16xf32>
    %194 = arith.mulf %189, %193 : vector<16x16xf32>
    %195 = vector.extract_strided_slice %144 {offsets = [0, 32], sizes = [16, 16], strides = [1, 1]} : vector<16x64xf32> to vector<16x16xf32>
    %cst_82 = arith.constant dense<0.000000e+00> : vector<16x16xf32>
    %196 = tpu.matmul %194, %195, %cst_82 {dimension_numbers = #tpu.dot_dimension_numbers<[1], [0], [0], [1], [0, 0, 1, 1], [], []>} : vector<16x16xf32>, vector<16x16xf32>, vector<16x16xf32> -> vector<16x16xf32>
    %197 = vector.extract_strided_slice %65 {offsets = [32, 0], sizes = [16, 64], strides = [1, 1]} : vector<64x64xf32> to vector<16x64xf32>
    %cst_83 = arith.constant dense<0.000000e+00> : vector<16x64xf32>
    %198 = tpu.matmul %196, %197, %cst_83 {dimension_numbers = #tpu.dot_dimension_numbers<[1], [0], [0], [1], [0, 0, 1, 1], [], []>} : vector<16x16xf32>, vector<16x64xf32>, vector<16x64xf32> -> vector<16x64xf32>
    %199 = arith.addf %181, %198 : vector<16x64xf32>
    %200 = vector.extract_strided_slice %142 {offsets = [0, 48], sizes = [16, 16], strides = [1, 1]} : vector<16x64xf32> to vector<16x16xf32>
    %201 = vector.extract_strided_slice %143 {offsets = [0, 48], sizes = [16, 16], strides = [1, 1]} : vector<16x64xf32> to vector<16x16xf32>
    %cst_84 = arith.constant dense<0.000000e+00> : vector<16x16xf32>
    %202 = tpu.matmul %200, %201, %cst_84 {dimension_numbers = #tpu.dot_dimension_numbers<[1], [1], [0], [0], [0, 0, 1, 0], [], []>} : vector<16x16xf32>, vector<16x16xf32>, vector<16x16xf32> -> vector<16x16xf32>
    %cst_85 = arith.constant dense<0xFF800000> : vector<16xf32>
    %203 = vector.multi_reduction <maximumf>, %202, %cst_85 [1] : vector<16x16xf32> to vector<16xf32>
    %204 = vector.shape_cast %203 : vector<16xf32> to vector<16x1xf32>
    %205 = vector.broadcast %204 : vector<16x1xf32> to vector<16x16xf32>
    %206 = arith.subf %202, %205 : vector<16x16xf32>
    %207 = math.exp %206 : vector<16x16xf32>
    %cst_86 = arith.constant dense<0.000000e+00> : vector<16xf32>
    %208 = vector.multi_reduction <add>, %207, %cst_86 [1] : vector<16x16xf32> to vector<16xf32>
    %209 = vector.shape_cast %208 : vector<16xf32> to vector<16x1xf32>
    %210 = tpu.reciprocal %209 {approx = true} : vector<16x1xf32> -> vector<16x1xf32>
    %211 = vector.broadcast %210 : vector<16x1xf32> to vector<16x16xf32>
    %212 = arith.mulf %207, %211 : vector<16x16xf32>
    %213 = vector.extract_strided_slice %144 {offsets = [0, 48], sizes = [16, 16], strides = [1, 1]} : vector<16x64xf32> to vector<16x16xf32>
    %cst_87 = arith.constant dense<0.000000e+00> : vector<16x16xf32>
    %214 = tpu.matmul %212, %213, %cst_87 {dimension_numbers = #tpu.dot_dimension_numbers<[1], [0], [0], [1], [0, 0, 1, 1], [], []>} : vector<16x16xf32>, vector<16x16xf32>, vector<16x16xf32> -> vector<16x16xf32>
    %215 = vector.extract_strided_slice %65 {offsets = [48, 0], sizes = [16, 64], strides = [1, 1]} : vector<64x64xf32> to vector<16x64xf32>
    %cst_88 = arith.constant dense<0.000000e+00> : vector<16x64xf32>
    %216 = tpu.matmul %214, %215, %cst_88 {dimension_numbers = #tpu.dot_dimension_numbers<[1], [0], [0], [1], [0, 0, 1, 1], [], []>} : vector<16x16xf32>, vector<16x64xf32>, vector<16x64xf32> -> vector<16x64xf32>
    %217 = arith.addf %199, %216 : vector<16x64xf32>
    %218 = tpu.concatenate %141, %217 in 0 : vector<16x64xf32>, vector<16x64xf32> -> vector<32x64xf32>
    %219 = arith.addf %22, %218 : vector<32x64xf32>
    %220 = vector.extract_strided_slice %27 {offsets = [2, 0], sizes = [1, 64], strides = [1, 1]} : vector<12x64xf32> to vector<1x64xf32>
    %c0_89 = arith.constant 0 : index
    %c1 = arith.constant 1 : index
    %c0_90 = arith.constant 0 : index
    %c0_91 = arith.constant 0 : index
    %221 = vector.load %arg10[%c0_89, %c1, %c0_90, %c0_91] : memref<2x4x64x64xf32, #tpu.memory_space<vmem>>, vector<1x1x64x64xf32>
    %222 = vector.shape_cast %221 : vector<1x1x64x64xf32> to vector<64x64xf32>
    %cst_92 = arith.constant dense<0.000000e+00> : vector<2x64xf32>
    %223 = tpu.matmul %13, %222, %cst_92 {dimension_numbers = #tpu.dot_dimension_numbers<[1], [0], [0], [1], [0, 0, 1, 1], [], []>} : vector<2x64xf32>, vector<64x64xf32>, vector<2x64xf32> -> vector<2x64xf32>
    %224 = vector.broadcast %220 : vector<1x64xf32> to vector<2x64xf32>
    %225 = arith.addf %224, %223 : vector<2x64xf32>
    %226 = vector.extract_strided_slice %27 {offsets = [3, 0], sizes = [1, 64], strides = [1, 1]} : vector<12x64xf32> to vector<1x64xf32>
    %227 = vector.broadcast %226 : vector<1x64xf32> to vector<2x64xf32>
    %228 = arith.addf %225, %227 : vector<2x64xf32>
    %c0_93 = arith.constant 0 : index
    %c0_94 = arith.constant 0 : index
    %c0_95 = arith.constant 0 : index
    %229 = vector.load %arg4[%c0_93, %c0_94, %c0_95] : memref<2x1x64xf32, #tpu.memory_space<vmem>>, vector<1x1x64xf32>
    %230 = vector.shape_cast %229 : vector<1x1x64xf32> to vector<1x64xf32>
    %231 = vector.broadcast %25 : vector<2x1xf32> to vector<2x64xf32>
    %232 = vector.broadcast %230 : vector<1x64xf32> to vector<2x64xf32>
    %233 = arith.mulf %231, %232 : vector<2x64xf32>
    %234 = vector.extract_strided_slice %27 {offsets = [4, 0], sizes = [1, 64], strides = [1, 1]} : vector<12x64xf32> to vector<1x64xf32>
    %235 = vector.broadcast %234 : vector<1x64xf32> to vector<2x64xf32>
    %236 = arith.addf %233, %235 : vector<2x64xf32>
    %237 = vector.extract_strided_slice %27 {offsets = [5, 0], sizes = [1, 64], strides = [1, 1]} : vector<12x64xf32> to vector<1x64xf32>
    %238 = vector.extract_strided_slice %27 {offsets = [6, 0], sizes = [1, 64], strides = [1, 1]} : vector<12x64xf32> to vector<1x64xf32>
    %cst_96 = arith.constant dense<0.000000e+00> : vector<2xf32>
    %239 = vector.multi_reduction <add>, %236, %cst_96 [1] : vector<2x64xf32> to vector<2xf32>
    %240 = vector.shape_cast %239 : vector<2xf32> to vector<2x1xf32>
    %cst_97 = arith.constant 6.400000e+01 : f32
    %241 = vector.broadcast %cst_97 : f32 to vector<2x1xf32>
    %242 = arith.divf %240, %241 : vector<2x1xf32>
    %243 = vector.broadcast %242 : vector<2x1xf32> to vector<2x64xf32>
    %244 = arith.subf %236, %243 : vector<2x64xf32>
    %245 = arith.mulf %244, %244 : vector<2x64xf32>
    %cst_98 = arith.constant dense<0.000000e+00> : vector<2xf32>
    %246 = vector.multi_reduction <add>, %245, %cst_98 [1] : vector<2x64xf32> to vector<2xf32>
    %247 = vector.shape_cast %246 : vector<2xf32> to vector<2x1xf32>
    %cst_99 = arith.constant 6.400000e+01 : f32
    %248 = vector.broadcast %cst_99 : f32 to vector<2x1xf32>
    %249 = arith.divf %247, %248 : vector<2x1xf32>
    %250 = vector.broadcast %242 : vector<2x1xf32> to vector<2x64xf32>
    %251 = arith.subf %236, %250 : vector<2x64xf32>
    %cst_100 = arith.constant 9.99999974E-6 : f32
    %252 = vector.broadcast %cst_100 : f32 to vector<2x1xf32>
    %253 = arith.addf %249, %252 : vector<2x1xf32>
    %254 = math.rsqrt %253 : vector<2x1xf32>
    %255 = vector.broadcast %254 : vector<2x1xf32> to vector<2x64xf32>
    %256 = arith.mulf %251, %255 : vector<2x64xf32>
    %257 = vector.broadcast %237 : vector<1x64xf32> to vector<2x64xf32>
    %258 = arith.mulf %256, %257 : vector<2x64xf32>
    %259 = vector.broadcast %238 : vector<1x64xf32> to vector<2x64xf32>
    %260 = arith.addf %258, %259 : vector<2x64xf32>
    %c0_101 = arith.constant 0 : index
    %c2 = arith.constant 2 : index
    %c0_102 = arith.constant 0 : index
    %c0_103 = arith.constant 0 : index
    %261 = vector.load %arg10[%c0_101, %c2, %c0_102, %c0_103] : memref<2x4x64x64xf32, #tpu.memory_space<vmem>>, vector<1x1x64x64xf32>
    %262 = vector.shape_cast %261 : vector<1x1x64x64xf32> to vector<64x64xf32>
    %cst_104 = arith.constant dense<0.000000e+00> : vector<2x64xf32>
    %263 = tpu.matmul %260, %262, %cst_104 {dimension_numbers = #tpu.dot_dimension_numbers<[1], [0], [0], [1], [0, 0, 1, 1], [], []>} : vector<2x64xf32>, vector<64x64xf32>, vector<2x64xf32> -> vector<2x64xf32>
    %264 = vector.extract_strided_slice %27 {offsets = [7, 0], sizes = [1, 64], strides = [1, 1]} : vector<12x64xf32> to vector<1x64xf32>
    %265 = vector.broadcast %264 : vector<1x64xf32> to vector<2x64xf32>
    %266 = arith.addf %263, %265 : vector<2x64xf32>
    %c0_105 = arith.constant 0 : index
    %c3 = arith.constant 3 : index
    %c0_106 = arith.constant 0 : index
    %c0_107 = arith.constant 0 : index
    %267 = vector.load %arg10[%c0_105, %c3, %c0_106, %c0_107] : memref<2x4x64x64xf32, #tpu.memory_space<vmem>>, vector<1x1x64x64xf32>
    %268 = vector.shape_cast %267 : vector<1x1x64x64xf32> to vector<64x64xf32>
    %cst_108 = arith.constant dense<0.000000e+00> : vector<2x64xf32>
    %269 = tpu.matmul %266, %268, %cst_108 {dimension_numbers = #tpu.dot_dimension_numbers<[1], [0], [0], [1], [0, 0, 1, 1], [], []>} : vector<2x64xf32>, vector<64x64xf32>, vector<2x64xf32> -> vector<2x64xf32>
    %270 = arith.addf %228, %269 : vector<2x64xf32>
    %271 = vector.extract_strided_slice %27 {offsets = [8, 0], sizes = [1, 64], strides = [1, 1]} : vector<12x64xf32> to vector<1x64xf32>
    %272 = vector.broadcast %271 : vector<1x64xf32> to vector<2x64xf32>
    %273 = arith.addf %270, %272 : vector<2x64xf32>
    %cst_109 = arith.constant dense<0.000000e+00> : vector<32x64xf32>
    %274 = tpu.matmul %23, %273, %cst_109 {dimension_numbers = #tpu.dot_dimension_numbers<[1], [0], [0], [1], [0, 0, 1, 1], [], []>} : vector<32x2xf32>, vector<2x64xf32>, vector<32x64xf32> -> vector<32x64xf32>
    %275 = arith.addf %219, %274 : vector<32x64xf32>
    %276 = vector.extract_strided_slice %27 {offsets = [9, 0], sizes = [1, 64], strides = [1, 1]} : vector<12x64xf32> to vector<1x64xf32>
    %277 = vector.extract_strided_slice %27 {offsets = [10, 0], sizes = [1, 64], strides = [1, 1]} : vector<12x64xf32> to vector<1x64xf32>
    %cst_110 = arith.constant dense<0.000000e+00> : vector<32xf32>
    %278 = vector.multi_reduction <add>, %275, %cst_110 [1] : vector<32x64xf32> to vector<32xf32>
    %279 = vector.shape_cast %278 : vector<32xf32> to vector<32x1xf32>
    %cst_111 = arith.constant 6.400000e+01 : f32
    %280 = vector.broadcast %cst_111 : f32 to vector<32x1xf32>
    %281 = arith.divf %279, %280 : vector<32x1xf32>
    %282 = vector.broadcast %281 : vector<32x1xf32> to vector<32x64xf32>
    %283 = arith.subf %275, %282 : vector<32x64xf32>
    %284 = arith.mulf %283, %283 : vector<32x64xf32>
    %cst_112 = arith.constant dense<0.000000e+00> : vector<32xf32>
    %285 = vector.multi_reduction <add>, %284, %cst_112 [1] : vector<32x64xf32> to vector<32xf32>
    %286 = vector.shape_cast %285 : vector<32xf32> to vector<32x1xf32>
    %cst_113 = arith.constant 6.400000e+01 : f32
    %287 = vector.broadcast %cst_113 : f32 to vector<32x1xf32>
    %288 = arith.divf %286, %287 : vector<32x1xf32>
    %289 = vector.broadcast %281 : vector<32x1xf32> to vector<32x64xf32>
    %290 = arith.subf %275, %289 : vector<32x64xf32>
    %cst_114 = arith.constant 9.99999974E-6 : f32
    %291 = vector.broadcast %cst_114 : f32 to vector<32x1xf32>
    %292 = arith.addf %288, %291 : vector<32x1xf32>
    %293 = math.rsqrt %292 : vector<32x1xf32>
    %294 = vector.broadcast %293 : vector<32x1xf32> to vector<32x64xf32>
    %295 = arith.mulf %290, %294 : vector<32x64xf32>
    %296 = vector.broadcast %276 : vector<1x64xf32> to vector<32x64xf32>
    %297 = arith.mulf %295, %296 : vector<32x64xf32>
    %298 = vector.broadcast %277 : vector<1x64xf32> to vector<32x64xf32>
    %299 = arith.addf %297, %298 : vector<32x64xf32>
    %c0_115 = arith.constant 0 : index
    %c0_116 = arith.constant 0 : index
    %c0_117 = arith.constant 0 : index
    %300 = vector.load %arg6[%c0_115, %c0_116, %c0_117] : memref<2x64x256xf32, #tpu.memory_space<vmem>>, vector<1x64x256xf32>
    %301 = vector.shape_cast %300 : vector<1x64x256xf32> to vector<64x256xf32>
    %cst_118 = arith.constant dense<0.000000e+00> : vector<32x256xf32>
    %302 = tpu.matmul %299, %301, %cst_118 {dimension_numbers = #tpu.dot_dimension_numbers<[1], [0], [0], [1], [0, 0, 1, 1], [], []>} : vector<32x64xf32>, vector<64x256xf32>, vector<32x256xf32> -> vector<32x256xf32>
    %c0_119 = arith.constant 0 : index
    %c0_120 = arith.constant 0 : index
    %c0_121 = arith.constant 0 : index
    %303 = vector.load %arg5[%c0_119, %c0_120, %c0_121] : memref<2x1x256xf32, #tpu.memory_space<vmem>>, vector<1x1x256xf32>
    %304 = vector.shape_cast %303 : vector<1x1x256xf32> to vector<1x256xf32>
    %305 = vector.broadcast %304 : vector<1x256xf32> to vector<32x256xf32>
    %306 = arith.addf %302, %305 : vector<32x256xf32>
    %cst_122 = arith.constant 5.000000e-01 : f32
    %307 = vector.broadcast %cst_122 : f32 to vector<32x256xf32>
    %308 = arith.mulf %307, %306 : vector<32x256xf32>
    %cst_123 = arith.constant 0.707106769 : f32
    %309 = vector.broadcast %cst_123 : f32 to vector<32x256xf32>
    %310 = arith.mulf %306, %309 : vector<32x256xf32>
    %311 = math.absf %310 : vector<32x256xf32>
    %cst_124 = arith.constant 0.327591091 : f32
    %312 = vector.broadcast %cst_124 : f32 to vector<32x256xf32>
    %313 = arith.mulf %312, %311 : vector<32x256xf32>
    %cst_125 = arith.constant 1.000000e+00 : f32
    %314 = vector.broadcast %cst_125 : f32 to vector<32x256xf32>
    %315 = arith.addf %314, %313 : vector<32x256xf32>
    %cst_126 = arith.constant 1.000000e+00 : f32
    %316 = vector.broadcast %cst_126 : f32 to vector<32x256xf32>
    %317 = arith.divf %316, %315 : vector<32x256xf32>
    %cst_127 = arith.constant 1.06140542 : f32
    %318 = vector.broadcast %cst_127 : f32 to vector<32x256xf32>
    %319 = arith.mulf %317, %318 : vector<32x256xf32>
    %cst_128 = arith.constant -1.45315206 : f32
    %320 = vector.broadcast %cst_128 : f32 to vector<32x256xf32>
    %321 = arith.addf %320, %319 : vector<32x256xf32>
    %322 = arith.mulf %317, %321 : vector<32x256xf32>
    %cst_129 = arith.constant 1.42141378 : f32
    %323 = vector.broadcast %cst_129 : f32 to vector<32x256xf32>
    %324 = arith.addf %323, %322 : vector<32x256xf32>
    %325 = arith.mulf %317, %324 : vector<32x256xf32>
    %cst_130 = arith.constant -0.284496725 : f32
    %326 = vector.broadcast %cst_130 : f32 to vector<32x256xf32>
    %327 = arith.addf %326, %325 : vector<32x256xf32>
    %328 = arith.mulf %317, %327 : vector<32x256xf32>
    %cst_131 = arith.constant 0.254829586 : f32
    %329 = vector.broadcast %cst_131 : f32 to vector<32x256xf32>
    %330 = arith.addf %329, %328 : vector<32x256xf32>
    %331 = arith.mulf %317, %330 : vector<32x256xf32>
    %cst_132 = arith.constant 0.000000e+00 : f32
    %332 = vector.broadcast %cst_132 : f32 to vector<32x256xf32>
    %333 = arith.subf %332, %311 : vector<32x256xf32>
    %334 = arith.mulf %333, %311 : vector<32x256xf32>
    %335 = math.exp %334 : vector<32x256xf32>
    %336 = arith.mulf %331, %335 : vector<32x256xf32>
    %cst_133 = arith.constant 1.000000e+00 : f32
    %337 = vector.broadcast %cst_133 : f32 to vector<32x256xf32>
    %338 = arith.subf %337, %336 : vector<32x256xf32>
    %cst_134 = arith.constant 0.000000e+00 : f32
    %339 = vector.broadcast %cst_134 : f32 to vector<32x256xf32>
    %340 = arith.cmpf olt, %310, %339 : vector<32x256xf32>
    %cst_135 = arith.constant 0.000000e+00 : f32
    %341 = vector.broadcast %cst_135 : f32 to vector<32x256xf32>
    %342 = arith.subf %341, %338 : vector<32x256xf32>
    %343 = arith.select %340, %342, %338 : vector<32x256xi1>, vector<32x256xf32>
    %cst_136 = arith.constant 1.000000e+00 : f32
    %344 = vector.broadcast %cst_136 : f32 to vector<32x256xf32>
    %345 = arith.addf %344, %343 : vector<32x256xf32>
    %346 = arith.mulf %308, %345 : vector<32x256xf32>
    %c0_137 = arith.constant 0 : index
    %c0_138 = arith.constant 0 : index
    %c0_139 = arith.constant 0 : index
    %347 = vector.load %arg7[%c0_137, %c0_138, %c0_139] : memref<2x256x64xf32, #tpu.memory_space<vmem>>, vector<1x256x64xf32>
    %348 = vector.shape_cast %347 : vector<1x256x64xf32> to vector<256x64xf32>
    %cst_140 = arith.constant dense<0.000000e+00> : vector<32x64xf32>
    %349 = tpu.matmul %346, %348, %cst_140 {dimension_numbers = #tpu.dot_dimension_numbers<[1], [0], [0], [1], [0, 0, 1, 1], [], []>} : vector<32x256xf32>, vector<256x64xf32>, vector<32x64xf32> -> vector<32x64xf32>
    %350 = vector.extract_strided_slice %27 {offsets = [11, 0], sizes = [1, 64], strides = [1, 1]} : vector<12x64xf32> to vector<1x64xf32>
    %351 = vector.broadcast %350 : vector<1x64xf32> to vector<32x64xf32>
    %352 = arith.addf %349, %351 : vector<32x64xf32>
    %353 = arith.addf %275, %352 : vector<32x64xf32>
    %c1_141 = arith.constant 1 : index
    %c0_142 = arith.constant 0 : index
    %c0_143 = arith.constant 0 : index
    %354 = vector.load %arg11[%c1_141, %c0_142, %c0_143] : memref<2x12x64xf32, #tpu.memory_space<vmem>>, vector<1x12x64xf32>
    %355 = vector.shape_cast %354 : vector<1x12x64xf32> to vector<12x64xf32>
    %356 = vector.extract_strided_slice %355 {offsets = [0, 0], sizes = [1, 64], strides = [1, 1]} : vector<12x64xf32> to vector<1x64xf32>
    %357 = vector.extract_strided_slice %355 {offsets = [1, 0], sizes = [1, 64], strides = [1, 1]} : vector<12x64xf32> to vector<1x64xf32>
    %cst_144 = arith.constant dense<0.000000e+00> : vector<32xf32>
    %358 = vector.multi_reduction <add>, %353, %cst_144 [1] : vector<32x64xf32> to vector<32xf32>
    %359 = vector.shape_cast %358 : vector<32xf32> to vector<32x1xf32>
    %cst_145 = arith.constant 6.400000e+01 : f32
    %360 = vector.broadcast %cst_145 : f32 to vector<32x1xf32>
    %361 = arith.divf %359, %360 : vector<32x1xf32>
    %362 = vector.broadcast %361 : vector<32x1xf32> to vector<32x64xf32>
    %363 = arith.subf %353, %362 : vector<32x64xf32>
    %364 = arith.mulf %363, %363 : vector<32x64xf32>
    %cst_146 = arith.constant dense<0.000000e+00> : vector<32xf32>
    %365 = vector.multi_reduction <add>, %364, %cst_146 [1] : vector<32x64xf32> to vector<32xf32>
    %366 = vector.shape_cast %365 : vector<32xf32> to vector<32x1xf32>
    %cst_147 = arith.constant 6.400000e+01 : f32
    %367 = vector.broadcast %cst_147 : f32 to vector<32x1xf32>
    %368 = arith.divf %366, %367 : vector<32x1xf32>
    %369 = vector.broadcast %361 : vector<32x1xf32> to vector<32x64xf32>
    %370 = arith.subf %353, %369 : vector<32x64xf32>
    %cst_148 = arith.constant 9.99999974E-6 : f32
    %371 = vector.broadcast %cst_148 : f32 to vector<32x1xf32>
    %372 = arith.addf %368, %371 : vector<32x1xf32>
    %373 = math.rsqrt %372 : vector<32x1xf32>
    %374 = vector.broadcast %373 : vector<32x1xf32> to vector<32x64xf32>
    %375 = arith.mulf %370, %374 : vector<32x64xf32>
    %376 = vector.broadcast %356 : vector<1x64xf32> to vector<32x64xf32>
    %377 = arith.mulf %375, %376 : vector<32x64xf32>
    %378 = vector.broadcast %357 : vector<1x64xf32> to vector<32x64xf32>
    %379 = arith.addf %377, %378 : vector<32x64xf32>
    %c1_149 = arith.constant 1 : index
    %c0_150 = arith.constant 0 : index
    %c0_151 = arith.constant 0 : index
    %380 = vector.load %arg9[%c1_149, %c0_150, %c0_151] : memref<2x64x192xf32, #tpu.memory_space<vmem>>, vector<1x64x192xf32>
    %381 = vector.shape_cast %380 : vector<1x64x192xf32> to vector<64x192xf32>
    %cst_152 = arith.constant dense<0.000000e+00> : vector<32x192xf32>
    %382 = tpu.matmul %379, %381, %cst_152 {dimension_numbers = #tpu.dot_dimension_numbers<[1], [0], [0], [1], [0, 0, 1, 1], [], []>} : vector<32x64xf32>, vector<64x192xf32>, vector<32x192xf32> -> vector<32x192xf32>
    %c1_153 = arith.constant 1 : index
    %c0_154 = arith.constant 0 : index
    %c0_155 = arith.constant 0 : index
    %383 = vector.load %arg8[%c1_153, %c0_154, %c0_155] : memref<2x1x192xf32, #tpu.memory_space<vmem>>, vector<1x1x192xf32>
    %384 = vector.shape_cast %383 : vector<1x1x192xf32> to vector<1x192xf32>
    %385 = vector.broadcast %384 : vector<1x192xf32> to vector<32x192xf32>
    %386 = arith.addf %382, %385 : vector<32x192xf32>
    %387 = vector.extract_strided_slice %386 {offsets = [0, 0], sizes = [32, 64], strides = [1, 1]} : vector<32x192xf32> to vector<32x64xf32>
    %cst_156 = arith.constant 2.500000e-01 : f32
    %388 = vector.broadcast %cst_156 : f32 to vector<32x64xf32>
    %389 = arith.mulf %387, %388 : vector<32x64xf32>
    %390 = vector.extract_strided_slice %386 {offsets = [0, 64], sizes = [32, 64], strides = [1, 1]} : vector<32x192xf32> to vector<32x64xf32>
    %391 = vector.extract_strided_slice %386 {offsets = [0, 128], sizes = [32, 64], strides = [1, 1]} : vector<32x192xf32> to vector<32x64xf32>
    %c1_157 = arith.constant 1 : index
    %c0_158 = arith.constant 0 : index
    %c0_159 = arith.constant 0 : index
    %c0_160 = arith.constant 0 : index
    %392 = vector.load %arg10[%c1_157, %c0_158, %c0_159, %c0_160] : memref<2x4x64x64xf32, #tpu.memory_space<vmem>>, vector<1x1x64x64xf32>
    %393 = vector.shape_cast %392 : vector<1x1x64x64xf32> to vector<64x64xf32>
    %394 = vector.extract_strided_slice %389 {offsets = [0, 0], sizes = [16, 64], strides = [1, 1]} : vector<32x64xf32> to vector<16x64xf32>
    %395 = vector.extract_strided_slice %390 {offsets = [0, 0], sizes = [16, 64], strides = [1, 1]} : vector<32x64xf32> to vector<16x64xf32>
    %396 = vector.extract_strided_slice %391 {offsets = [0, 0], sizes = [16, 64], strides = [1, 1]} : vector<32x64xf32> to vector<16x64xf32>
    %cst_161 = arith.constant 0.000000e+00 : f32
    %397 = vector.broadcast %cst_161 : f32 to vector<16x64xf32>
    %398 = vector.extract_strided_slice %394 {offsets = [0, 0], sizes = [16, 16], strides = [1, 1]} : vector<16x64xf32> to vector<16x16xf32>
    %399 = vector.extract_strided_slice %395 {offsets = [0, 0], sizes = [16, 16], strides = [1, 1]} : vector<16x64xf32> to vector<16x16xf32>
    %cst_162 = arith.constant dense<0.000000e+00> : vector<16x16xf32>
    %400 = tpu.matmul %398, %399, %cst_162 {dimension_numbers = #tpu.dot_dimension_numbers<[1], [1], [0], [0], [0, 0, 1, 0], [], []>} : vector<16x16xf32>, vector<16x16xf32>, vector<16x16xf32> -> vector<16x16xf32>
    %cst_163 = arith.constant dense<0xFF800000> : vector<16xf32>
    %401 = vector.multi_reduction <maximumf>, %400, %cst_163 [1] : vector<16x16xf32> to vector<16xf32>
    %402 = vector.shape_cast %401 : vector<16xf32> to vector<16x1xf32>
    %403 = vector.broadcast %402 : vector<16x1xf32> to vector<16x16xf32>
    %404 = arith.subf %400, %403 : vector<16x16xf32>
    %405 = math.exp %404 : vector<16x16xf32>
    %cst_164 = arith.constant dense<0.000000e+00> : vector<16xf32>
    %406 = vector.multi_reduction <add>, %405, %cst_164 [1] : vector<16x16xf32> to vector<16xf32>
    %407 = vector.shape_cast %406 : vector<16xf32> to vector<16x1xf32>
    %408 = tpu.reciprocal %407 {approx = true} : vector<16x1xf32> -> vector<16x1xf32>
    %409 = vector.broadcast %408 : vector<16x1xf32> to vector<16x16xf32>
    %410 = arith.mulf %405, %409 : vector<16x16xf32>
    %411 = vector.extract_strided_slice %396 {offsets = [0, 0], sizes = [16, 16], strides = [1, 1]} : vector<16x64xf32> to vector<16x16xf32>
    %cst_165 = arith.constant dense<0.000000e+00> : vector<16x16xf32>
    %412 = tpu.matmul %410, %411, %cst_165 {dimension_numbers = #tpu.dot_dimension_numbers<[1], [0], [0], [1], [0, 0, 1, 1], [], []>} : vector<16x16xf32>, vector<16x16xf32>, vector<16x16xf32> -> vector<16x16xf32>
    %413 = vector.extract_strided_slice %393 {offsets = [0, 0], sizes = [16, 64], strides = [1, 1]} : vector<64x64xf32> to vector<16x64xf32>
    %cst_166 = arith.constant dense<0.000000e+00> : vector<16x64xf32>
    %414 = tpu.matmul %412, %413, %cst_166 {dimension_numbers = #tpu.dot_dimension_numbers<[1], [0], [0], [1], [0, 0, 1, 1], [], []>} : vector<16x16xf32>, vector<16x64xf32>, vector<16x64xf32> -> vector<16x64xf32>
    %415 = arith.addf %397, %414 : vector<16x64xf32>
    %416 = vector.extract_strided_slice %394 {offsets = [0, 16], sizes = [16, 16], strides = [1, 1]} : vector<16x64xf32> to vector<16x16xf32>
    %417 = vector.extract_strided_slice %395 {offsets = [0, 16], sizes = [16, 16], strides = [1, 1]} : vector<16x64xf32> to vector<16x16xf32>
    %cst_167 = arith.constant dense<0.000000e+00> : vector<16x16xf32>
    %418 = tpu.matmul %416, %417, %cst_167 {dimension_numbers = #tpu.dot_dimension_numbers<[1], [1], [0], [0], [0, 0, 1, 0], [], []>} : vector<16x16xf32>, vector<16x16xf32>, vector<16x16xf32> -> vector<16x16xf32>
    %cst_168 = arith.constant dense<0xFF800000> : vector<16xf32>
    %419 = vector.multi_reduction <maximumf>, %418, %cst_168 [1] : vector<16x16xf32> to vector<16xf32>
    %420 = vector.shape_cast %419 : vector<16xf32> to vector<16x1xf32>
    %421 = vector.broadcast %420 : vector<16x1xf32> to vector<16x16xf32>
    %422 = arith.subf %418, %421 : vector<16x16xf32>
    %423 = math.exp %422 : vector<16x16xf32>
    %cst_169 = arith.constant dense<0.000000e+00> : vector<16xf32>
    %424 = vector.multi_reduction <add>, %423, %cst_169 [1] : vector<16x16xf32> to vector<16xf32>
    %425 = vector.shape_cast %424 : vector<16xf32> to vector<16x1xf32>
    %426 = tpu.reciprocal %425 {approx = true} : vector<16x1xf32> -> vector<16x1xf32>
    %427 = vector.broadcast %426 : vector<16x1xf32> to vector<16x16xf32>
    %428 = arith.mulf %423, %427 : vector<16x16xf32>
    %429 = vector.extract_strided_slice %396 {offsets = [0, 16], sizes = [16, 16], strides = [1, 1]} : vector<16x64xf32> to vector<16x16xf32>
    %cst_170 = arith.constant dense<0.000000e+00> : vector<16x16xf32>
    %430 = tpu.matmul %428, %429, %cst_170 {dimension_numbers = #tpu.dot_dimension_numbers<[1], [0], [0], [1], [0, 0, 1, 1], [], []>} : vector<16x16xf32>, vector<16x16xf32>, vector<16x16xf32> -> vector<16x16xf32>
    %431 = vector.extract_strided_slice %393 {offsets = [16, 0], sizes = [16, 64], strides = [1, 1]} : vector<64x64xf32> to vector<16x64xf32>
    %cst_171 = arith.constant dense<0.000000e+00> : vector<16x64xf32>
    %432 = tpu.matmul %430, %431, %cst_171 {dimension_numbers = #tpu.dot_dimension_numbers<[1], [0], [0], [1], [0, 0, 1, 1], [], []>} : vector<16x16xf32>, vector<16x64xf32>, vector<16x64xf32> -> vector<16x64xf32>
    %433 = arith.addf %415, %432 : vector<16x64xf32>
    %434 = vector.extract_strided_slice %394 {offsets = [0, 32], sizes = [16, 16], strides = [1, 1]} : vector<16x64xf32> to vector<16x16xf32>
    %435 = vector.extract_strided_slice %395 {offsets = [0, 32], sizes = [16, 16], strides = [1, 1]} : vector<16x64xf32> to vector<16x16xf32>
    %cst_172 = arith.constant dense<0.000000e+00> : vector<16x16xf32>
    %436 = tpu.matmul %434, %435, %cst_172 {dimension_numbers = #tpu.dot_dimension_numbers<[1], [1], [0], [0], [0, 0, 1, 0], [], []>} : vector<16x16xf32>, vector<16x16xf32>, vector<16x16xf32> -> vector<16x16xf32>
    %cst_173 = arith.constant dense<0xFF800000> : vector<16xf32>
    %437 = vector.multi_reduction <maximumf>, %436, %cst_173 [1] : vector<16x16xf32> to vector<16xf32>
    %438 = vector.shape_cast %437 : vector<16xf32> to vector<16x1xf32>
    %439 = vector.broadcast %438 : vector<16x1xf32> to vector<16x16xf32>
    %440 = arith.subf %436, %439 : vector<16x16xf32>
    %441 = math.exp %440 : vector<16x16xf32>
    %cst_174 = arith.constant dense<0.000000e+00> : vector<16xf32>
    %442 = vector.multi_reduction <add>, %441, %cst_174 [1] : vector<16x16xf32> to vector<16xf32>
    %443 = vector.shape_cast %442 : vector<16xf32> to vector<16x1xf32>
    %444 = tpu.reciprocal %443 {approx = true} : vector<16x1xf32> -> vector<16x1xf32>
    %445 = vector.broadcast %444 : vector<16x1xf32> to vector<16x16xf32>
    %446 = arith.mulf %441, %445 : vector<16x16xf32>
    %447 = vector.extract_strided_slice %396 {offsets = [0, 32], sizes = [16, 16], strides = [1, 1]} : vector<16x64xf32> to vector<16x16xf32>
    %cst_175 = arith.constant dense<0.000000e+00> : vector<16x16xf32>
    %448 = tpu.matmul %446, %447, %cst_175 {dimension_numbers = #tpu.dot_dimension_numbers<[1], [0], [0], [1], [0, 0, 1, 1], [], []>} : vector<16x16xf32>, vector<16x16xf32>, vector<16x16xf32> -> vector<16x16xf32>
    %449 = vector.extract_strided_slice %393 {offsets = [32, 0], sizes = [16, 64], strides = [1, 1]} : vector<64x64xf32> to vector<16x64xf32>
    %cst_176 = arith.constant dense<0.000000e+00> : vector<16x64xf32>
    %450 = tpu.matmul %448, %449, %cst_176 {dimension_numbers = #tpu.dot_dimension_numbers<[1], [0], [0], [1], [0, 0, 1, 1], [], []>} : vector<16x16xf32>, vector<16x64xf32>, vector<16x64xf32> -> vector<16x64xf32>
    %451 = arith.addf %433, %450 : vector<16x64xf32>
    %452 = vector.extract_strided_slice %394 {offsets = [0, 48], sizes = [16, 16], strides = [1, 1]} : vector<16x64xf32> to vector<16x16xf32>
    %453 = vector.extract_strided_slice %395 {offsets = [0, 48], sizes = [16, 16], strides = [1, 1]} : vector<16x64xf32> to vector<16x16xf32>
    %cst_177 = arith.constant dense<0.000000e+00> : vector<16x16xf32>
    %454 = tpu.matmul %452, %453, %cst_177 {dimension_numbers = #tpu.dot_dimension_numbers<[1], [1], [0], [0], [0, 0, 1, 0], [], []>} : vector<16x16xf32>, vector<16x16xf32>, vector<16x16xf32> -> vector<16x16xf32>
    %cst_178 = arith.constant dense<0xFF800000> : vector<16xf32>
    %455 = vector.multi_reduction <maximumf>, %454, %cst_178 [1] : vector<16x16xf32> to vector<16xf32>
    %456 = vector.shape_cast %455 : vector<16xf32> to vector<16x1xf32>
    %457 = vector.broadcast %456 : vector<16x1xf32> to vector<16x16xf32>
    %458 = arith.subf %454, %457 : vector<16x16xf32>
    %459 = math.exp %458 : vector<16x16xf32>
    %cst_179 = arith.constant dense<0.000000e+00> : vector<16xf32>
    %460 = vector.multi_reduction <add>, %459, %cst_179 [1] : vector<16x16xf32> to vector<16xf32>
    %461 = vector.shape_cast %460 : vector<16xf32> to vector<16x1xf32>
    %462 = tpu.reciprocal %461 {approx = true} : vector<16x1xf32> -> vector<16x1xf32>
    %463 = vector.broadcast %462 : vector<16x1xf32> to vector<16x16xf32>
    %464 = arith.mulf %459, %463 : vector<16x16xf32>
    %465 = vector.extract_strided_slice %396 {offsets = [0, 48], sizes = [16, 16], strides = [1, 1]} : vector<16x64xf32> to vector<16x16xf32>
    %cst_180 = arith.constant dense<0.000000e+00> : vector<16x16xf32>
    %466 = tpu.matmul %464, %465, %cst_180 {dimension_numbers = #tpu.dot_dimension_numbers<[1], [0], [0], [1], [0, 0, 1, 1], [], []>} : vector<16x16xf32>, vector<16x16xf32>, vector<16x16xf32> -> vector<16x16xf32>
    %467 = vector.extract_strided_slice %393 {offsets = [48, 0], sizes = [16, 64], strides = [1, 1]} : vector<64x64xf32> to vector<16x64xf32>
    %cst_181 = arith.constant dense<0.000000e+00> : vector<16x64xf32>
    %468 = tpu.matmul %466, %467, %cst_181 {dimension_numbers = #tpu.dot_dimension_numbers<[1], [0], [0], [1], [0, 0, 1, 1], [], []>} : vector<16x16xf32>, vector<16x64xf32>, vector<16x64xf32> -> vector<16x64xf32>
    %469 = arith.addf %451, %468 : vector<16x64xf32>
    %470 = vector.extract_strided_slice %389 {offsets = [16, 0], sizes = [16, 64], strides = [1, 1]} : vector<32x64xf32> to vector<16x64xf32>
    %471 = vector.extract_strided_slice %390 {offsets = [16, 0], sizes = [16, 64], strides = [1, 1]} : vector<32x64xf32> to vector<16x64xf32>
    %472 = vector.extract_strided_slice %391 {offsets = [16, 0], sizes = [16, 64], strides = [1, 1]} : vector<32x64xf32> to vector<16x64xf32>
    %cst_182 = arith.constant 0.000000e+00 : f32
    %473 = vector.broadcast %cst_182 : f32 to vector<16x64xf32>
    %474 = vector.extract_strided_slice %470 {offsets = [0, 0], sizes = [16, 16], strides = [1, 1]} : vector<16x64xf32> to vector<16x16xf32>
    %475 = vector.extract_strided_slice %471 {offsets = [0, 0], sizes = [16, 16], strides = [1, 1]} : vector<16x64xf32> to vector<16x16xf32>
    %cst_183 = arith.constant dense<0.000000e+00> : vector<16x16xf32>
    %476 = tpu.matmul %474, %475, %cst_183 {dimension_numbers = #tpu.dot_dimension_numbers<[1], [1], [0], [0], [0, 0, 1, 0], [], []>} : vector<16x16xf32>, vector<16x16xf32>, vector<16x16xf32> -> vector<16x16xf32>
    %cst_184 = arith.constant dense<0xFF800000> : vector<16xf32>
    %477 = vector.multi_reduction <maximumf>, %476, %cst_184 [1] : vector<16x16xf32> to vector<16xf32>
    %478 = vector.shape_cast %477 : vector<16xf32> to vector<16x1xf32>
    %479 = vector.broadcast %478 : vector<16x1xf32> to vector<16x16xf32>
    %480 = arith.subf %476, %479 : vector<16x16xf32>
    %481 = math.exp %480 : vector<16x16xf32>
    %cst_185 = arith.constant dense<0.000000e+00> : vector<16xf32>
    %482 = vector.multi_reduction <add>, %481, %cst_185 [1] : vector<16x16xf32> to vector<16xf32>
    %483 = vector.shape_cast %482 : vector<16xf32> to vector<16x1xf32>
    %484 = tpu.reciprocal %483 {approx = true} : vector<16x1xf32> -> vector<16x1xf32>
    %485 = vector.broadcast %484 : vector<16x1xf32> to vector<16x16xf32>
    %486 = arith.mulf %481, %485 : vector<16x16xf32>
    %487 = vector.extract_strided_slice %472 {offsets = [0, 0], sizes = [16, 16], strides = [1, 1]} : vector<16x64xf32> to vector<16x16xf32>
    %cst_186 = arith.constant dense<0.000000e+00> : vector<16x16xf32>
    %488 = tpu.matmul %486, %487, %cst_186 {dimension_numbers = #tpu.dot_dimension_numbers<[1], [0], [0], [1], [0, 0, 1, 1], [], []>} : vector<16x16xf32>, vector<16x16xf32>, vector<16x16xf32> -> vector<16x16xf32>
    %489 = vector.extract_strided_slice %393 {offsets = [0, 0], sizes = [16, 64], strides = [1, 1]} : vector<64x64xf32> to vector<16x64xf32>
    %cst_187 = arith.constant dense<0.000000e+00> : vector<16x64xf32>
    %490 = tpu.matmul %488, %489, %cst_187 {dimension_numbers = #tpu.dot_dimension_numbers<[1], [0], [0], [1], [0, 0, 1, 1], [], []>} : vector<16x16xf32>, vector<16x64xf32>, vector<16x64xf32> -> vector<16x64xf32>
    %491 = arith.addf %473, %490 : vector<16x64xf32>
    %492 = vector.extract_strided_slice %470 {offsets = [0, 16], sizes = [16, 16], strides = [1, 1]} : vector<16x64xf32> to vector<16x16xf32>
    %493 = vector.extract_strided_slice %471 {offsets = [0, 16], sizes = [16, 16], strides = [1, 1]} : vector<16x64xf32> to vector<16x16xf32>
    %cst_188 = arith.constant dense<0.000000e+00> : vector<16x16xf32>
    %494 = tpu.matmul %492, %493, %cst_188 {dimension_numbers = #tpu.dot_dimension_numbers<[1], [1], [0], [0], [0, 0, 1, 0], [], []>} : vector<16x16xf32>, vector<16x16xf32>, vector<16x16xf32> -> vector<16x16xf32>
    %cst_189 = arith.constant dense<0xFF800000> : vector<16xf32>
    %495 = vector.multi_reduction <maximumf>, %494, %cst_189 [1] : vector<16x16xf32> to vector<16xf32>
    %496 = vector.shape_cast %495 : vector<16xf32> to vector<16x1xf32>
    %497 = vector.broadcast %496 : vector<16x1xf32> to vector<16x16xf32>
    %498 = arith.subf %494, %497 : vector<16x16xf32>
    %499 = math.exp %498 : vector<16x16xf32>
    %cst_190 = arith.constant dense<0.000000e+00> : vector<16xf32>
    %500 = vector.multi_reduction <add>, %499, %cst_190 [1] : vector<16x16xf32> to vector<16xf32>
    %501 = vector.shape_cast %500 : vector<16xf32> to vector<16x1xf32>
    %502 = tpu.reciprocal %501 {approx = true} : vector<16x1xf32> -> vector<16x1xf32>
    %503 = vector.broadcast %502 : vector<16x1xf32> to vector<16x16xf32>
    %504 = arith.mulf %499, %503 : vector<16x16xf32>
    %505 = vector.extract_strided_slice %472 {offsets = [0, 16], sizes = [16, 16], strides = [1, 1]} : vector<16x64xf32> to vector<16x16xf32>
    %cst_191 = arith.constant dense<0.000000e+00> : vector<16x16xf32>
    %506 = tpu.matmul %504, %505, %cst_191 {dimension_numbers = #tpu.dot_dimension_numbers<[1], [0], [0], [1], [0, 0, 1, 1], [], []>} : vector<16x16xf32>, vector<16x16xf32>, vector<16x16xf32> -> vector<16x16xf32>
    %507 = vector.extract_strided_slice %393 {offsets = [16, 0], sizes = [16, 64], strides = [1, 1]} : vector<64x64xf32> to vector<16x64xf32>
    %cst_192 = arith.constant dense<0.000000e+00> : vector<16x64xf32>
    %508 = tpu.matmul %506, %507, %cst_192 {dimension_numbers = #tpu.dot_dimension_numbers<[1], [0], [0], [1], [0, 0, 1, 1], [], []>} : vector<16x16xf32>, vector<16x64xf32>, vector<16x64xf32> -> vector<16x64xf32>
    %509 = arith.addf %491, %508 : vector<16x64xf32>
    %510 = vector.extract_strided_slice %470 {offsets = [0, 32], sizes = [16, 16], strides = [1, 1]} : vector<16x64xf32> to vector<16x16xf32>
    %511 = vector.extract_strided_slice %471 {offsets = [0, 32], sizes = [16, 16], strides = [1, 1]} : vector<16x64xf32> to vector<16x16xf32>
    %cst_193 = arith.constant dense<0.000000e+00> : vector<16x16xf32>
    %512 = tpu.matmul %510, %511, %cst_193 {dimension_numbers = #tpu.dot_dimension_numbers<[1], [1], [0], [0], [0, 0, 1, 0], [], []>} : vector<16x16xf32>, vector<16x16xf32>, vector<16x16xf32> -> vector<16x16xf32>
    %cst_194 = arith.constant dense<0xFF800000> : vector<16xf32>
    %513 = vector.multi_reduction <maximumf>, %512, %cst_194 [1] : vector<16x16xf32> to vector<16xf32>
    %514 = vector.shape_cast %513 : vector<16xf32> to vector<16x1xf32>
    %515 = vector.broadcast %514 : vector<16x1xf32> to vector<16x16xf32>
    %516 = arith.subf %512, %515 : vector<16x16xf32>
    %517 = math.exp %516 : vector<16x16xf32>
    %cst_195 = arith.constant dense<0.000000e+00> : vector<16xf32>
    %518 = vector.multi_reduction <add>, %517, %cst_195 [1] : vector<16x16xf32> to vector<16xf32>
    %519 = vector.shape_cast %518 : vector<16xf32> to vector<16x1xf32>
    %520 = tpu.reciprocal %519 {approx = true} : vector<16x1xf32> -> vector<16x1xf32>
    %521 = vector.broadcast %520 : vector<16x1xf32> to vector<16x16xf32>
    %522 = arith.mulf %517, %521 : vector<16x16xf32>
    %523 = vector.extract_strided_slice %472 {offsets = [0, 32], sizes = [16, 16], strides = [1, 1]} : vector<16x64xf32> to vector<16x16xf32>
    %cst_196 = arith.constant dense<0.000000e+00> : vector<16x16xf32>
    %524 = tpu.matmul %522, %523, %cst_196 {dimension_numbers = #tpu.dot_dimension_numbers<[1], [0], [0], [1], [0, 0, 1, 1], [], []>} : vector<16x16xf32>, vector<16x16xf32>, vector<16x16xf32> -> vector<16x16xf32>
    %525 = vector.extract_strided_slice %393 {offsets = [32, 0], sizes = [16, 64], strides = [1, 1]} : vector<64x64xf32> to vector<16x64xf32>
    %cst_197 = arith.constant dense<0.000000e+00> : vector<16x64xf32>
    %526 = tpu.matmul %524, %525, %cst_197 {dimension_numbers = #tpu.dot_dimension_numbers<[1], [0], [0], [1], [0, 0, 1, 1], [], []>} : vector<16x16xf32>, vector<16x64xf32>, vector<16x64xf32> -> vector<16x64xf32>
    %527 = arith.addf %509, %526 : vector<16x64xf32>
    %528 = vector.extract_strided_slice %470 {offsets = [0, 48], sizes = [16, 16], strides = [1, 1]} : vector<16x64xf32> to vector<16x16xf32>
    %529 = vector.extract_strided_slice %471 {offsets = [0, 48], sizes = [16, 16], strides = [1, 1]} : vector<16x64xf32> to vector<16x16xf32>
    %cst_198 = arith.constant dense<0.000000e+00> : vector<16x16xf32>
    %530 = tpu.matmul %528, %529, %cst_198 {dimension_numbers = #tpu.dot_dimension_numbers<[1], [1], [0], [0], [0, 0, 1, 0], [], []>} : vector<16x16xf32>, vector<16x16xf32>, vector<16x16xf32> -> vector<16x16xf32>
    %cst_199 = arith.constant dense<0xFF800000> : vector<16xf32>
    %531 = vector.multi_reduction <maximumf>, %530, %cst_199 [1] : vector<16x16xf32> to vector<16xf32>
    %532 = vector.shape_cast %531 : vector<16xf32> to vector<16x1xf32>
    %533 = vector.broadcast %532 : vector<16x1xf32> to vector<16x16xf32>
    %534 = arith.subf %530, %533 : vector<16x16xf32>
    %535 = math.exp %534 : vector<16x16xf32>
    %cst_200 = arith.constant dense<0.000000e+00> : vector<16xf32>
    %536 = vector.multi_reduction <add>, %535, %cst_200 [1] : vector<16x16xf32> to vector<16xf32>
    %537 = vector.shape_cast %536 : vector<16xf32> to vector<16x1xf32>
    %538 = tpu.reciprocal %537 {approx = true} : vector<16x1xf32> -> vector<16x1xf32>
    %539 = vector.broadcast %538 : vector<16x1xf32> to vector<16x16xf32>
    %540 = arith.mulf %535, %539 : vector<16x16xf32>
    %541 = vector.extract_strided_slice %472 {offsets = [0, 48], sizes = [16, 16], strides = [1, 1]} : vector<16x64xf32> to vector<16x16xf32>
    %cst_201 = arith.constant dense<0.000000e+00> : vector<16x16xf32>
    %542 = tpu.matmul %540, %541, %cst_201 {dimension_numbers = #tpu.dot_dimension_numbers<[1], [0], [0], [1], [0, 0, 1, 1], [], []>} : vector<16x16xf32>, vector<16x16xf32>, vector<16x16xf32> -> vector<16x16xf32>
    %543 = vector.extract_strided_slice %393 {offsets = [48, 0], sizes = [16, 64], strides = [1, 1]} : vector<64x64xf32> to vector<16x64xf32>
    %cst_202 = arith.constant dense<0.000000e+00> : vector<16x64xf32>
    %544 = tpu.matmul %542, %543, %cst_202 {dimension_numbers = #tpu.dot_dimension_numbers<[1], [0], [0], [1], [0, 0, 1, 1], [], []>} : vector<16x16xf32>, vector<16x64xf32>, vector<16x64xf32> -> vector<16x64xf32>
    %545 = arith.addf %527, %544 : vector<16x64xf32>
    %546 = tpu.concatenate %469, %545 in 0 : vector<16x64xf32>, vector<16x64xf32> -> vector<32x64xf32>
    %547 = arith.addf %353, %546 : vector<32x64xf32>
    %548 = vector.extract_strided_slice %355 {offsets = [2, 0], sizes = [1, 64], strides = [1, 1]} : vector<12x64xf32> to vector<1x64xf32>
    %c1_203 = arith.constant 1 : index
    %c1_204 = arith.constant 1 : index
    %c0_205 = arith.constant 0 : index
    %c0_206 = arith.constant 0 : index
    %549 = vector.load %arg10[%c1_203, %c1_204, %c0_205, %c0_206] : memref<2x4x64x64xf32, #tpu.memory_space<vmem>>, vector<1x1x64x64xf32>
    %550 = vector.shape_cast %549 : vector<1x1x64x64xf32> to vector<64x64xf32>
    %cst_207 = arith.constant dense<0.000000e+00> : vector<2x64xf32>
    %551 = tpu.matmul %13, %550, %cst_207 {dimension_numbers = #tpu.dot_dimension_numbers<[1], [0], [0], [1], [0, 0, 1, 1], [], []>} : vector<2x64xf32>, vector<64x64xf32>, vector<2x64xf32> -> vector<2x64xf32>
    %552 = vector.broadcast %548 : vector<1x64xf32> to vector<2x64xf32>
    %553 = arith.addf %552, %551 : vector<2x64xf32>
    %554 = vector.extract_strided_slice %355 {offsets = [3, 0], sizes = [1, 64], strides = [1, 1]} : vector<12x64xf32> to vector<1x64xf32>
    %555 = vector.broadcast %554 : vector<1x64xf32> to vector<2x64xf32>
    %556 = arith.addf %553, %555 : vector<2x64xf32>
    %c1_208 = arith.constant 1 : index
    %c0_209 = arith.constant 0 : index
    %c0_210 = arith.constant 0 : index
    %557 = vector.load %arg4[%c1_208, %c0_209, %c0_210] : memref<2x1x64xf32, #tpu.memory_space<vmem>>, vector<1x1x64xf32>
    %558 = vector.shape_cast %557 : vector<1x1x64xf32> to vector<1x64xf32>
    %559 = vector.broadcast %25 : vector<2x1xf32> to vector<2x64xf32>
    %560 = vector.broadcast %558 : vector<1x64xf32> to vector<2x64xf32>
    %561 = arith.mulf %559, %560 : vector<2x64xf32>
    %562 = vector.extract_strided_slice %355 {offsets = [4, 0], sizes = [1, 64], strides = [1, 1]} : vector<12x64xf32> to vector<1x64xf32>
    %563 = vector.broadcast %562 : vector<1x64xf32> to vector<2x64xf32>
    %564 = arith.addf %561, %563 : vector<2x64xf32>
    %565 = vector.extract_strided_slice %355 {offsets = [5, 0], sizes = [1, 64], strides = [1, 1]} : vector<12x64xf32> to vector<1x64xf32>
    %566 = vector.extract_strided_slice %355 {offsets = [6, 0], sizes = [1, 64], strides = [1, 1]} : vector<12x64xf32> to vector<1x64xf32>
    %cst_211 = arith.constant dense<0.000000e+00> : vector<2xf32>
    %567 = vector.multi_reduction <add>, %564, %cst_211 [1] : vector<2x64xf32> to vector<2xf32>
    %568 = vector.shape_cast %567 : vector<2xf32> to vector<2x1xf32>
    %cst_212 = arith.constant 6.400000e+01 : f32
    %569 = vector.broadcast %cst_212 : f32 to vector<2x1xf32>
    %570 = arith.divf %568, %569 : vector<2x1xf32>
    %571 = vector.broadcast %570 : vector<2x1xf32> to vector<2x64xf32>
    %572 = arith.subf %564, %571 : vector<2x64xf32>
    %573 = arith.mulf %572, %572 : vector<2x64xf32>
    %cst_213 = arith.constant dense<0.000000e+00> : vector<2xf32>
    %574 = vector.multi_reduction <add>, %573, %cst_213 [1] : vector<2x64xf32> to vector<2xf32>
    %575 = vector.shape_cast %574 : vector<2xf32> to vector<2x1xf32>
    %cst_214 = arith.constant 6.400000e+01 : f32
    %576 = vector.broadcast %cst_214 : f32 to vector<2x1xf32>
    %577 = arith.divf %575, %576 : vector<2x1xf32>
    %578 = vector.broadcast %570 : vector<2x1xf32> to vector<2x64xf32>
    %579 = arith.subf %564, %578 : vector<2x64xf32>
    %cst_215 = arith.constant 9.99999974E-6 : f32
    %580 = vector.broadcast %cst_215 : f32 to vector<2x1xf32>
    %581 = arith.addf %577, %580 : vector<2x1xf32>
    %582 = math.rsqrt %581 : vector<2x1xf32>
    %583 = vector.broadcast %582 : vector<2x1xf32> to vector<2x64xf32>
    %584 = arith.mulf %579, %583 : vector<2x64xf32>
    %585 = vector.broadcast %565 : vector<1x64xf32> to vector<2x64xf32>
    %586 = arith.mulf %584, %585 : vector<2x64xf32>
    %587 = vector.broadcast %566 : vector<1x64xf32> to vector<2x64xf32>
    %588 = arith.addf %586, %587 : vector<2x64xf32>
    %c1_216 = arith.constant 1 : index
    %c2_217 = arith.constant 2 : index
    %c0_218 = arith.constant 0 : index
    %c0_219 = arith.constant 0 : index
    %589 = vector.load %arg10[%c1_216, %c2_217, %c0_218, %c0_219] : memref<2x4x64x64xf32, #tpu.memory_space<vmem>>, vector<1x1x64x64xf32>
    %590 = vector.shape_cast %589 : vector<1x1x64x64xf32> to vector<64x64xf32>
    %cst_220 = arith.constant dense<0.000000e+00> : vector<2x64xf32>
    %591 = tpu.matmul %588, %590, %cst_220 {dimension_numbers = #tpu.dot_dimension_numbers<[1], [0], [0], [1], [0, 0, 1, 1], [], []>} : vector<2x64xf32>, vector<64x64xf32>, vector<2x64xf32> -> vector<2x64xf32>
    %592 = vector.extract_strided_slice %355 {offsets = [7, 0], sizes = [1, 64], strides = [1, 1]} : vector<12x64xf32> to vector<1x64xf32>
    %593 = vector.broadcast %592 : vector<1x64xf32> to vector<2x64xf32>
    %594 = arith.addf %591, %593 : vector<2x64xf32>
    %c1_221 = arith.constant 1 : index
    %c3_222 = arith.constant 3 : index
    %c0_223 = arith.constant 0 : index
    %c0_224 = arith.constant 0 : index
    %595 = vector.load %arg10[%c1_221, %c3_222, %c0_223, %c0_224] : memref<2x4x64x64xf32, #tpu.memory_space<vmem>>, vector<1x1x64x64xf32>
    %596 = vector.shape_cast %595 : vector<1x1x64x64xf32> to vector<64x64xf32>
    %cst_225 = arith.constant dense<0.000000e+00> : vector<2x64xf32>
    %597 = tpu.matmul %594, %596, %cst_225 {dimension_numbers = #tpu.dot_dimension_numbers<[1], [0], [0], [1], [0, 0, 1, 1], [], []>} : vector<2x64xf32>, vector<64x64xf32>, vector<2x64xf32> -> vector<2x64xf32>
    %598 = arith.addf %556, %597 : vector<2x64xf32>
    %599 = vector.extract_strided_slice %355 {offsets = [8, 0], sizes = [1, 64], strides = [1, 1]} : vector<12x64xf32> to vector<1x64xf32>
    %600 = vector.broadcast %599 : vector<1x64xf32> to vector<2x64xf32>
    %601 = arith.addf %598, %600 : vector<2x64xf32>
    %cst_226 = arith.constant dense<0.000000e+00> : vector<32x64xf32>
    %602 = tpu.matmul %23, %601, %cst_226 {dimension_numbers = #tpu.dot_dimension_numbers<[1], [0], [0], [1], [0, 0, 1, 1], [], []>} : vector<32x2xf32>, vector<2x64xf32>, vector<32x64xf32> -> vector<32x64xf32>
    %603 = arith.addf %547, %602 : vector<32x64xf32>
    %604 = vector.extract_strided_slice %355 {offsets = [9, 0], sizes = [1, 64], strides = [1, 1]} : vector<12x64xf32> to vector<1x64xf32>
    %605 = vector.extract_strided_slice %355 {offsets = [10, 0], sizes = [1, 64], strides = [1, 1]} : vector<12x64xf32> to vector<1x64xf32>
    %cst_227 = arith.constant dense<0.000000e+00> : vector<32xf32>
    %606 = vector.multi_reduction <add>, %603, %cst_227 [1] : vector<32x64xf32> to vector<32xf32>
    %607 = vector.shape_cast %606 : vector<32xf32> to vector<32x1xf32>
    %cst_228 = arith.constant 6.400000e+01 : f32
    %608 = vector.broadcast %cst_228 : f32 to vector<32x1xf32>
    %609 = arith.divf %607, %608 : vector<32x1xf32>
    %610 = vector.broadcast %609 : vector<32x1xf32> to vector<32x64xf32>
    %611 = arith.subf %603, %610 : vector<32x64xf32>
    %612 = arith.mulf %611, %611 : vector<32x64xf32>
    %cst_229 = arith.constant dense<0.000000e+00> : vector<32xf32>
    %613 = vector.multi_reduction <add>, %612, %cst_229 [1] : vector<32x64xf32> to vector<32xf32>
    %614 = vector.shape_cast %613 : vector<32xf32> to vector<32x1xf32>
    %cst_230 = arith.constant 6.400000e+01 : f32
    %615 = vector.broadcast %cst_230 : f32 to vector<32x1xf32>
    %616 = arith.divf %614, %615 : vector<32x1xf32>
    %617 = vector.broadcast %609 : vector<32x1xf32> to vector<32x64xf32>
    %618 = arith.subf %603, %617 : vector<32x64xf32>
    %cst_231 = arith.constant 9.99999974E-6 : f32
    %619 = vector.broadcast %cst_231 : f32 to vector<32x1xf32>
    %620 = arith.addf %616, %619 : vector<32x1xf32>
    %621 = math.rsqrt %620 : vector<32x1xf32>
    %622 = vector.broadcast %621 : vector<32x1xf32> to vector<32x64xf32>
    %623 = arith.mulf %618, %622 : vector<32x64xf32>
    %624 = vector.broadcast %604 : vector<1x64xf32> to vector<32x64xf32>
    %625 = arith.mulf %623, %624 : vector<32x64xf32>
    %626 = vector.broadcast %605 : vector<1x64xf32> to vector<32x64xf32>
    %627 = arith.addf %625, %626 : vector<32x64xf32>
    %c1_232 = arith.constant 1 : index
    %c0_233 = arith.constant 0 : index
    %c0_234 = arith.constant 0 : index
    %628 = vector.load %arg6[%c1_232, %c0_233, %c0_234] : memref<2x64x256xf32, #tpu.memory_space<vmem>>, vector<1x64x256xf32>
    %629 = vector.shape_cast %628 : vector<1x64x256xf32> to vector<64x256xf32>
    %cst_235 = arith.constant dense<0.000000e+00> : vector<32x256xf32>
    %630 = tpu.matmul %627, %629, %cst_235 {dimension_numbers = #tpu.dot_dimension_numbers<[1], [0], [0], [1], [0, 0, 1, 1], [], []>} : vector<32x64xf32>, vector<64x256xf32>, vector<32x256xf32> -> vector<32x256xf32>
    %c1_236 = arith.constant 1 : index
    %c0_237 = arith.constant 0 : index
    %c0_238 = arith.constant 0 : index
    %631 = vector.load %arg5[%c1_236, %c0_237, %c0_238] : memref<2x1x256xf32, #tpu.memory_space<vmem>>, vector<1x1x256xf32>
    %632 = vector.shape_cast %631 : vector<1x1x256xf32> to vector<1x256xf32>
    %633 = vector.broadcast %632 : vector<1x256xf32> to vector<32x256xf32>
    %634 = arith.addf %630, %633 : vector<32x256xf32>
    %cst_239 = arith.constant 5.000000e-01 : f32
    %635 = vector.broadcast %cst_239 : f32 to vector<32x256xf32>
    %636 = arith.mulf %635, %634 : vector<32x256xf32>
    %cst_240 = arith.constant 0.707106769 : f32
    %637 = vector.broadcast %cst_240 : f32 to vector<32x256xf32>
    %638 = arith.mulf %634, %637 : vector<32x256xf32>
    %639 = math.absf %638 : vector<32x256xf32>
    %cst_241 = arith.constant 0.327591091 : f32
    %640 = vector.broadcast %cst_241 : f32 to vector<32x256xf32>
    %641 = arith.mulf %640, %639 : vector<32x256xf32>
    %cst_242 = arith.constant 1.000000e+00 : f32
    %642 = vector.broadcast %cst_242 : f32 to vector<32x256xf32>
    %643 = arith.addf %642, %641 : vector<32x256xf32>
    %cst_243 = arith.constant 1.000000e+00 : f32
    %644 = vector.broadcast %cst_243 : f32 to vector<32x256xf32>
    %645 = arith.divf %644, %643 : vector<32x256xf32>
    %cst_244 = arith.constant 1.06140542 : f32
    %646 = vector.broadcast %cst_244 : f32 to vector<32x256xf32>
    %647 = arith.mulf %645, %646 : vector<32x256xf32>
    %cst_245 = arith.constant -1.45315206 : f32
    %648 = vector.broadcast %cst_245 : f32 to vector<32x256xf32>
    %649 = arith.addf %648, %647 : vector<32x256xf32>
    %650 = arith.mulf %645, %649 : vector<32x256xf32>
    %cst_246 = arith.constant 1.42141378 : f32
    %651 = vector.broadcast %cst_246 : f32 to vector<32x256xf32>
    %652 = arith.addf %651, %650 : vector<32x256xf32>
    %653 = arith.mulf %645, %652 : vector<32x256xf32>
    %cst_247 = arith.constant -0.284496725 : f32
    %654 = vector.broadcast %cst_247 : f32 to vector<32x256xf32>
    %655 = arith.addf %654, %653 : vector<32x256xf32>
    %656 = arith.mulf %645, %655 : vector<32x256xf32>
    %cst_248 = arith.constant 0.254829586 : f32
    %657 = vector.broadcast %cst_248 : f32 to vector<32x256xf32>
    %658 = arith.addf %657, %656 : vector<32x256xf32>
    %659 = arith.mulf %645, %658 : vector<32x256xf32>
    %cst_249 = arith.constant 0.000000e+00 : f32
    %660 = vector.broadcast %cst_249 : f32 to vector<32x256xf32>
    %661 = arith.subf %660, %639 : vector<32x256xf32>
    %662 = arith.mulf %661, %639 : vector<32x256xf32>
    %663 = math.exp %662 : vector<32x256xf32>
    %664 = arith.mulf %659, %663 : vector<32x256xf32>
    %cst_250 = arith.constant 1.000000e+00 : f32
    %665 = vector.broadcast %cst_250 : f32 to vector<32x256xf32>
    %666 = arith.subf %665, %664 : vector<32x256xf32>
    %cst_251 = arith.constant 0.000000e+00 : f32
    %667 = vector.broadcast %cst_251 : f32 to vector<32x256xf32>
    %668 = arith.cmpf olt, %638, %667 : vector<32x256xf32>
    %cst_252 = arith.constant 0.000000e+00 : f32
    %669 = vector.broadcast %cst_252 : f32 to vector<32x256xf32>
    %670 = arith.subf %669, %666 : vector<32x256xf32>
    %671 = arith.select %668, %670, %666 : vector<32x256xi1>, vector<32x256xf32>
    %cst_253 = arith.constant 1.000000e+00 : f32
    %672 = vector.broadcast %cst_253 : f32 to vector<32x256xf32>
    %673 = arith.addf %672, %671 : vector<32x256xf32>
    %674 = arith.mulf %636, %673 : vector<32x256xf32>
    %c1_254 = arith.constant 1 : index
    %c0_255 = arith.constant 0 : index
    %c0_256 = arith.constant 0 : index
    %675 = vector.load %arg7[%c1_254, %c0_255, %c0_256] : memref<2x256x64xf32, #tpu.memory_space<vmem>>, vector<1x256x64xf32>
    %676 = vector.shape_cast %675 : vector<1x256x64xf32> to vector<256x64xf32>
    %cst_257 = arith.constant dense<0.000000e+00> : vector<32x64xf32>
    %677 = tpu.matmul %674, %676, %cst_257 {dimension_numbers = #tpu.dot_dimension_numbers<[1], [0], [0], [1], [0, 0, 1, 1], [], []>} : vector<32x256xf32>, vector<256x64xf32>, vector<32x64xf32> -> vector<32x64xf32>
    %678 = vector.extract_strided_slice %355 {offsets = [11, 0], sizes = [1, 64], strides = [1, 1]} : vector<12x64xf32> to vector<1x64xf32>
    %679 = vector.broadcast %678 : vector<1x64xf32> to vector<32x64xf32>
    %680 = arith.addf %677, %679 : vector<32x64xf32>
    %681 = arith.addf %603, %680 : vector<32x64xf32>
    %c0_258 = arith.constant 0 : index
    %c0_259 = arith.constant 0 : index
    %682 = vector.load %arg14[%c0_258, %c0_259] : memref<1x64xf32, #tpu.memory_space<vmem>>, vector<1x64xf32>
    %c0_260 = arith.constant 0 : index
    %c0_261 = arith.constant 0 : index
    %683 = vector.load %arg13[%c0_260, %c0_261] : memref<1x64xf32, #tpu.memory_space<vmem>>, vector<1x64xf32>
    %cst_262 = arith.constant dense<0.000000e+00> : vector<32xf32>
    %684 = vector.multi_reduction <add>, %681, %cst_262 [1] : vector<32x64xf32> to vector<32xf32>
    %685 = vector.shape_cast %684 : vector<32xf32> to vector<32x1xf32>
    %cst_263 = arith.constant 6.400000e+01 : f32
    %686 = vector.broadcast %cst_263 : f32 to vector<32x1xf32>
    %687 = arith.divf %685, %686 : vector<32x1xf32>
    %688 = vector.broadcast %687 : vector<32x1xf32> to vector<32x64xf32>
    %689 = arith.subf %681, %688 : vector<32x64xf32>
    %690 = arith.mulf %689, %689 : vector<32x64xf32>
    %cst_264 = arith.constant dense<0.000000e+00> : vector<32xf32>
    %691 = vector.multi_reduction <add>, %690, %cst_264 [1] : vector<32x64xf32> to vector<32xf32>
    %692 = vector.shape_cast %691 : vector<32xf32> to vector<32x1xf32>
    %cst_265 = arith.constant 6.400000e+01 : f32
    %693 = vector.broadcast %cst_265 : f32 to vector<32x1xf32>
    %694 = arith.divf %692, %693 : vector<32x1xf32>
    %695 = vector.broadcast %687 : vector<32x1xf32> to vector<32x64xf32>
    %696 = arith.subf %681, %695 : vector<32x64xf32>
    %cst_266 = arith.constant 9.99999974E-6 : f32
    %697 = vector.broadcast %cst_266 : f32 to vector<32x1xf32>
    %698 = arith.addf %694, %697 : vector<32x1xf32>
    %699 = math.rsqrt %698 : vector<32x1xf32>
    %700 = vector.broadcast %699 : vector<32x1xf32> to vector<32x64xf32>
    %701 = arith.mulf %696, %700 : vector<32x64xf32>
    %702 = vector.broadcast %682 : vector<1x64xf32> to vector<32x64xf32>
    %703 = arith.mulf %701, %702 : vector<32x64xf32>
    %704 = vector.broadcast %683 : vector<1x64xf32> to vector<32x64xf32>
    %705 = arith.addf %703, %704 : vector<32x64xf32>
    %c0_267 = arith.constant 0 : index
    %c0_268 = arith.constant 0 : index
    %706 = vector.load %arg18[%c0_267, %c0_268] : memref<64x128xf32, #tpu.memory_space<vmem>>, vector<64x128xf32>
    %cst_269 = arith.constant dense<0.000000e+00> : vector<32x128xf32>
    %707 = tpu.matmul %705, %706, %cst_269 {dimension_numbers = #tpu.dot_dimension_numbers<[1], [0], [0], [1], [0, 0, 1, 1], [], []>} : vector<32x64xf32>, vector<64x128xf32>, vector<32x128xf32> -> vector<32x128xf32>
    %c0_270 = arith.constant 0 : index
    %c0_271 = arith.constant 0 : index
    %708 = vector.load %arg17[%c0_270, %c0_271] : memref<1x128xf32, #tpu.memory_space<vmem>>, vector<1x128xf32>
    %709 = vector.broadcast %708 : vector<1x128xf32> to vector<32x128xf32>
    %710 = arith.addf %707, %709 : vector<32x128xf32>
    %c0_272 = arith.constant 0 : index
    %c0_273 = arith.constant 0 : index
    %c0_274 = arith.constant 0 : index
    %711 = vector.load %arg24[%c0_272, %c0_273, %c0_274] : memref<1x32x128xf32, #tpu.memory_space<vmem>>, vector<1x32x128xf32>
    %712 = vector.shape_cast %711 : vector<1x32x128xf32> to vector<32x128xf32>
    %713 = vector.shape_cast %710 : vector<32x128xf32> to vector<1x32x128xf32>
    tpu.vector_store %arg24[%c0_272, %c0_273, %c0_274], %713 {strides = array<i32>} : memref<1x32x128xf32, #tpu.memory_space<vmem>>, vector<1x32x128xf32>,
    return
  }
  func.func @transform_0(%arg0: i32) -> (i32, i32, i32) {
    %c0_i32 = arith.constant 0 : i32
    %c0_i32_0 = arith.constant 0 : i32
    %c0_i32_1 = arith.constant 0 : i32
    return %arg0, %c0_i32, %c0_i32_0 : i32, i32, i32
  }
  func.func @transform_1(%arg0: i32) -> (i32, i32, i32) {
    %c0_i32 = arith.constant 0 : i32
    %c0_i32_0 = arith.constant 0 : i32
    %c0_i32_1 = arith.constant 0 : i32
    return %arg0, %c0_i32, %c0_i32_0 : i32, i32, i32
  }
  func.func @transform_2(%arg0: i32) -> (i32, i32, i32) {
    %c0_i32 = arith.constant 0 : i32
    %c0_i32_0 = arith.constant 0 : i32
    %c0_i32_1 = arith.constant 0 : i32
    return %arg0, %c0_i32, %c0_i32_0 : i32, i32, i32
  }
  func.func @transform_3(%arg0: i32) -> (i32, i32, i32) {
    %c0_i32 = arith.constant 0 : i32
    %c0_i32_0 = arith.constant 0 : i32
    %c0_i32_1 = arith.constant 0 : i32
    %c0_i32_2 = arith.constant 0 : i32
    return %c0_i32, %c0_i32_0, %c0_i32_1 : i32, i32, i32
  }
  func.func @transform_4(%arg0: i32) -> (i32, i32, i32) {
    %c0_i32 = arith.constant 0 : i32
    %c0_i32_0 = arith.constant 0 : i32
    %c0_i32_1 = arith.constant 0 : i32
    %c0_i32_2 = arith.constant 0 : i32
    return %c0_i32, %c0_i32_0, %c0_i32_1 : i32, i32, i32
  }
  func.func @transform_5(%arg0: i32) -> (i32, i32, i32) {
    %c0_i32 = arith.constant 0 : i32
    %c0_i32_0 = arith.constant 0 : i32
    %c0_i32_1 = arith.constant 0 : i32
    %c0_i32_2 = arith.constant 0 : i32
    return %c0_i32, %c0_i32_0, %c0_i32_1 : i32, i32, i32
  }
  func.func @transform_6(%arg0: i32) -> (i32, i32, i32) {
    %c0_i32 = arith.constant 0 : i32
    %c0_i32_0 = arith.constant 0 : i32
    %c0_i32_1 = arith.constant 0 : i32
    %c0_i32_2 = arith.constant 0 : i32
    return %c0_i32, %c0_i32_0, %c0_i32_1 : i32, i32, i32
  }
  func.func @transform_7(%arg0: i32) -> (i32, i32, i32) {
    %c0_i32 = arith.constant 0 : i32
    %c0_i32_0 = arith.constant 0 : i32
    %c0_i32_1 = arith.constant 0 : i32
    %c0_i32_2 = arith.constant 0 : i32
    return %c0_i32, %c0_i32_0, %c0_i32_1 : i32, i32, i32
  }
  func.func @transform_8(%arg0: i32) -> (i32, i32, i32) {
    %c0_i32 = arith.constant 0 : i32
    %c0_i32_0 = arith.constant 0 : i32
    %c0_i32_1 = arith.constant 0 : i32
    %c0_i32_2 = arith.constant 0 : i32
    return %c0_i32, %c0_i32_0, %c0_i32_1 : i32, i32, i32
  }
  func.func @transform_9(%arg0: i32) -> (i32, i32, i32, i32) {
    %c0_i32 = arith.constant 0 : i32
    %c0_i32_0 = arith.constant 0 : i32
    %c0_i32_1 = arith.constant 0 : i32
    %c0_i32_2 = arith.constant 0 : i32
    %c0_i32_3 = arith.constant 0 : i32
    return %c0_i32, %c0_i32_0, %c0_i32_1, %c0_i32_2 : i32, i32, i32, i32
  }
  func.func @transform_10(%arg0: i32) -> (i32, i32, i32) {
    %c0_i32 = arith.constant 0 : i32
    %c0_i32_0 = arith.constant 0 : i32
    %c0_i32_1 = arith.constant 0 : i32
    %c0_i32_2 = arith.constant 0 : i32
    return %c0_i32, %c0_i32_0, %c0_i32_1 : i32, i32, i32
  }
  func.func @transform_11(%arg0: i32) -> (i32, i32) {
    %c0_i32 = arith.constant 0 : i32
    %c0_i32_0 = arith.constant 0 : i32
    %c0_i32_1 = arith.constant 0 : i32
    return %c0_i32, %c0_i32_0 : i32, i32
  }
  func.func @transform_12(%arg0: i32) -> (i32, i32) {
    %c0_i32 = arith.constant 0 : i32
    %c0_i32_0 = arith.constant 0 : i32
    %c0_i32_1 = arith.constant 0 : i32
    return %c0_i32, %c0_i32_0 : i32, i32
  }
  func.func @transform_13(%arg0: i32) -> (i32, i32) {
    %c0_i32 = arith.constant 0 : i32
    %c0_i32_0 = arith.constant 0 : i32
    %c0_i32_1 = arith.constant 0 : i32
    return %c0_i32, %c0_i32_0 : i32, i32
  }
  func.func @transform_14(%arg0: i32) -> (i32, i32) {
    %c0_i32 = arith.constant 0 : i32
    %c0_i32_0 = arith.constant 0 : i32
    %c0_i32_1 = arith.constant 0 : i32
    return %c0_i32, %c0_i32_0 : i32, i32
  }
  func.func @transform_15(%arg0: i32) -> (i32, i32) {
    %c0_i32 = arith.constant 0 : i32
    %c0_i32_0 = arith.constant 0 : i32
    %c0_i32_1 = arith.constant 0 : i32
    return %c0_i32, %c0_i32_0 : i32, i32
  }
  func.func @transform_16(%arg0: i32) -> (i32, i32) {
    %c0_i32 = arith.constant 0 : i32
    %c0_i32_0 = arith.constant 0 : i32
    %c0_i32_1 = arith.constant 0 : i32
    return %c0_i32, %c0_i32_0 : i32, i32
  }
  func.func @transform_17(%arg0: i32) -> (i32, i32) {
    %c0_i32 = arith.constant 0 : i32
    %c0_i32_0 = arith.constant 0 : i32
    %c0_i32_1 = arith.constant 0 : i32
    return %c0_i32, %c0_i32_0 : i32, i32
  }
  func.func @transform_18(%arg0: i32) -> (i32, i32) {
    %c0_i32 = arith.constant 0 : i32
    %c0_i32_0 = arith.constant 0 : i32
    %c0_i32_1 = arith.constant 0 : i32
    return %c0_i32, %c0_i32_0 : i32, i32
  }
  func.func @transform_19(%arg0: i32) -> (i32, i32) {
    %c0_i32 = arith.constant 0 : i32
    %c0_i32_0 = arith.constant 0 : i32
    %c0_i32_1 = arith.constant 0 : i32
    return %c0_i32, %c0_i32_0 : i32, i32
  }
  func.func @transform_20(%arg0: i32) -> (i32, i32) {
    %c0_i32 = arith.constant 0 : i32
    %c0_i32_0 = arith.constant 0 : i32
    %c0_i32_1 = arith.constant 0 : i32
    return %c0_i32, %c0_i32_0 : i32, i32
  }
  func.func @transform_21(%arg0: i32) -> (i32, i32) {
    %c0_i32 = arith.constant 0 : i32
    %c0_i32_0 = arith.constant 0 : i32
    %c0_i32_1 = arith.constant 0 : i32
    return %c0_i32, %c0_i32_0 : i32, i32
  }
  func.func @transform_22(%arg0: i32) -> (i32, i32) {
    %c0_i32 = arith.constant 0 : i32
    %c0_i32_0 = arith.constant 0 : i32
    %c0_i32_1 = arith.constant 0 : i32
    return %c0_i32, %c0_i32_0 : i32, i32
  }
  func.func @transform_23(%arg0: i32) -> (i32, i32, i32) {
    %c0_i32 = arith.constant 0 : i32
    %c0_i32_0 = arith.constant 0 : i32
    %c0_i32_1 = arith.constant 0 : i32
    return %arg0, %c0_i32, %c0_i32_0 : i32, i32, i32
  }
}

</mosaic_0001>

<bundles_post_ra>
// kernel: _lambda_.1
= control target key start
LH: loop header
LB: loop body
LE: loop exit
PB: predicated region body
PF: predicated region fallthrough
CT: control target
= control target key end

     0   :  { %v9465_v0 = vmov 0.0|0.0   ;;  %vm9466_vm0 = vmmov 0   ;;  %v9467_v4 = vmov 0.0   ;;  %vm86_vm1 = vcmask 261120   ;;  %s9473_s25 = smov 48   ;;  %s11469_s21 = inlined_call_operand.vmem [shape: f32[32,32], index: 21, kind: input, shape index: {}]   ;;  %s11470_s22 = inlined_call_operand.vmem [shape: f32[32,64], index: 22, kind: input, shape index: {}]   ;;  %s11471_s0 = inlined_call_operand.vmem [shape: f32[1,2,32], index: 0, kind: input, shape index: {}]   ;;  %s11472_s15 = inlined_call_operand.vmem [shape: f32[16,64], index: 15, kind: input, shape index: {}]   ;;  %s11473_s19 = inlined_call_operand.vmem [shape: f32[1,32], index: 19, kind: input, shape index: {}]   ;;  %s11474_s1 = inlined_call_operand.vmem [shape: f32[1,32,16], index: 1, kind: input, shape index: {}]   ;;  %s11475_s14 = inlined_call_operand.vmem [shape: f32[1,64], index: 14, kind: input, shape index: {}]   ;;  %s11476_s18 = inlined_call_operand.vmem [shape: f32[32,64], index: 18, kind: input, shape index: {}]   ;;  %s11477_s8 = inlined_call_operand.vmem [shape: f32[2,64,192], index: 8, kind: input, shape index: {}]   ;;  %s11478_s10 = inlined_call_operand.vmem [shape: f32[2,12,64], index: 10, kind: input, shape index: {}]   ;;  %s11479_s7 = inlined_call_operand.vmem [shape: f32[2,1,192], index: 7, kind: input, shape index: {}]   ;;  %s11480_s9 = inlined_call_operand.vmem [shape: f32[2,4,64,64], index: 9, kind: input, shape index: {}]   ;;  %s11481_s20 = inlined_call_operand.vmem [shape: f32[1,64], index: 20, kind: input, shape index: {}]   ;;  %s11482_s2 = inlined_call_operand.vmem [shape: f32[1,2,1], index: 2, kind: input, shape index: {}]   ;;  %s11483_s3 = inlined_call_operand.vmem [shape: f32[2,1,64], index: 3, kind: input, shape index: {}]   ;;  %s11484_s11 = inlined_call_operand.vmem [shape: f32[32,2], index: 11, kind: input, shape index: {}]   ;;  %s11485_s5 = inlined_call_operand.vmem [shape: f32[2,64,256], index: 5, kind: input, shape index: {}]   ;;  %s11486_s6 = inlined_call_operand.vmem [shape: f32[2,256,64], index: 6, kind: input, shape index: {}]   ;;  %s11487_s4 = inlined_call_operand.vmem [shape: f32[2,1,256], index: 4, kind: input, shape index: {}]   ;;  %s11488_s17 = inlined_call_operand.vmem [shape: f32[64,128], index: 17, kind: input, shape index: {}]   ;;  %s11489_s13 = inlined_call_operand.vmem [shape: f32[1,64], index: 13, kind: input, shape index: {}]   ;;  %s11490_s12 = inlined_call_operand.vmem [shape: f32[1,64], index: 12, kind: input, shape index: {}]   ;;  %s11491_s16 = inlined_call_operand.vmem [shape: f32[1,128], index: 16, kind: input, shape index: {}]   ;;  %s11492_s23 = inlined_call_operand.vmem [shape: f32[1,32,128], index: 23, kind: output, shape index: {}]  }
   0x1   :  { %11498 = sst [smem:[#allocation2_spill]] %s11469_s21  ;;  %8575 = vmatprep.subr.bf16.mxu0 %v9465_v0  ;;  %8063 = vmatprep.mubr.msk.f32.mxu0 %vm9466_vm0, %v9467_v4  ;;  %vm258_vm2 = vcmask 130048   ;;  %vm371_vm3 = vcmask 523264   ;;  %v442_v50 = vld [vmem:[%s11477_s8 + $0x8] sm:$0xff]  ;;  %v444_v51 = vld [vmem:[%s11477_s8 + $0x18] sm:$0xff]  ;;  %v441_v53 = vld [vmem:[%s11477_s8] sm:$0xff] }
   0x2   :  { %11499 = sst [smem:[#allocation3_spill]] %s11470_s22  ;;  %s11506_s24 = sld [smem:[#allocation2_spill]]  ;;  %545 = vmatprep.mubr.f32.mxu1 %v9467_v4  ;;  %v8591_v52 = vpack.c.bf16 %v444_v51, %v442_v50  ;;  %v443_v54 = vld [vmem:[%s11477_s8 + $0x10] sm:$0xff]  ;;  %v446_v56 = vld [vmem:[%s11477_s8 + $0x28] sm:$0xff]  ;;  %v448_v57 = vld [vmem:[%s11477_s8 + $0x38] sm:$0xff]  ;;  %vm2944_vm5 = vcmask 517120  }
   0x3   :  { %11500 = sst [smem:[#allocation4_spill]] %s11471_s0  ;;  %s11507_s28 = sld [smem:[#allocation3_spill]]  ;;  %v8593_v55 = vpack.c.bf16 %v443_v54, %v441_v53  ;;  %v8595_v58 = vpack.c.bf16 %v448_v57, %v446_v56  ;;  %v445_v59 = vld [vmem:[%s11477_s8 + $0x20] sm:$0xff]  ;;  %v447_v60 = vld [vmem:[%s11477_s8 + $0x30] sm:$0xff]  ;;  %v450_v62 = vld [vmem:[%s11477_s8 + $0x48] sm:$0xff]  ;;  %vm3142_vm6 = vcmask 15360  }
   0x4   :  { %11501 = sst [smem:[#allocation5_spill]] %s11472_s15  ;;  %s11508_s30 = sld [smem:[#allocation4_spill]]  ;;  %8592 = vmatprep.subr.bf16.mxu1 %v8591_v52  ;;  %v8597_v61 = vpack.c.bf16 %v447_v60, %v445_v59  ;;  %v452_v63 = vld [vmem:[%s11477_s8 + $0x58] sm:$0xff]  ;;  %vm9806_vm4 = vmpackc.low %vm258_vm2, %vm258_vm2  ;;  %vm3155_vm7 = vcmask 1041408  }
   0x5   :  { %11502 = sst [smem:[#allocation6_spill]] %s11473_s19  ;;  %8594 = vmatpush1.bf16.msra.mxu1 %v8593_v55  ;;  %s9468_s15 = smov 64  }
   0x6   :  { %11503 = sst [smem:[#allocation7_spill]] %s11474_s1  ;;  %s11510_s21 = sld [smem:[#allocation6_spill]]  ;;  %8596 = vmatprep.subr.bf16.mxu1 %v8595_v58 }
   0x7   :  { %11504 = sst [smem:[#allocation8_spill]] %s11475_s14  ;;  %s11509_s14 = sld [smem:[#allocation5_spill]] }
   0x8   :  { %11505 = sst [smem:[#allocation9_spill]] %s11476_s18  ;;  %v75_v1 = vld [vmem:[%s11506_s24] sm:$0xff]  ;;  %v76_v2 = vld [vmem:[%s11506_s24 + $0x8] sm:$0xff]  ;;  %v77_v3 = vld [vmem:[%s11506_s24 + $0x10] sm:$0xff]  ;;  %s11512_s18 = sld [smem:[#allocation8_spill]] }
   0x9   :  { %v8576_v5 = vpack.c.bf16 %v76_v2, %v75_v1  ;;  %v78_v6 = vld [vmem:[%s11506_s24 + $0x18] sm:$0xff]  ;;  %v161_v8 = vld [vmem:[%s11507_s28] sm:$0xff]  ;;  %v162_v9 = vld [vmem:[%s11507_s28 + $0x8] sm:$0xff]  ;;  %v8599_v2 = vpack.c.bf16 %v452_v63, %v450_v62  ;;  %8598 = vmatpush1.bf16.msra.mxu1 %v8597_v61  ;;  %s9470_s19 = smov 96   ;;  %s9472_s24 = smov 80  }
   0xa   :  { %v8579_v7 = vpack.c.bf16 %v78_v6, %v77_v3  ;;  %v74_v10 = vld [vmem:[%s11508_s30] sm:$0x3]  ;;  %v8582_v11 = vpack.c.bf16 %v162_v9, %v161_v8  ;;  %v163_v12 = vld [vmem:[%s11507_s28 + $0x10] sm:$0xff]  ;;  %v164_v13 = vld [vmem:[%s11507_s28 + $0x18] sm:$0xff]  ;;  %s11511_s30 = sld [smem:[#allocation7_spill]]  ;;  %s9469_s28 = smov 32  }
   0xb   :  { %8577 = vmatpush3.bf16.msra.mxu0 %v8576_v5  ;;  %v8585_v14 = vpack.c.bf16 %v164_v13, %v163_v12  ;;  %v449_v1 = vld [vmem:[%s11477_s8 + $0x40] sm:$0xff]  ;;  %v451_v3 = vld [vmem:[%s11477_s8 + $0x50] sm:$0xff]  ;;  %v454_v5 = vld [vmem:[%s11477_s8 + $0x68] sm:$0xff]  ;;  %8600 = vmatprep.subr.bf16.mxu1 %v8599_v2  ;;  %s9474_s1 = smov 16  }
   0xc   :  { %8578 = vmatprep.subr.bf16.mxu0 %v9465_v0  ;;  %v7380_v18 = vld [vmem:[%s11510_s21] ss:$0 sm:$0xff]  ;;  %s11513_s21 = sld [smem:[#allocation9_spill]]  ;;  %v456_v6 = vld [vmem:[%s11477_s8 + $0x78] sm:$0xff] }
   0xd   :  { %v249_v15 = vld [vmem:[%s11509_s14] sm:$0xff]  ;;  %v250_v16 = vld [vmem:[%s11509_s14 + $0x8] sm:$0xff]  ;;  %v8603_v8 = vpack.c.bf16 %v456_v6, %v454_v5 }
   0xe   :  { %v8587_v17 = vpack.c.bf16 %v250_v16, %v249_v15  ;;  %v9664_v29 = vld [vmem:[%s11512_s18] ss:$0 sm:$0xff] }
   0xf   :  { %8580 = vmatpush3.bf16.msra.mxu0 %v8579_v7  ;;  %v8601_v7 = vpack.c.bf16 %v451_v3, %v449_v1  ;;  %v453_v9 = vld [vmem:[%s11477_s8 + $0x60] sm:$0xff] }
  0x10   :  { %8581 = vmatprep.subr.bf16.mxu0 %v9465_v0  ;;  %v245_v23 = vld [vmem:[%s11511_s30] sm:$0xff]  ;;  %v246_v24 = vld [vmem:[%s11511_s30 + $0x8] sm:$0xff]  ;;  %v247_v25 = vld [vmem:[%s11511_s30 + $0x10] sm:$0xff] }
  0x11   :  { %v248_v26 = vld [vmem:[%s11511_s30 + $0x18] sm:$0xff]  ;;  %8602 = vmatpush1.bf16.msra.mxu1 %v8601_v7  ;;  %v457_v6 = vld [vmem:[%s11479_s7] sm:$0x3]  ;;  %s9471_s30 = smov 112  }
  0x12   :  { %8064 = vmatmul.mubr.msk.f32.vlgmr.msra.gmra.mrb[0].mxu0 %vm86_vm1, %v74_v10  ;;  %v356_v32 = vld [vmem:[%s11513_s21] sm:$0xff]  ;;  %v357_v35 = vld [vmem:[%s11513_s21 + $0x8] sm:$0xff]  ;;  %v455_v10 = vld [vmem:[%s11477_s8 + $0x70] sm:$0xff]  ;;  %8604 = vmatprep.subr.bf16.mxu1 %v8603_v8 }
  0x13   :  { %8583 = vmatpush3.bf16.msra.mxu0 %v8582_v11  ;;  %8074 = vmatprep.mubr.msk.f32.mxu0 %vm9466_vm0, %v9467_v4  ;;  %v8605_v11 = vpack.c.bf16 %v455_v10, %v453_v9  ;;  %v358_v16 = vld [vmem:[%s11513_s21 + $0x10] sm:$0xff] }
  0x14   :  { %8584 = vmatprep.subr.bf16.mxu0 %v9465_v0 }
  0x15   :  { %8606 = vmatpush1.bf16.msra.mxu1 %v8605_v11 }
  0x17   :  { %8586 = vmatpush3.bf16.msra.mxu0 %v8585_v14  ;;  %v359_v14 = vld [vmem:[%s11513_s21 + $0x18] sm:$0xff] }
  0x18   :  { %8588 = vmatprep.subr.bf16.mxu0 %v8587_v17 }
  0xe5   :  { %v156_v19 = vpop.f32.mrb[0].mxu0 }
  0xe6   :  { %v157_v20 = vadd.f32 %v7380_v18, %v156_v19  ;;  %v8065_v21 = vpop.f32.mrb[1].mxu0 }
  0xe8   :  { %v160_v22 = vmax.f32 %v157_v20, 0.0 }
  0xea   :  { %8075 = vmatmul.mubr.msk.f32.vlgmr.msra.gmra.mrb[2].mxu0 %vm86_vm1, %v160_v22 }
  0xeb   :  { %8590 = vmatpush3.bf16.msra.mxu0 %v8587_v17  ;;  %8081 = vmatprep.mubr.msk.f32.mxu0 %vm258_vm2, %v245_v23 }
  0xee   :  { %8082 = vmatmul.mubr.msk.f32.vlgmr.msra.gmra.mrb[4].mxu0 %vm258_vm2, %v246_v24  ;;  %v425_v24 = vlaneseq }
  0xef   :  { %8084 = vmatprep.mubr.msk.f32.mxu0 %vm258_vm2, %v247_v25 }
  0xf2   :  { %8085 = vmatmul.mubr.msk.f32.gmra.mrb[6].mxu0 %vm258_vm2, %v248_v26 }
 0x1bd   :  { %v9659_v27 = vpop.f32.mrb[2].mxu0 }
 0x1be   :  { %v8076_v28 = vpop.f32.mrb[3].mxu0 }
 0x1c1   :  { %v8083_v30 = vpop.f32.mrb[4].mxu0 }
 0x1c2   :  { %v337_v31 = vpop.f32.mrb[5].mxu0  ;;  %v343_v33 = vadd.f32 %v8083_v30, %v9664_v29 }
 0x1c3   :  { %v338_v34 = vadd.f32 %v9664_v29, %v337_v31 }
 0x1c4   :  { %v9676_v37 = vadd.f32 %v357_v35, %v343_v33 }
 0x1c5   :  { %v9674_v36 = vadd.f32 %v356_v32, %v338_v34  ;;  %v8086_v12 = vpop.f32.mrb[6].mxu0  ;;  %v369_v32 = vld [vmem:[%s11478_s10] sm:$0xff] }
 0x1c6   :  { %v375_v39 = vsel %vm371_vm3, %v9676_v37, 0.0  ;;  %v353_v13 = vadd.f32 %v8086_v12, %v9664_v29  ;;  %v347_v15 = vpop.f32.mrb[7].mxu0 }
 0x1c7   :  { %v372_v38 = vsel %vm371_vm3, %v9674_v36, 0.0  ;;  %v348_v17 = vadd.f32 %v9664_v29, %v347_v15  ;;  %v9758_v29 = vshrl.u32 %v425_v24, 7 }
 0x1c8   :  { %373 = vadd.xlane.f32.xlu0 %v372_v38  ;;  %v9750_v18 = vadd.f32 %v359_v14, %v353_v13 }
 0x1c9   :  { %v9752_v19 = vadd.f32 %v358_v16, %v348_v17  ;;  %v9761_v31 = vsub.s32 0, %v9758_v29  ;;  %v9767_v33 = vsub.s32 1, %v9758_v29 }
 0x1ca   :  { %v381_v21 = vsel %vm371_vm3, %v9750_v18, 0.0 }
 0x1cb   :  { %v378_v20 = vsel %vm371_vm3, %v9752_v19, 0.0  ;;  %v428_v34 = vrot.slane %v369_v32, %v9761_v31  ;;  %v462_v8 = vrot.slane %v457_v6, %v9761_v31  ;;  %v466_v13 = vrot.slane %v457_v6, %v9767_v33 }
 0x1cc   :  { %376 = vadd.xlane.f32.xlu0 %v375_v39  ;;  %v436_v39 = vrot.slane %v369_v32, %v9767_v33 }
 0x255   :  { %v374_v40 = vpop.xlane.xlu0 %373 }
 0x256   :  { %v385_v41 = vmul.f32 0.015625, %v374_v40 }
 0x258   :  { %v9683_v42 = vsub.f32 %v9674_v36, %v385_v41 }
 0x259   :  { %v377_v43 = vpop.xlane.xlu0 %376 }
 0x25a   :  { %v386_v44 = vmul.f32 0.015625, %v377_v43  ;;  %v393_v45 = vmul.f32 %v9683_v42, %v9683_v42 }
 0x25c   :  { %v9688_v46 = vsub.f32 %v9676_v37, %v386_v44  ;;  %v397_v47 = vsel %vm371_vm3, %v393_v45, 0.0 }
 0x25d   :  { %398 = vadd.xlane.f32.xlu1 %v397_v47 }
 0x25e   :  { %v394_v48 = vmul.f32 %v9688_v46, %v9688_v46 }
 0x260   :  { %v400_v49 = vsel %vm371_vm3, %v394_v48, 0.0 }
 0x261   :  { %401 = vadd.xlane.f32.xlu1 %v400_v49 }
 0x265   :  { %379 = vadd.xlane.f32.xlu1 %v378_v20 }
 0x269   :  { %382 = vadd.xlane.f32.xlu1 %v381_v21 }
 0x2ea   :  { %v399_v22 = vpop.xlane.xlu1 %398 }
 0x2eb   :  { %v409_v23 = vmul.f32 0.015625, %v399_v22 }
 0x2ed   :  { %v413_v25 = vadd.f32 1e-05, %v409_v23 }
 0x2ee   :  { %v402_v26 = vpop.xlane.xlu1 %401 }
 0x2ef   :  { %9223 = vrsqrt.f32 %v413_v25  ;;  %v410_v28 = vmul.f32 0.015625, %v402_v26 }
 0x2f1   :  { %v414_v30 = vadd.f32 1e-05, %v410_v28 }
 0x2f2   :  { %v380_v48 = vpop.xlane.xlu1 %379 }
 0x2f3   :  { %9225 = vrsqrt.f32 %v414_v30  ;;  %v387_v49 = vmul.f32 0.015625, %v380_v48 }
 0x2f6   :  { %v383_v50 = vpop.xlane.xlu1 %382 }
 0x2f7   :  { %v388_v51 = vmul.f32 0.015625, %v383_v50 }
 0x2f9   :  { %v9224_v35 = vpop.eup %9223  ;;  %v392_v53 = vsub.f32 %v9750_v18, %v388_v51 }
 0x2fa   :  { %v421_v38 = vmul.f32 %v9224_v35, %v9683_v42  ;;  %v391_v42 = vsub.f32 %v9752_v19, %v387_v49 }
 0x2fb   :  { %v396_v54 = vmul.f32 %v392_v53, %v392_v53 }
 0x2fc   :  { %v429_v40 = vmul.f32 %v428_v34, %v421_v38  ;;  %v395_v52 = vmul.f32 %v391_v42, %v391_v42  ;;  %v7591_v38 = vld [vmem:[%s11480_s9 + $0x150] sm:$0xff] }
 0x2fd   :  { %v9226_v41 = vpop.eup %9225  ;;  %v406_v55 = vsel %vm371_vm3, %v396_v54, 0.0 }
 0x2fe   :  { %v437_v43 = vadd.f32 %v436_v39, %v429_v40  ;;  %v422_v44 = vmul.f32 %v9226_v41, %v9688_v46  ;;  %v403_v46 = vsel %vm371_vm3, %v395_v52, 0.0 }
 0x2ff   :  { %404 = vadd.xlane.f32.xlu1 %v403_v46 }
 0x300   :  { %7389 = vmatmul.mubr.msk.f32.vlgmr.msra.gmra.mrb[0].mxu1 %vm371_vm3, %v437_v43  ;;  %v430_v45 = vmul.f32 %v428_v34, %v422_v44 }
 0x301   :  { %551 = vmatprep.mubr.f32.mxu1 %v9467_v4 }
 0x302   :  { %v438_v47 = vadd.f32 %v436_v39, %v430_v45 }
 0x303   :  { %407 = vadd.xlane.f32.xlu1 %v406_v55 }
 0x304   :  { %7390 = vmatmul.mubr.msk.f32.gmra.mrb[2].mxu1 %vm371_vm3, %v438_v47 }
 0x305   :  { %557 = vmatprep.mubr.f32.mxu1 %v9467_v4 }
 0x38c   :  { %v405_v56 = vpop.xlane.xlu1 %404 }
 0x38d   :  { %v411_v57 = vmul.f32 0.015625, %v405_v56 }
 0x38f   :  { %v415_v59 = vadd.f32 1e-05, %v411_v57 }
 0x390   :  { %v408_v58 = vpop.xlane.xlu1 %407 }
 0x391   :  { %v412_v60 = vmul.f32 0.015625, %v408_v58  ;;  %9227 = vrsqrt.f32 %v415_v59 }
 0x393   :  { %v416_v61 = vadd.f32 1e-05, %v412_v60 }
 0x395   :  { %9229 = vrsqrt.f32 %v416_v61 }
 0x39b   :  { %v9228_v62 = vpop.eup %9227 }
 0x39c   :  { %v423_v63 = vmul.f32 %v9228_v62, %v391_v42 }
 0x39e   :  { %v431_v2 = vmul.f32 %v428_v34, %v423_v63 }
 0x39f   :  { %v9230_v1 = vpop.eup %9229 }
 0x3a0   :  { %v439_v3 = vadd.f32 %v436_v39, %v431_v2  ;;  %v424_v5 = vmul.f32 %v9230_v1, %v392_v53 }
 0x3a2   :  { %7391 = vmatmul.mubr.msk.f32.gmra.mrb[4].mxu1 %vm371_vm3, %v439_v3  ;;  %v432_v7 = vmul.f32 %v428_v34, %v424_v5 }
 0x3a3   :  { %563 = vmatprep.mubr.f32.mxu1 %v9467_v4 }
 0x3a4   :  { %v440_v9 = vadd.f32 %v436_v39, %v432_v7 }
 0x3a6   :  { %7392 = vmatmul.mubr.msk.f32.gmra.mrb[6].mxu1 %vm371_vm3, %v440_v9 }
 0x3d3   :  { %v547_v10 = vpop.f32.mrb[0].mxu1 }
 0x3d4   :  { %v548_v11 = vadd.f32 %v547_v10, %v462_v8  ;;  %v549_v12 = vpop.f32.mrb[1].mxu1 }
 0x3d5   :  { %v550_v20 = vadd.f32 %v549_v12, %v466_v13 }
 0x3d6   :  { %v9789_v14 = vmul.f32 0.25, %v548_v11 }
 0x3d7   :  { %v553_v15 = vpop.f32.mrb[2].mxu1 }
 0x3d8   :  { %v554_v16 = vadd.f32 %v553_v15, %v462_v8  ;;  %v555_v17 = vpop.f32.mrb[3].mxu1  ;;  %8091 = vmatprep.mubr.msk.f32.mxu0 %vm258_vm2, %v9789_v14 }
 0x3d9   :  { %v556_v21 = vadd.f32 %v555_v17, %v466_v13 }
 0x3da   :  { %v9793_v22 = vpack.i.bf16 %v554_v16, %v548_v11  ;;  %v571_v25 = vmul.f32 0.25, %v554_v16 }
 0x3db   :  { %v8613_v23 = vpack.c.bf16 %v556_v21, %v550_v20  ;;  %v9795_v24 = vpack.i.bf16 %v556_v21, %v550_v20 }
 0x3dc   :  { %9083 = vrot.lane.b32.xlu0 %v9793_v22, %s9468_s15  ;;  %9088 = vrot.lane.b32.xlu1 %v9793_v22, %s9469_s28 }
 0x3e0   :  { %1140 = vrot.lane.b32.xlu0 %v9789_v14, %s9470_s19 }
 0x3e4   :  { %1142 = vrot.lane.b32.xlu0 %v571_v25, %s9470_s19 }
 0x44e   :  { %v9084_v26 = vpop.permute.xlu0 %9083  ;;  %v9089_v28 = vpop.permute.xlu1 %9088 }
 0x44f   :  { %v9086_v30 = vunpack.i.h.bf16 %v9084_v26  ;;  %v9085_v32 = vunpack.i.l.bf16 %v9084_v26  ;;  %v9091_v34 = vunpack.i.h.bf16 %v9089_v28  ;;  %v9090_v35 = vunpack.i.l.bf16 %v9089_v28 }
 0x451   :  { %v8607_v39 = vpack.c.bf16 %v9086_v30, %v9085_v32  ;;  %v8635_v40 = vpack.c.bf16 %v9091_v34, %v9090_v35 }
 0x452   :  { %v1141_v41 = vpop.permute.xlu0 %1140 }
 0x453   :  { %8609 = vmatprep.subr.msk.bf16.mxu0 %vm9806_vm4, %v8607_v39  ;;  %8637 = vmatprep.subr.msk.bf16.mxu1 %vm9806_vm4, %v8635_v40 }
 0x454   :  { %8133 = vmatprep.mubr.msk.f32.mxu1 %vm258_vm2, %v1141_v41  ;;  %8612 = vmatpush3.bf16.xpose.msk.msra.mxu0 %vm9806_vm4, %v8607_v39 }
 0x455   :  { %8640 = vmatpush3.bf16.xpose.msk.msra.mxu1 %vm9806_vm4, %v8635_v40  ;;  %8614 = vmatprep.subr.bf16.mxu0 %v8613_v23 }
 0x456   :  { %v1143_v43 = vpop.permute.xlu0 %1142 }
 0x45b   :  { %8092 = vmatmul.mubr.msk.f32.vlgmr.msra.gmra.mrb[8].mxu0 %vm258_vm2, %v571_v25 }
 0x45c   :  { %8134 = vmatmul.mubr.msk.f32.vlgmr.msra.gmra.mrb[8].mxu1 %vm258_vm2, %v1143_v43  ;;  %8616 = vmatpush3.bf16.msra.mxu0 %v8613_v23 }
 0x475   :  { %v559_v44 = vpop.f32.mrb[4].mxu1 }
 0x476   :  { %v561_v45 = vpop.f32.mrb[5].mxu1  ;;  %v9821_v49 = vadd.f32 %v559_v44, %v462_v8 }
 0x477   :  { %v562_v50 = vadd.f32 %v561_v45, %v466_v13 }
 0x479   :  { %v565_v47 = vpop.f32.mrb[6].mxu1 }
 0x47a   :  { %v567_v48 = vpop.f32.mrb[7].mxu1  ;;  %v9823_v42 = vadd.f32 %v565_v47, %v462_v8 }
 0x47b   :  { %v568_v51 = vadd.f32 %v567_v48, %v466_v13 }
 0x47c   :  { %v9827_v52 = vpack.i.bf16 %v9823_v42, %v9821_v49 }
 0x47d   :  { %v9829_v53 = vpack.c.bf16 %v568_v51, %v562_v50  ;;  %v9831_v46 = vpack.i.bf16 %v568_v51, %v562_v50 }
 0x52e   :  { %v8093_v54 = vpop.f32.mrb[8].mxu0 }
 0x52f   :  { %v9833_v55 = vpop.f32.mrb[8].mxu1  ;;  %v664_v56 = vpop.f32.mrb[9].mxu0  ;;  %v676_v57 = vsel %vm258_vm2, %v8093_v54, -inf }
 0x530   :  { %v1222_v58 = vpop.f32.mrb[9].mxu1  ;;  %677 = vmax.xlane.f32.xlu1 %v676_v57  ;;  %v673_v59 = vsel %vm258_vm2, %v664_v56, -inf  ;;  %v1234_v16 = vsel %vm258_vm2, %v9833_v55, -inf }
 0x531   :  { %674 = vmax.xlane.f32.xlu0 %v673_v59  ;;  %v1231_v60 = vsel %vm258_vm2, %v1222_v58, -inf }
 0x541   :  { %776 = vrot.lane.b32.xlu1 %v9789_v14, %s9471_s30 }
 0x545   :  { %778 = vrot.lane.b32.xlu1 %v571_v25, %s9471_s30 }
 0x569   :  { %1232 = vmax.xlane.f32.xlu1 %v1231_v60 }
 0x57a   :  { %9098 = vrot.lane.b32.xlu1 %v9795_v24, %s9470_s19 }
 0x57e   :  { %1423 = vrot.lane.b32.xlu1 %v9789_v14, %s9472_s24 }
 0x582   :  { %1425 = vrot.lane.b32.xlu1 %v571_v25, %s9472_s24 }
 0x5bd   :  { %v678_v61 = vpop.xlane.xlu1 %677 }
 0x5be   :  { %v680_v62 = vsub.f32 %v8093_v54, %v678_v61  ;;  %v675_v63 = vpop.xlane.xlu0 %674 }
 0x5bf   :  { %v679_v1 = vsub.f32 %v664_v56, %v675_v63 }
 0x5c0   :  { %v683_v2 = vmul.f32 1.442695, %v680_v62 }
 0x5c1   :  { %v681_v3 = vmul.f32 1.442695, %v679_v1  ;;  %v777_v9 = vpop.permute.xlu1 %776 }
 0x5c2   :  { %9231 = vpow2.f32 %v683_v2 }
 0x5c3   :  { %9233 = vpow2.f32 %v681_v3 }
 0x5c5   :  { %v779_v10 = vpop.permute.xlu1 %778 }
 0x5cc   :  { %v9232_v5 = vpop.eup %9231 }
 0x5cd   :  { %v688_v6 = vsel %vm258_vm2, %v9232_v5, 0.0  ;;  %v9234_v7 = vpop.eup %9233 }
 0x5ce   :  { %689 = vadd.xlane.f32.xlu0 %v688_v6  ;;  %v685_v8 = vsel %vm258_vm2, %v9234_v7, 0.0 }
 0x5d2   :  { %686 = vadd.xlane.f32.xlu0 %v685_v8 }
 0x5e8   :  { %9093 = vrot.lane.b32.xlu0 %v9793_v22, %s9473_s25 }
 0x5f6   :  { %v1233_v11 = vpop.xlane.xlu1 %1232 }
 0x5f7   :  { %v1237_v35 = vsub.f32 %v1222_v58, %v1233_v11 }
 0x5f9   :  { %v1239_v41 = vmul.f32 1.442695, %v1237_v35 }
 0x5fa   :  { %v9099_v12 = vpop.permute.xlu1 %9098 }
 0x5fb   :  { %v9101_v13 = vunpack.i.h.bf16 %v9099_v12  ;;  %v9100_v14 = vunpack.i.l.bf16 %v9099_v12 }
 0x5fd   :  { %v8641_v15 = vpack.c.bf16 %v9101_v13, %v9100_v14 }
 0x5ff   :  { %8642 = vmatprep.subr.bf16.mxu1 %v8641_v15 }
 0x600   :  { %8644 = vmatpush3.bf16.msra.mxu1 %v8641_v15 }
 0x607   :  { %1235 = vmax.xlane.f32.xlu0 %v1234_v16 }
 0x65b   :  { %v690_v17 = vpop.xlane.xlu0 %689 }
 0x65c   :  { %9235 = vrcp.f32 %v690_v17 }
 0x65f   :  { %v687_v20 = vpop.xlane.xlu0 %686 }
 0x660   :  { %9237 = vrcp.f32 %v687_v20 }
 0x663   :  { %v9094_v21 = vpop.permute.xlu0 %9093 }
 0x664   :  { %v9096_v23 = vunpack.i.h.bf16 %v9094_v21  ;;  %v9095_v25 = vunpack.i.l.bf16 %v9094_v21 }
 0x666   :  { %v8617_v26 = vpack.c.bf16 %v9096_v23, %v9095_v25  ;;  %v9236_v28 = vpop.eup %9235 }
 0x667   :  { %v694_v34 = vmul.f32 %v9236_v28, %v9232_v5 }
 0x668   :  { %8619 = vmatprep.subr.msk.bf16.mxu0 %vm9806_vm4, %v8617_v26 }
 0x66a   :  { %v9238_v30 = vpop.eup %9237 }
 0x66b   :  { %v693_v32 = vmul.f32 %v9238_v30, %v9234_v7  ;;  %v9879_v7 = vmul.f32 0.25, %v9821_v49 }
 0x66d   :  { %8098 = vmatprep.mubr.msk.f32.mxu0 %vm258_vm2, %v693_v32 }
 0x66e   :  { %8099 = vmatmul.mubr.msk.f32.vlgmr.msra.gmra.mrb[10].mxu0 %vm258_vm2, %v694_v34 }
 0x66f   :  { %8622 = vmatpush3.bf16.xpose.msk.msra.mxu0 %vm9806_vm4, %v8617_v26  ;;  %8105 = vmatprep.mubr.msk.f32.mxu0 %vm258_vm2, %v777_v9 }
 0x676   :  { %8106 = vmatmul.mubr.msk.f32.vlgmr.msra.gmra.mrb[12].mxu0 %vm258_vm2, %v779_v10 }
 0x694   :  { %v1236_v39 = vpop.xlane.xlu0 %1235 }
 0x695   :  { %v1238_v40 = vsub.f32 %v9833_v55, %v1236_v39 }
 0x697   :  { %v1241_v43 = vmul.f32 1.442695, %v1238_v40 }
 0x699   :  { %9239 = vpow2.f32 %v1241_v43 }
 0x69a   :  { %9241 = vpow2.f32 %v1239_v41 }
 0x6a3   :  { %v9240_v44 = vpop.eup %9239 }
 0x6a4   :  { %v1246_v45 = vsel %vm258_vm2, %v9240_v44, 0.0  ;;  %v9242_v47 = vpop.eup %9241 }
 0x6a5   :  { %1247 = vadd.xlane.f32.xlu0 %v1246_v45  ;;  %v1243_v48 = vsel %vm258_vm2, %v9242_v47, 0.0 }
 0x6a9   :  { %1244 = vadd.xlane.f32.xlu0 %v1243_v48 }
 0x6bf   :  { %9103 = vrot.lane.b32.xlu0 %v9793_v22, %s9474_s1  ;;  %v1424_v22 = vpop.permute.xlu1 %1423 }
 0x6c3   :  { %v1426_v6 = vpop.permute.xlu1 %1425 }
 0x732   :  { %v1248_v50 = vpop.xlane.xlu0 %1247 }
 0x733   :  { %9243 = vrcp.f32 %v1248_v50 }
 0x736   :  { %v1245_v51 = vpop.xlane.xlu0 %1244 }
 0x737   :  { %9245 = vrcp.f32 %v1245_v51  ;;  %v9903_v51 = vmul.f32 0.25, %v9823_v42  ;;  %v576_v42 = vld [vmem:[%s11480_s9 + $0x10] sm:$0xff] }
 0x73a   :  { %v9104_v54 = vpop.permute.xlu0 %9103 }
 0x73b   :  { %v9106_v55 = vunpack.i.h.bf16 %v9104_v54  ;;  %v9105_v56 = vunpack.i.l.bf16 %v9104_v54 }
 0x73d   :  { %v8649_v57 = vpack.c.bf16 %v9106_v55, %v9105_v56  ;;  %v9244_v58 = vpop.eup %9243 }
 0x73e   :  { %v1252_v63 = vmul.f32 %v9244_v58, %v9240_v44 }
 0x73f   :  { %8651 = vmatprep.subr.msk.bf16.mxu1 %vm9806_vm4, %v8649_v57 }
 0x741   :  { %v9246_v59 = vpop.eup %9245  ;;  %v9867_v60 = vpop.f32.mrb[10].mxu0 }
 0x742   :  { %v9869_v61 = vpop.f32.mrb[11].mxu0  ;;  %v1251_v62 = vmul.f32 %v9246_v59, %v9242_v47 }
 0x744   :  { %8140 = vmatprep.mubr.msk.f32.mxu1 %vm258_vm2, %v1251_v62 }
 0x745   :  { %8141 = vmatmul.mubr.msk.f32.vlgmr.msra.gmra.mrb[10].mxu1 %vm258_vm2, %v1252_v63 }
 0x746   :  { %8654 = vmatpush3.bf16.xpose.msk.msra.mxu1 %vm9806_vm4, %v8649_v57  ;;  %8154 = vmatprep.mubr.msk.f32.mxu1 %vm258_vm2, %v1424_v22 }
 0x749   :  { %v8107_v1 = vpop.f32.mrb[12].mxu0 }
 0x74a   :  { %v858_v2 = vpop.f32.mrb[13].mxu0  ;;  %v870_v3 = vsel %vm258_vm2, %v8107_v1, -inf }
 0x74b   :  { %871 = vmax.xlane.f32.xlu0 %v870_v3  ;;  %v867_v5 = vsel %vm258_vm2, %v858_v2, -inf }
 0x74c   :  { %868 = vmax.xlane.f32.xlu1 %v867_v5  ;;  %v575_v5 = vld [vmem:[%s11480_s9 + $0x8] sm:$0xff] }
 0x74d   :  { %8155 = vmatmul.mubr.msk.f32.vlgmr.msra.gmra.mrb[12].mxu1 %vm258_vm2, %v1426_v6 }
 0x74e   :  { %8175 = vmatprep.mubr.msk.f32.mxu1 %vm258_vm2, %v9879_v7 }
 0x75d   :  { %9108 = vrot.lane.b32.xlu1 %v9795_v24, %s9471_s30 }
 0x7d8   :  { %v872_v8 = vpop.xlane.xlu0 %871 }
 0x7d9   :  { %v874_v9 = vsub.f32 %v8107_v1, %v872_v8  ;;  %v869_v10 = vpop.xlane.xlu1 %868 }
 0x7da   :  { %v873_v11 = vsub.f32 %v858_v2, %v869_v10  ;;  %v577_v2 = vld [vmem:[%s11480_s9 + $0x18] sm:$0xff]  ;;  %v579_v10 = vld [vmem:[%s11480_s9 + $0x28] sm:$0xff] }
 0x7db   :  { %v877_v12 = vmul.f32 1.442695, %v874_v9  ;;  %v9919_v3 = vpack.c.bf16 %v577_v2, %v576_v42  ;;  %v578_v9 = vld [vmem:[%s11480_s9 + $0x20] sm:$0xff] }
 0x7dc   :  { %v875_v13 = vmul.f32 1.442695, %v873_v11 }
 0x7dd   :  { %v9109_v14 = vpop.permute.xlu1 %9108 }
 0x7de   :  { %9247 = vpow2.f32 %v875_v13  ;;  %v9111_v15 = vunpack.i.h.bf16 %v9109_v14  ;;  %v9110_v16 = vunpack.i.l.bf16 %v9109_v14  ;;  %v9946_v13 = vpack.c.bf16 %v579_v10, %v578_v9 }
 0x7df   :  { %9249 = vpow2.f32 %v877_v12 }
 0x7e0   :  { %v8623_v49 = vpack.c.bf16 %v9111_v15, %v9110_v16 }
 0x7e2   :  { %8624 = vmatprep.subr.bf16.mxu0 %v8623_v49 }
 0x7e3   :  { %8626 = vmatpush3.bf16.msra.mxu0 %v8623_v49 }
 0x7e4   :  { %8628 = vmatprep.subr.bf16.mxu0 %v9919_v3 }
 0x7e8   :  { %v9248_v17 = vpop.eup %9247 }
 0x7e9   :  { %v879_v20 = vsel %vm258_vm2, %v9248_v17, 0.0  ;;  %v9250_v21 = vpop.eup %9249 }
 0x7ea   :  { %880 = vadd.xlane.f32.xlu0 %v879_v20  ;;  %v882_v23 = vsel %vm258_vm2, %v9250_v21, 0.0 }
 0x7ee   :  { %883 = vadd.xlane.f32.xlu0 %v882_v23 }
 0x804   :  { %9113 = vrot.lane.b32.xlu0 %v9827_v52, %s9468_s15 }
 0x818   :  { %v9890_v25 = vpop.f32.mrb[10].mxu1 }
 0x819   :  { %v9892_v26 = vpop.f32.mrb[11].mxu1 }
 0x820   :  { %v8156_v28 = vpop.f32.mrb[12].mxu1 }
 0x821   :  { %v1505_v30 = vpop.f32.mrb[13].mxu1  ;;  %v1517_v32 = vsel %vm258_vm2, %v8156_v28, -inf }
 0x822   :  { %v1514_v34 = vsel %vm258_vm2, %v1505_v30, -inf }
 0x823   :  { %1518 = vmax.xlane.f32.xlu0 %v1517_v32  ;;  %1515 = vmax.xlane.f32.xlu1 %v1514_v34 }
 0x877   :  { %v881_v35 = vpop.xlane.xlu0 %880 }
 0x878   :  { %9251 = vrcp.f32 %v881_v35 }
 0x87b   :  { %v884_v39 = vpop.xlane.xlu0 %883 }
 0x87c   :  { %9253 = vrcp.f32 %v884_v39 }
 0x87f   :  { %v9114_v40 = vpop.permute.xlu0 %9113 }
 0x880   :  { %v9116_v41 = vunpack.i.h.bf16 %v9114_v40  ;;  %v9115_v43 = vunpack.i.l.bf16 %v9114_v40 }
 0x882   :  { %v9252_v44 = vpop.eup %9251  ;;  %v8663_v45 = vpack.c.bf16 %v9116_v41, %v9115_v43 }
 0x883   :  { %v887_v47 = vmul.f32 %v9252_v44, %v9248_v17 }
 0x884   :  { %8665 = vmatprep.subr.msk.bf16.mxu1 %vm9806_vm4, %v8663_v45 }
 0x885   :  { %8112 = vmatprep.mubr.msk.f32.mxu0 %vm258_vm2, %v887_v47  ;;  %8668 = vmatpush3.bf16.xpose.msk.msra.mxu1 %vm9806_vm4, %v8663_v45 }
 0x886   :  { %v9254_v48 = vpop.eup %9253 }
 0x887   :  { %v888_v50 = vmul.f32 %v9254_v48, %v9250_v21 }
 0x889   :  { %8113 = vmatmul.mubr.msk.f32.vlgmr.msra.gmra.mrb[14].mxu0 %vm258_vm2, %v888_v50 }
 0x88a   :  { %8630 = vmatpush3.bf16.msra.mxu0 %v9919_v3 }
 0x88c   :  { %8176 = vmatmul.mubr.msk.f32.vlgmr.msra.gmra.mrb[14].mxu1 %vm258_vm2, %v9903_v51 }
 0x8b0   :  { %v1519_v54 = vpop.xlane.xlu0 %1518  ;;  %v1516_v55 = vpop.xlane.xlu1 %1515 }
 0x8b1   :  { %v1521_v56 = vsub.f32 %v8156_v28, %v1519_v54  ;;  %v1520_v57 = vsub.f32 %v1505_v30, %v1516_v55  ;;  %v580_v28 = vld [vmem:[%s11480_s9 + $0x30] sm:$0xff]  ;;  %v581_v30 = vld [vmem:[%s11480_s9 + $0x38] sm:$0xff] }
 0x8b2   :  { %v9967_v34 = vpack.c.bf16 %v581_v30, %v580_v28 }
 0x8b3   :  { %v1524_v58 = vmul.f32 1.442695, %v1521_v56  ;;  %v1522_v59 = vmul.f32 1.442695, %v1520_v57 }
 0x8b5   :  { %9255 = vpow2.f32 %v1524_v58 }
 0x8b6   :  { %9257 = vpow2.f32 %v1522_v59 }
 0x8bf   :  { %v9256_v62 = vpop.eup %9255 }
 0x8c0   :  { %v9258_v63 = vpop.eup %9257  ;;  %v1529_v22 = vsel %vm258_vm2, %v9256_v62, 0.0 }
 0x8c1   :  { %1530 = vadd.xlane.f32.xlu0 %v1529_v22  ;;  %v1526_v1 = vsel %vm258_vm2, %v9258_v63, 0.0 }
 0x8c2   :  { %1527 = vadd.xlane.f32.xlu1 %v1526_v1 }
 0x8d3   :  { %9118 = vrot.lane.b32.xlu1 %v9795_v24, %s9472_s24  ;;  %v574_v24 = vld [vmem:[%s11480_s9] sm:$0xff] }
 0x8d4   :  { %v9933_v6 = vpack.c.bf16 %v575_v5, %v574_v24 }
 0x8d6   :  { %8632 = vmatprep.subr.bf16.mxu0 %v9933_v6 }
 0x8d7   :  { %9123 = vrot.lane.b32.xlu1 %v9827_v52, %s9473_s25 }
 0x8db   :  { %1902 = vrot.lane.b32.xlu1 %v9903_v51, %s9471_s30 }
 0x8df   :  { %9128 = vrot.lane.b32.xlu1 %v9827_v52, %s9469_s28 }
 0x8e3   :  { %2264 = vrot.lane.b32.xlu1 %v9879_v7, %s9470_s19 }
 0x8e7   :  { %2266 = vrot.lane.b32.xlu1 %v9903_v51, %s9470_s19 }
 0x94e   :  { %v1531_v49 = vpop.xlane.xlu0 %1530 }
 0x94f   :  { %v1528_v8 = vpop.xlane.xlu1 %1527 }
 0x950   :  { %9259 = vrcp.f32 %v1528_v8 }
 0x951   :  { %9261 = vrcp.f32 %v1531_v49 }
 0x953   :  { %v9119_v15 = vpop.permute.xlu1 %9118 }
 0x954   :  { %v9121_v20 = vunpack.i.h.bf16 %v9119_v15  ;;  %v9120_v21 = vunpack.i.l.bf16 %v9119_v15 }
 0x957   :  { %v9124_v54 = vpop.permute.xlu1 %9123 }
 0x958   :  { %v9126_v55 = vunpack.i.h.bf16 %v9124_v54  ;;  %v9125_v56 = vunpack.i.l.bf16 %v9124_v54 }
 0x95a   :  { %v9260_v32 = vpop.eup %9259  ;;  %v8673_v59 = vpack.c.bf16 %v9126_v55, %v9125_v56 }
 0x95b   :  { %v9262_v35 = vpop.eup %9261  ;;  %v1903_v22 = vpop.permute.xlu1 %1902 }
 0x95c   :  { %v8114_v11 = vpop.f32.mrb[14].mxu0 }
 0x95d   :  { %v969_v12 = vpop.f32.mrb[15].mxu0 }
 0x95e   :  { %8119 = vmatprep.mubr.msk.f32.mxu0 %vm258_vm2, %v969_v12 }
 0x95f   :  { %8120 = vmatmul.mubr.msk.f32.vlgmr.msra.gmra.mrb[16].mxu0 %vm258_vm2, %v8114_v11  ;;  %v8177_v14 = vpop.f32.mrb[14].mxu1  ;;  %v9129_v42 = vpop.permute.xlu1 %9128 }
 0x960   :  { %8126 = vmatprep.mubr.msk.f32.mxu0 %vm258_vm2, %v9869_v61  ;;  %v1788_v16 = vpop.f32.mrb[15].mxu1  ;;  %8634 = vmatpush3.bf16.msra.mxu0 %v9933_v6  ;;  %v1800_v23 = vsel %vm258_vm2, %v8177_v14, -inf  ;;  %v8655_v61 = vpack.c.bf16 %v9121_v20, %v9120_v21  ;;  %v9131_v24 = vunpack.i.h.bf16 %v9129_v42  ;;  %v9130_v5 = vunpack.i.l.bf16 %v9129_v42 }
 0x961   :  { %v1797_v17 = vsel %vm258_vm2, %v1788_v16, -inf  ;;  %8646 = vmatprep.subr.bf16.mxu0 %v9946_v13 }
 0x962   :  { %1798 = vmax.xlane.f32.xlu0 %v1797_v17  ;;  %v8691_v10 = vpack.c.bf16 %v9131_v24, %v9130_v5  ;;  %v7459_v5 = vld [vmem:[%s11480_s9 + $0x50] sm:$0xff] }
 0x966   :  { %1801 = vmax.xlane.f32.xlu0 %v1800_v23 }
 0x967   :  { %8127 = vmatmul.mubr.msk.f32.vlgmr.msra.gmra.mrb[16].mxu0 %vm258_vm2, %v9867_v60  ;;  %v1534_v60 = vmul.f32 %v9260_v32, %v9258_v63 }
 0x968   :  { %8648 = vmatpush3.bf16.msra.mxu0 %v9946_v13  ;;  %8147 = vmatprep.mubr.msk.f32.mxu0 %vm258_vm2, %v9892_v26  ;;  %v1535_v26 = vmul.f32 %v9262_v35, %v9256_v62 }
 0x969   :  { %8656 = vmatprep.subr.bf16.mxu0 %v8655_v61 }
 0x96f   :  { %8148 = vmatmul.mubr.msk.f32.vlgmr.msra.gmra.mrb[16].mxu0 %vm258_vm2, %v9890_v25 }
 0x970   :  { %8658 = vmatpush3.bf16.msra.mxu0 %v8655_v61  ;;  %8161 = vmatprep.mubr.msk.f32.mxu0 %vm258_vm2, %v1534_v60 }
 0x971   :  { %8660 = vmatprep.subr.bf16.mxu0 %v9967_v34 }
 0x973   :  { %8162 = vmatmul.mubr.msk.f32.vlgmr.msra.gmra.mrb[18].mxu0 %vm258_vm2, %v1535_v26 }
 0x974   :  { %8662 = vmatpush3.bf16.msra.mxu0 %v9967_v34 }
 0x975   :  { %8670 = vmatprep.subr.bf16.mxu0 %v9829_v53 }
 0x9ef   :  { %v1799_v39 = vpop.xlane.xlu0 %1798 }
 0x9f0   :  { %v1803_v40 = vsub.f32 %v1788_v16, %v1799_v39 }
 0x9f2   :  { %v1805_v41 = vmul.f32 1.442695, %v1803_v40 }
 0x9f3   :  { %v1802_v43 = vpop.xlane.xlu0 %1801 }
 0x9f4   :  { %9263 = vpow2.f32 %v1805_v41  ;;  %v1804_v44 = vsub.f32 %v8177_v14, %v1802_v43 }
 0x9f6   :  { %v1807_v45 = vmul.f32 1.442695, %v1804_v44 }
 0x9f8   :  { %9265 = vpow2.f32 %v1807_v45 }
 0x9fe   :  { %v9264_v25 = vpop.eup %9263 }
 0x9ff   :  { %v1809_v47 = vsel %vm258_vm2, %v9264_v25, 0.0 }
 0xa00   :  { %1810 = vadd.xlane.f32.xlu0 %v1809_v47  ;;  %v9475_v47 = vmov 0  }
 0xa01   :  { %9152 = vset.pattern.permute.xlu0 %v9475_v47 }
 0xa02   :  { %v9266_v48 = vpop.eup %9265 }
 0xa03   :  { %v1812_v50 = vsel %vm258_vm2, %v9266_v48, 0.0 }
 0xa04   :  { %1813 = vadd.xlane.f32.xlu0 %v1812_v50 }
 0xa1a   :  { %1900 = vrot.lane.b32.xlu0 %v9879_v7, %s9471_s30 }
 0xa46   :  { %v8163_v57 = vpop.f32.mrb[18].mxu0 }
 0xa47   :  { %v1614_v58 = vpop.f32.mrb[19].mxu0 }
 0xa48   :  { %8168 = vmatprep.mubr.msk.f32.mxu0 %vm258_vm2, %v1614_v58 }
 0xa49   :  { %8169 = vmatmul.mubr.msk.f32.vlgmr.msra.gmra.mrb[16].mxu0 %vm258_vm2, %v8163_v57 }
 0xa4a   :  { %8672 = vmatpush3.bf16.msra.mxu0 %v9829_v53  ;;  %v2265_v53 = vpop.permute.xlu1 %2264 }
 0xa4b   :  { %8675 = vmatprep.subr.msk.bf16.mxu0 %vm9806_vm4, %v8673_v59 }
 0xa4e   :  { %v2267_v12 = vpop.permute.xlu1 %2266 }
 0xa8d   :  { %v1811_v62 = vpop.xlane.xlu0 %1810 }
 0xa8e   :  { %9267 = vrcp.f32 %v1811_v62 }
 0xa91   :  { %v1814_v63 = vpop.xlane.xlu0 %1813 }
 0xa92   :  { %9269 = vrcp.f32 %v1814_v63  ;;  %v7457_v63 = vld [vmem:[%s11480_s9 + $0x40] sm:$0xff] }
 0xa95   :  { %v1901_v11 = vpop.permute.xlu0 %1900 }
 0xa98   :  { %v9268_v1 = vpop.eup %9267 }
 0xa99   :  { %v1817_v2 = vmul.f32 %v9268_v1, %v9264_v25 }
 0xa9b   :  { %8182 = vmatprep.mubr.msk.f32.mxu0 %vm258_vm2, %v1817_v2 }
 0xa9c   :  { %v9270_v8 = vpop.eup %9269 }
 0xa9d   :  { %v1818_v9 = vmul.f32 %v9270_v8, %v9266_v48  ;;  %v7460_v8 = vld [vmem:[%s11480_s9 + $0x58] sm:$0xff] }
 0xa9f   :  { %8183 = vmatmul.mubr.msk.f32.vlgmr.msra.gmra.mrb[20].mxu0 %vm258_vm2, %v1818_v9 }
 0xaa0   :  { %8678 = vmatpush3.bf16.xpose.msk.msra.mxu0 %vm9806_vm4, %v8673_v59  ;;  %8189 = vmatprep.mubr.msk.f32.mxu0 %vm258_vm2, %v1901_v11  ;;  %v7461_v11 = vld [vmem:[%s11480_s9 + $0x60] sm:$0xff] }
 0xaa1   :  { %8693 = vmatprep.subr.msk.bf16.mxu0 %vm9806_vm4, %v8691_v10 }
 0xaa7   :  { %8190 = vmatmul.mubr.msk.f32.vlgmr.msra.gmra.mrb[22].mxu0 %vm258_vm2, %v1903_v22  ;;  %v7458_v22 = vld [vmem:[%s11480_s9 + $0x48] sm:$0xff] }
 0xaa8   :  { %8696 = vmatpush3.bf16.xpose.msk.msra.mxu0 %vm9806_vm4, %v8691_v10  ;;  %8217 = vmatprep.mubr.msk.f32.mxu0 %vm258_vm2, %v2265_v53  ;;  %v8720_v24 = vpack.c.bf16 %v7458_v22, %v7457_v63  ;;  %v8723_v10 = vpack.c.bf16 %v7460_v8, %v7459_v5  ;;  %v7462_v53 = vld [vmem:[%s11480_s9 + $0x68] sm:$0xff] }
 0xaaf   :  { %8218 = vmatmul.mubr.msk.f32.vlgmr.msra.gmra.mrb[24].mxu0 %vm258_vm2, %v2267_v12  ;;  %v8726_v12 = vpack.c.bf16 %v7462_v53, %v7461_v11 }
 0xb1c   :  { %v9997_v14 = vpop.f32.mrb[16].mxu0 }
 0xb1d   :  { %v9999_v15 = vpop.f32.mrb[17].mxu0 }
 0xb72   :  { %v10001_v16 = vpop.f32.mrb[20].mxu0 }
 0xb73   :  { %v10003_v49 = vpop.f32.mrb[21].mxu0 }
 0xb7a   :  { %v8191_v17 = vpop.f32.mrb[22].mxu0 }
 0xb7b   :  { %v1982_v20 = vpop.f32.mrb[23].mxu0  ;;  %v1994_v21 = vsel %vm258_vm2, %v8191_v17, -inf }
 0xb7c   :  { %1995 = vmax.xlane.f32.xlu0 %v1994_v21  ;;  %v1991_v23 = vsel %vm258_vm2, %v1982_v20, -inf  ;;  %v7382_v21 = vld [vmem:[%s11481_s20] ss:$0 sm:$0xff] }
 0xb7d   :  { %1992 = vmax.xlane.f32.xlu1 %v1991_v23  ;;  %v10070_v23 = vadd.f32 %v7382_v21, %v9659_v27 }
 0xb82   :  { %v10007_v61 = vpop.f32.mrb[24].mxu0 }
 0xb83   :  { %v10009_v28 = vpop.f32.mrb[25].mxu0  ;;  %v2358_v25 = vsel %vm258_vm2, %v10007_v61, -inf }
 0xb84   :  { %v2355_v45 = vsel %vm258_vm2, %v10009_v28, -inf }
 0xc09   :  { %v1996_v30 = vpop.xlane.xlu0 %1995 }
 0xc0a   :  { %v1998_v32 = vsub.f32 %v8191_v17, %v1996_v30  ;;  %v1993_v35 = vpop.xlane.xlu1 %1992  ;;  %v7464_v17 = vld [vmem:[%s11480_s9 + $0x78] sm:$0xff] }
 0xc0b   :  { %v1997_v60 = vsub.f32 %v1982_v20, %v1993_v35 }
 0xc0c   :  { %v2001_v26 = vmul.f32 1.442695, %v1998_v32 }
 0xc0d   :  { %v1999_v39 = vmul.f32 1.442695, %v1997_v60 }
 0xc0e   :  { %9271 = vpow2.f32 %v2001_v26 }
 0xc0f   :  { %9273 = vpow2.f32 %v1999_v39 }
 0xc18   :  { %v9272_v40 = vpop.eup %9271 }
 0xc19   :  { %v9274_v41 = vpop.eup %9273  ;;  %v2006_v43 = vsel %vm258_vm2, %v9272_v40, 0.0 }
 0xc1a   :  { %2007 = vadd.xlane.f32.xlu1 %v2006_v43  ;;  %v2003_v44 = vsel %vm258_vm2, %v9274_v41, 0.0 }
 0xc1b   :  { %2004 = vadd.xlane.f32.xlu0 %v2003_v44 }
 0xc2b   :  { %9138 = vrot.lane.b32.xlu1 %v9827_v52, %s9474_s1 }
 0xc2f   :  { %2547 = vrot.lane.b32.xlu1 %v9879_v7, %s9472_s24 }
 0xc31   :  { %9133 = vrot.lane.b32.xlu0 %v9831_v46, %s9471_s30 }
 0xc33   :  { %2549 = vrot.lane.b32.xlu1 %v9903_v51, %s9472_s24 }
 0xc50   :  { %2356 = vmax.xlane.f32.xlu0 %v2355_v45 }
 0xc57   :  { %2359 = vmax.xlane.f32.xlu1 %v2358_v25 }
 0xca7   :  { %v2008_v52 = vpop.xlane.xlu1 %2007 }
 0xca8   :  { %9275 = vrcp.f32 %v2008_v52  ;;  %v2005_v48 = vpop.xlane.xlu0 %2004 }
 0xca9   :  { %9277 = vrcp.f32 %v2005_v48 }
 0xcab   :  { %v9139_v7 = vpop.permute.xlu1 %9138 }
 0xcac   :  { %v9141_v50 = vunpack.i.h.bf16 %v9139_v7  ;;  %v9140_v54 = vunpack.i.l.bf16 %v9139_v7  ;;  %v9134_v55 = vpop.permute.xlu0 %9133 }
 0xcad   :  { %v9136_v56 = vunpack.i.h.bf16 %v9134_v55  ;;  %v9135_v51 = vunpack.i.l.bf16 %v9134_v55 }
 0xcae   :  { %v8705_v57 = vpack.c.bf16 %v9141_v50, %v9140_v54 }
 0xcaf   :  { %v2548_v58 = vpop.permute.xlu1 %2547  ;;  %v8679_v59 = vpack.c.bf16 %v9136_v56, %v9135_v51  ;;  %v2941_v56 = vsub.s32 4, %v9758_v29  ;;  %v7466_v51 = vld [vmem:[%s11483_s3] ss:$0 sm:$0xff] }
 0xcb0   :  { %8707 = vmatprep.subr.msk.bf16.mxu0 %vm9806_vm4, %v8705_v57  ;;  %8238 = vmatprep.mubr.msk.f32.mxu0 %vm258_vm2, %v2548_v58  ;;  %v10099_v58 = vld [vmem:[%s11478_s10] sm:$0xff] }
 0xcb1   :  { %8680 = vmatprep.subr.bf16.mxu1 %v8679_v59  ;;  %8710 = vmatpush3.bf16.xpose.msk.msra.mxu0 %vm9806_vm4, %v8705_v57 }
 0xcb2   :  { %v9276_v62 = vpop.eup %9275  ;;  %8682 = vmatpush3.bf16.msra.mxu1 %v8679_v59  ;;  %8719 = vmatprep.subr.bf16.mxu0 %v9465_v0  ;;  %v2942_v59 = vrot.slane %v10099_v58, %v2941_v56 }
 0xcb3   :  { %v9278_v1 = vpop.eup %9277  ;;  %8684 = vmatprep.subr.bf16.mxu1 %v9919_v3  ;;  %v2012_v2 = vmul.f32 %v9276_v62, %v9272_v40  ;;  %v2550_v9 = vpop.permute.xlu1 %2549 }
 0xcb4   :  { %v2011_v42 = vmul.f32 %v9278_v1, %v9274_v41 }
 0xcb6   :  { %8196 = vmatprep.mubr.msk.f32.mxu1 %vm258_vm2, %v2011_v42 }
 0xcb7   :  { %8197 = vmatmul.mubr.msk.f32.vlgmr.msra.gmra.mrb[16].mxu1 %vm258_vm2, %v2012_v2 }
 0xcb8   :  { %8239 = vmatmul.mubr.msk.f32.vlgmr.msra.gmra.mrb[26].mxu0 %vm258_vm2, %v2550_v9  ;;  %8686 = vmatpush3.bf16.msra.mxu1 %v9919_v3  ;;  %v7463_v3 = vld [vmem:[%s11480_s9 + $0x70] sm:$0xff] }
 0xcb9   :  { %8721 = vmatpush3.bf16.msra.mxu0 %v8720_v24  ;;  %8271 = vmatprep.mubr.msk.f32.mxu0 %vm9466_vm0, %v9467_v4  ;;  %v8729_v20 = vpack.c.bf16 %v7464_v17, %v7463_v3 }
 0xcba   :  { %8722 = vmatprep.subr.bf16.mxu0 %v9465_v0  ;;  %8688 = vmatprep.subr.bf16.mxu1 %v9933_v6 }
 0xcbd   :  { %8724 = vmatpush3.bf16.msra.mxu0 %v8723_v10 }
 0xcbe   :  { %8725 = vmatprep.subr.bf16.mxu0 %v9465_v0 }
 0xcc1   :  { %8727 = vmatpush3.bf16.msra.mxu0 %v8726_v12 }
 0xcc2   :  { %8728 = vmatprep.subr.bf16.mxu0 %v9465_v0 }
 0xcc5   :  { %8730 = vmatpush3.bf16.msra.mxu0 %v8729_v20 }
 0xcc6   :  { %8743 = vmatprep.subr.bf16.mxu0 %v9465_v0 }
 0xcc8   :  { %8272 = vmatmul.mubr.msk.f32.vlgmr.msra.gmra.mrb[28].mxu0 %vm371_vm3, %v10070_v23 }
 0xcc9   :  { %8309 = vmatprep.mubr.msk.f32.mxu0 %vm9466_vm0, %v9467_v4 }
 0xcdd   :  { %v2357_v30 = vpop.xlane.xlu0 %2356 }
 0xcde   :  { %v2361_v32 = vsub.f32 %v10009_v28, %v2357_v30  ;;  %v368_v28 = vld [vmem:[%s11482_s2] sm:$0x3] }
 0xce0   :  { %v2363_v26 = vmul.f32 1.442695, %v2361_v32 }
 0xce4   :  { %v2360_v35 = vpop.xlane.xlu1 %2359 }
 0xce5   :  { %v2362_v60 = vsub.f32 %v10007_v61, %v2360_v35 }
 0xce7   :  { %v2365_v39 = vmul.f32 1.442695, %v2362_v60 }
 0xce9   :  { %9279 = vpow2.f32 %v2365_v39 }
 0xcea   :  { %9281 = vpow2.f32 %v2363_v26 }
 0xcf3   :  { %v9280_v27 = vpop.eup %9279 }
 0xcf4   :  { %v2370_v40 = vsel %vm258_vm2, %v9280_v27, 0.0  ;;  %v9282_v41 = vpop.eup %9281 }
 0xcf5   :  { %2371 = vadd.xlane.f32.xlu0 %v2370_v40  ;;  %v2367_v43 = vsel %vm258_vm2, %v9282_v41, 0.0 }
 0xcf9   :  { %2368 = vadd.xlane.f32.xlu0 %v2367_v43 }
 0xd0f   :  { %9143 = vrot.lane.b32.xlu0 %v9831_v46, %s9470_s19 }
 0xd13   :  { %2929 = vperm.xlu0 %9152, %v368_v28  }
 0xd82   :  { %v2372_v61 = vpop.xlane.xlu0 %2371 }
 0xd86   :  { %v2369_v44 = vpop.xlane.xlu0 %2368 }
 0xd87   :  { %9283 = vrcp.f32 %v2369_v44 }
 0xd88   :  { %9285 = vrcp.f32 %v2372_v61 }
 0xd8a   :  { %v8198_v45 = vpop.f32.mrb[16].mxu1  ;;  %v9144_v25 = vpop.permute.xlu0 %9143 }
 0xd8b   :  { %v9146_v47 = vunpack.i.h.bf16 %v9144_v25  ;;  %v9145_v52 = vunpack.i.l.bf16 %v9144_v25  ;;  %v2093_v48 = vpop.f32.mrb[17].mxu1  ;;  %v8240_v7 = vpop.f32.mrb[26].mxu0  ;;  %v7476_v25 = vld [vmem:[%s11480_s9 + $0xc0] sm:$0xff] }
 0xd8c   :  { %8203 = vmatprep.mubr.msk.f32.mxu1 %vm258_vm2, %v2093_v48  ;;  %v2629_v50 = vpop.f32.mrb[27].mxu0 }
 0xd8d   :  { %8204 = vmatmul.mubr.msk.f32.vlgmr.msra.gmra.mrb[18].mxu1 %vm258_vm2, %v8198_v45  ;;  %v2638_v54 = vsel %vm258_vm2, %v2629_v50, -inf  ;;  %v8697_v55 = vpack.c.bf16 %v9146_v47, %v9145_v52  ;;  %v7477_v47 = vld [vmem:[%s11480_s9 + $0xc8] sm:$0xff]  ;;  %v7478_v52 = vld [vmem:[%s11480_s9 + $0xd0] sm:$0xff] }
 0xd8e   :  { %8690 = vmatpush3.bf16.msra.mxu1 %v9933_v6  ;;  %8210 = vmatprep.mubr.msk.f32.mxu1 %vm258_vm2, %v10003_v49  ;;  %v2641_v6 = vsel %vm258_vm2, %v8240_v7, -inf  ;;  %v8744_v48 = vpack.c.bf16 %v7477_v47, %v7476_v25  ;;  %v10224_v47 = vld [vmem:[%s11478_s10 + $0x8] sm:$0xf] }
 0xd8f   :  { %2639 = vmax.xlane.f32.xlu1 %v2638_v54  ;;  %8698 = vmatprep.subr.bf16.mxu1 %v8697_v55  ;;  %v7481_v54 = vld [vmem:[%s11480_s9 + $0xe8] sm:$0xff] }
 0xd90   :  { %8745 = vmatpush3.bf16.msra.mxu0 %v8744_v48  ;;  %v3140_v48 = vrot.slane %v10224_v47, %v9761_v31 }
 0xd91   :  { %v9284_v57 = vpop.eup %9283  ;;  %8746 = vmatprep.subr.bf16.mxu0 %v9465_v0 }
 0xd92   :  { %v10105_v62 = vpop.permute.xlu0 %2929  ;;  %v9286_v63 = vpop.eup %9285  ;;  %v2375_v22 = vmul.f32 %v9284_v57, %v9282_v41 }
 0xd93   :  { %2642 = vmax.xlane.f32.xlu1 %v2641_v6  ;;  %v2938_v49 = vmul.f32 %v7466_v51, %v10105_v62  ;;  %v2376_v42 = vmul.f32 %v9286_v63, %v9280_v27  ;;  %v7467_v6 = vld [vmem:[%s11480_s9 + $0x80] sm:$0xff] }
 0xd95   :  { %8211 = vmatmul.mubr.msk.f32.vlgmr.msra.gmra.mrb[18].mxu1 %vm258_vm2, %v10001_v16  ;;  %v2943_v1 = vadd.f32 %v2942_v59, %v2938_v49  ;;  %v7468_v49 = vld [vmem:[%s11480_s9 + $0x88] sm:$0xff] }
 0xd96   :  { %8700 = vmatpush3.bf16.msra.mxu1 %v8697_v55  ;;  %8224 = vmatprep.mubr.msk.f32.mxu1 %vm258_vm2, %v2375_v22  ;;  %v8732_v22 = vpack.c.bf16 %v7468_v49, %v7467_v6 }
 0xd97   :  { %v2945_v2 = vsel %vm2944_vm5, %v2943_v1, 0.0  ;;  %8702 = vmatprep.subr.bf16.mxu1 %v9946_v13 }
 0xd98   :  { %2946 = vadd.xlane.f32.xlu0 %v2945_v2  ;;  %v7470_v2 = vld [vmem:[%s11480_s9 + $0x98] sm:$0xff] }
 0xd99   :  { %8225 = vmatmul.mubr.msk.f32.vlgmr.msra.gmra.mrb[20].mxu1 %vm258_vm2, %v2376_v42  ;;  %v7469_v42 = vld [vmem:[%s11480_s9 + $0x90] sm:$0xff] }
 0xd9a   :  { %8704 = vmatpush3.bf16.msra.mxu1 %v9946_v13 }
 0xd9b   :  { %v10115_v24 = vpop.f32.mrb[28].mxu0 }
 0xd9c   :  { %v8273_v5 = vpop.f32.mrb[29].mxu0 }
 0xd9d   :  { %v8735_v5 = vpack.c.bf16 %v7470_v2, %v7469_v42 }
 0xe1c   :  { %v2640_v8 = vpop.xlane.xlu1 %2639 }
 0xe1d   :  { %v2644_v9 = vsub.f32 %v2629_v50, %v2640_v8  ;;  %v7480_v50 = vld [vmem:[%s11480_s9 + $0xe0] sm:$0xff] }
 0xe1e   :  { %v8750_v55 = vpack.c.bf16 %v7481_v54, %v7480_v50  ;;  %v7471_v8 = vld [vmem:[%s11480_s9 + $0xa0] sm:$0xff] }
 0xe1f   :  { %v2646_v11 = vmul.f32 1.442695, %v2644_v9  ;;  %v7472_v9 = vld [vmem:[%s11480_s9 + $0xa8] sm:$0xff] }
 0xe20   :  { %v2643_v16 = vpop.xlane.xlu1 %2642 }
 0xe21   :  { %v2645_v10 = vsub.f32 %v8240_v7, %v2643_v16  ;;  %v7479_v7 = vld [vmem:[%s11480_s9 + $0xd8] sm:$0xff]  ;;  %v2960_v16 = vsub.s32 5, %v9758_v29 }
 0xe23   :  { %v2648_v53 = vmul.f32 1.442695, %v2645_v10 }
 0xe25   :  { %9287 = vpow2.f32 %v2648_v53  ;;  %v2947_v13 = vpop.xlane.xlu0 %2946 }
 0xe26   :  { %9289 = vpow2.f32 %v2646_v11  ;;  %v2948_v21 = vmul.f32 0.015625, %v2947_v13  ;;  %v8738_v11 = vpack.c.bf16 %v7472_v9, %v7471_v8 }
 0xe28   :  { %v10121_v30 = vsub.f32 %v2943_v1, %v2948_v21 }
 0xe2a   :  { %v2950_v32 = vmul.f32 %v10121_v30, %v10121_v30 }
 0xe2c   :  { %v2951_v35 = vsel %vm2944_vm5, %v2950_v32, 0.0 }
 0xe2f   :  { %v9288_v12 = vpop.eup %9287 }
 0xe30   :  { %v2653_v3 = vsel %vm258_vm2, %v9288_v12, 0.0  ;;  %v9290_v17 = vpop.eup %9289 }
 0xe31   :  { %2654 = vadd.xlane.f32.xlu1 %v2653_v3  ;;  %v2650_v20 = vsel %vm258_vm2, %v9290_v17, 0.0  ;;  %v7474_v3 = vld [vmem:[%s11480_s9 + $0xb8] sm:$0xff] }
 0xe35   :  { %2651 = vadd.xlane.f32.xlu1 %v2650_v20  ;;  %v2965_v20 = vsub.s32 6, %v9758_v29 }
 0xe46   :  { %9148 = vrot.lane.b32.xlu1 %v9831_v46, %s9472_s24 }
 0xe6a   :  { %2952 = vadd.xlane.f32.xlu1 %v2951_v35  ;;  %v7482_v35 = vld [vmem:[%s11480_s9 + $0xf0] sm:$0xff] }
 0xe6c   :  { %v8226_v60 = vpop.f32.mrb[20].mxu1 }
 0xe6d   :  { %v2455_v26 = vpop.f32.mrb[21].mxu1 }
 0xe6e   :  { %8231 = vmatprep.mubr.msk.f32.mxu1 %vm258_vm2, %v2455_v26 }
 0xe6f   :  { %8232 = vmatmul.mubr.msk.f32.vlgmr.msra.gmra.mrb[18].mxu1 %vm258_vm2, %v8226_v60  ;;  %v7483_v60 = vld [vmem:[%s11480_s9 + $0xf8] sm:$0xff] }
 0xe70   :  { %v8753_v26 = vpack.c.bf16 %v7483_v60, %v7482_v35  ;;  %v3321_v60 = vld [vmem:[%s11485_s5 + $0x28] sm:$0xff] }
 0xebe   :  { %v2655_v39 = vpop.xlane.xlu1 %2654 }
 0xebf   :  { %9291 = vrcp.f32 %v2655_v39  ;;  %v2979_v39 = vsub.s32 7, %v9758_v29 }
 0xec2   :  { %v2652_v27 = vpop.xlane.xlu1 %2651 }
 0xec3   :  { %9293 = vrcp.f32 %v2652_v27  ;;  %v2980_v27 = vrot.slane %v10099_v58, %v2979_v39 }
 0xec6   :  { %v9149_v46 = vpop.permute.xlu1 %9148 }
 0xec7   :  { %v9151_v40 = vunpack.i.h.bf16 %v9149_v46  ;;  %v9150_v41 = vunpack.i.l.bf16 %v9149_v46 }
 0xec9   :  { %v8711_v43 = vpack.c.bf16 %v9151_v40, %v9150_v41  ;;  %v9292_v28 = vpop.eup %9291 }
 0xeca   :  { %v2659_v45 = vmul.f32 %v9292_v28, %v9288_v12  ;;  %v7473_v12 = vld [vmem:[%s11480_s9 + $0xb0] sm:$0xff]  ;;  %v10211_v28 = vsub.s32 2, %v9758_v29 }
 0xecb   :  { %8712 = vmatprep.subr.bf16.mxu1 %v8711_v43  ;;  %v8741_v13 = vpack.c.bf16 %v7474_v3, %v7473_v12 }
 0xecc   :  { %8714 = vmatpush3.bf16.msra.mxu1 %v8711_v43  ;;  %v364_v43 = vld [vmem:[%s11484_s11] sm:$0xff] }
 0xecd   :  { %v9294_v61 = vpop.eup %9293  ;;  %8716 = vmatprep.subr.bf16.mxu1 %v9967_v34 }
 0xece   :  { %v2658_v44 = vmul.f32 %v9294_v61, %v9290_v17  ;;  %v2961_v17 = vrot.slane %v10099_v58, %v2960_v16  ;;  %v2919_v61 = vrot.slane %v10099_v58, %v10211_v28 }
 0xed0   :  { %8245 = vmatprep.mubr.msk.f32.mxu1 %vm258_vm2, %v2658_v44  ;;  %v10216_v44 = vsub.s32 3, %v9758_v29 }
 0xed1   :  { %8246 = vmatmul.mubr.msk.f32.vlgmr.msra.gmra.mrb[22].mxu1 %vm258_vm2, %v2659_v45  ;;  %v2920_v45 = vadd.f32 %v2919_v61, %v10115_v24  ;;  %v365_v24 = vld [vmem:[%s11484_s11 + $0x8] sm:$0xff]  ;;  %v3327_v61 = vld [vmem:[%s11485_s5 + $0x58] sm:$0xff] }
 0xed2   :  { %8718 = vmatpush3.bf16.msra.mxu1 %v9967_v34  ;;  %v8747_v34 = vpack.c.bf16 %v7479_v7, %v7478_v52  ;;  %v2924_v25 = vrot.slane %v10099_v58, %v10216_v44 }
 0xed3   :  { %8731 = vmatprep.subr.bf16.mxu1 %v9465_v0 }
 0xed4   :  { %8748 = vmatpush3.bf16.msra.mxu0 %v8747_v34  ;;  %v2925_v52 = vadd.f32 %v2924_v25, %v2920_v45  ;;  %v3324_v25 = vld [vmem:[%s11485_s5 + $0x40] sm:$0xff] }
 0xed5   :  { %8749 = vmatprep.subr.bf16.mxu0 %v9465_v0 }
 0xed8   :  { %8751 = vmatpush3.bf16.msra.mxu0 %v8750_v55  ;;  %v367_v55 = vld [vmem:[%s11484_s11 + $0x18] sm:$0xff] }
 0xed9   :  { %8752 = vmatprep.subr.bf16.mxu0 %v9465_v0 }
 0xedc   :  { %8754 = vmatpush3.bf16.msra.mxu0 %v8753_v26  ;;  %v3323_v26 = vld [vmem:[%s11485_s5 + $0x38] sm:$0xff] }
 0xef7   :  { %v2953_v51 = vpop.xlane.xlu1 %2952 }
 0xef8   :  { %v2954_v57 = vmul.f32 0.015625, %v2953_v51  ;;  %v9031_v51 = vadd.f32 %v9997_v14, %v9676_v37 }
 0xefa   :  { %v2955_v59 = vadd.f32 1e-05, %v2954_v57  ;;  %v9033_v57 = vadd.f32 %v9999_v15, %v9674_v36 }
 0xefc   :  { %9295 = vrsqrt.f32 %v2955_v59 }
 0xf06   :  { %v9296_v10 = vpop.eup %9295 }
 0xf07   :  { %v2957_v53 = vmul.f32 %v9296_v10, %v10121_v30  ;;  %v2966_v30 = vrot.slane %v10099_v58, %v2965_v20  ;;  %v366_v58 = vld [vmem:[%s11484_s11 + $0x10] sm:$0xff] }
 0xf09   :  { %v2962_v21 = vmul.f32 %v2961_v17, %v2957_v53 }
 0xf0b   :  { %v2967_v32 = vadd.f32 %v2966_v30, %v2962_v21  ;;  %v3316_v30 = vld [vmem:[%s11485_s5] sm:$0xff] }
 0xfa4   :  { %v8247_v63 = vpop.f32.mrb[22].mxu1 }
 0xfa5   :  { %v2738_v1 = vpop.f32.mrb[23].mxu1 }
 0xfa6   :  { %8252 = vmatprep.mubr.msk.f32.mxu1 %vm258_vm2, %v2738_v1 }
 0xfa7   :  { %8253 = vmatmul.mubr.msk.f32.vlgmr.msra.gmra.mrb[18].mxu1 %vm258_vm2, %v8247_v63 }
 0xfa8   :  { %8733 = vmatpush3.bf16.msra.mxu1 %v8732_v22  ;;  %8290 = vmatprep.mubr.msk.f32.mxu1 %vm9466_vm0, %v9467_v4 }
 0xfa9   :  { %8734 = vmatprep.subr.bf16.mxu1 %v9465_v0 }
 0xfac   :  { %8736 = vmatpush3.bf16.msra.mxu1 %v8735_v5 }
 0xfad   :  { %8737 = vmatprep.subr.bf16.mxu1 %v9465_v0 }
 0xfb0   :  { %8739 = vmatpush3.bf16.msra.mxu1 %v8738_v11 }
 0xfb1   :  { %8740 = vmatprep.subr.bf16.mxu1 %v9465_v0 }
 0xfb4   :  { %8742 = vmatpush3.bf16.msra.mxu1 %v8741_v13  ;;  %v3317_v13 = vld [vmem:[%s11485_s5 + $0x8] sm:$0xff] }
 0xfb7   :  { %8291 = vmatmul.mubr.msk.f32.vlgmr.msra.gmra.mrb[24].mxu1 %vm371_vm3, %v2967_v32  ;;  %v3318_v32 = vld [vmem:[%s11485_s5 + $0x10] sm:$0xff] }
 0xfb8   :  { %8314 = vmatprep.mubr.msk.f32.mxu1 %vm3142_vm6, %v364_v43  ;;  %v8757_v35 = vpack.c.bf16 %v3318_v32, %v3316_v30  ;;  %v3325_v43 = vld [vmem:[%s11485_s5 + $0x48] sm:$0xff] }
 0xfb9   :  { %v8763_v45 = vpack.c.bf16 %v3327_v61, %v3325_v43  ;;  %v3680_v43 = vld [vmem:[%s11486_s6 + $0x98] sm:$0xff] }
0x108a   :  { %v3050_v46 = vpop.f32.mrb[24].mxu1 }
0x108b   :  { %v3051_v40 = vadd.f32 %v3050_v46, %v2980_v27  ;;  %v8292_v41 = vpop.f32.mrb[25].mxu1  ;;  %v8759_v27 = vpack.c.bf16 %v3323_v26, %v3321_v60  ;;  %v3320_v46 = vld [vmem:[%s11485_s5 + $0x20] sm:$0xff] }
0x108d   :  { %8310 = vmatmul.mubr.msk.f32.vlgmr.msra.gmra.mrb[30].mxu0 %vm371_vm3, %v3051_v40  ;;  %v3322_v40 = vld [vmem:[%s11485_s5 + $0x30] sm:$0xff] }
0x108e   :  { %v8761_v41 = vpack.c.bf16 %v3322_v40, %v3320_v46  ;;  %v3662_v46 = vld [vmem:[%s11486_s6 + $0x8] sm:$0xff] }
0x1160   :  { %v3132_v7 = vpop.f32.mrb[30].mxu0 }
0x1161   :  { %v3136_v34 = vadd.f32 %v3132_v7, %v2925_v52  ;;  %v8311_v50 = vpop.f32.mrb[31].mxu0  ;;  %v3326_v52 = vld [vmem:[%s11485_s5 + $0x50] sm:$0xff]  ;;  %v3329_v7 = vld [vmem:[%s11485_s5 + $0x68] sm:$0xff] }
0x1163   :  { %v3141_v54 = vadd.f32 %v3140_v48, %v3136_v34  ;;  %v8765_v48 = vpack.c.bf16 %v3326_v52, %v3324_v25  ;;  %v3331_v34 = vld [vmem:[%s11485_s5 + $0x78] sm:$0xff] }
0x1164   :  { %v8767_v50 = vpack.c.bf16 %v3331_v34, %v3329_v7  ;;  %v3664_v25 = vld [vmem:[%s11486_s6 + $0x18] sm:$0xff]  ;;  %v3682_v7 = vld [vmem:[%s11486_s6 + $0xa8] sm:$0xff] }
0x1165   :  { %8312 = vmatprep.subr.msk.mxu1 %vm3155_vm7, %v3141_v54 }
0x1166   :  { %8313 = vmatpush3.msk.msra.mxu1 %vm3155_vm7, %v3141_v54  ;;  %v3328_v54 = vld [vmem:[%s11485_s5 + $0x60] sm:$0xff] }
0x1167   :  { %8315 = vmatmul.mubr.msk.f32.vlgmr.msra.gmra.mrb[26].mxu1 %vm3142_vm6, %v365_v24  ;;  %v3330_v24 = vld [vmem:[%s11485_s5 + $0x70] sm:$0xff] }
0x1168   :  { %8317 = vmatprep.mubr.msk.f32.mxu1 %vm3142_vm6, %v366_v58  ;;  %v8769_v58 = vpack.c.bf16 %v3330_v24, %v3328_v54  ;;  %v3666_v54 = vld [vmem:[%s11486_s6 + $0x28] sm:$0xff] }
0x116b   :  { %8318 = vmatmul.mubr.msk.f32.gmra.mrb[18].mxu1 %vm3142_vm6, %v367_v55 }
0x116c   :  { %3420 = vmatprep.mubr.f32.mxu1 %v9467_v4 }
0x123a   :  { %v8316_v59 = vpop.f32.mrb[26].mxu1 }
0x123b   :  { %v10247_v6 = vadd.f32 %v9031_v51, %v8316_v59  ;;  %v3225_v49 = vpop.f32.mrb[27].mxu1 }
0x123c   :  { %v10249_v63 = vadd.f32 %v9033_v57, %v3225_v49 }
0x123d   :  { %v3251_v2 = vsel %vm371_vm3, %v10247_v6, 0.0 }
0x123e   :  { %v8319_v22 = vpop.f32.mrb[18].mxu1  ;;  %v3248_v1 = vsel %vm371_vm3, %v10249_v63, 0.0 }
0x123f   :  { %3249 = vadd.xlane.f32.xlu0 %v3248_v1  ;;  %v3235_v42 = vpop.f32.mrb[19].mxu1  ;;  %v10270_v12 = vadd.f32 %v8319_v22, %v9750_v18  ;;  %v3319_v18 = vld [vmem:[%s11485_s5 + $0x18] sm:$0xff] }
0x1240   :  { %v10261_v9 = vadd.f32 %v3235_v42, %v9752_v19  ;;  %v8755_v21 = vpack.c.bf16 %v3319_v18, %v3317_v13 }
0x1241   :  { %v3257_v19 = vsel %vm371_vm3, %v10270_v12, 0.0 }
0x1242   :  { %v3254_v17 = vsel %vm371_vm3, %v10261_v9, 0.0  ;;  %8756 = vmatprep.subr.bf16.mxu1 %v8755_v21 }
0x1243   :  { %3252 = vadd.xlane.f32.xlu0 %v3251_v2  ;;  %8758 = vmatpush1.bf16.msra.mxu1 %v8757_v35 }
0x1244   :  { %8760 = vmatprep.subr.bf16.mxu1 %v8759_v27  ;;  %v3661_v27 = vld [vmem:[%s11486_s6] sm:$0xff] }
0x1245   :  { %v8773_v40 = vpack.c.bf16 %v3662_v46, %v3661_v27  ;;  %v3675_v46 = vld [vmem:[%s11486_s6 + $0x70] sm:$0xff] }
0x1247   :  { %8762 = vmatpush1.bf16.msra.mxu1 %v8761_v41  ;;  %v3679_v41 = vld [vmem:[%s11486_s6 + $0x90] sm:$0xff] }
0x1248   :  { %8764 = vmatprep.subr.bf16.mxu1 %v8763_v45  ;;  %v8775_v61 = vpack.c.bf16 %v3680_v43, %v3679_v41  ;;  %v3663_v45 = vld [vmem:[%s11486_s6 + $0x10] sm:$0xff] }
0x1249   :  { %v8777_v52 = vpack.c.bf16 %v3664_v25, %v3663_v45 }
0x124b   :  { %8766 = vmatpush1.bf16.msra.mxu1 %v8765_v48  ;;  %v3681_v48 = vld [vmem:[%s11486_s6 + $0xa0] sm:$0xff] }
0x124c   :  { %8768 = vmatprep.subr.bf16.mxu1 %v8767_v50  ;;  %v8779_v34 = vpack.c.bf16 %v3682_v7, %v3681_v48  ;;  %v3665_v50 = vld [vmem:[%s11486_s6 + $0x20] sm:$0xff] }
0x124d   :  { %v8781_v24 = vpack.c.bf16 %v3666_v54, %v3665_v50 }
0x124f   :  { %8770 = vmatpush1.bf16.msra.mxu1 %v8769_v58  ;;  %v3683_v58 = vld [vmem:[%s11486_s6 + $0xb0] sm:$0xff] }
0x12cc   :  { %v3250_v37 = vpop.xlane.xlu0 %3249 }
0x12cd   :  { %v3260_v14 = vmul.f32 0.015625, %v3250_v37 }
0x12cf   :  { %v10256_v36 = vsub.f32 %v10249_v63, %v3260_v14 }
0x12d0   :  { %v3253_v15 = vpop.xlane.xlu0 %3252 }
0x12d1   :  { %v3261_v5 = vmul.f32 0.015625, %v3253_v15  ;;  %v3268_v8 = vmul.f32 %v10256_v36, %v10256_v36 }
0x12d3   :  { %v10264_v10 = vsub.f32 %v10247_v6, %v3261_v5  ;;  %v3272_v11 = vsel %vm371_vm3, %v3268_v8, 0.0 }
0x12d4   :  { %3273 = vadd.xlane.f32.xlu0 %v3272_v11 }
0x12d5   :  { %v3269_v53 = vmul.f32 %v10264_v10, %v10264_v10 }
0x12d7   :  { %v3275_v3 = vsel %vm371_vm3, %v3269_v53, 0.0  ;;  %v10338_v53 = vrot.slane %v10224_v47, %v9767_v33 }
0x12d8   :  { %3276 = vadd.xlane.f32.xlu1 %v3275_v3  ;;  %3255 = vadd.xlane.f32.xlu0 %v3254_v17 }
0x12dc   :  { %3258 = vadd.xlane.f32.xlu1 %v3257_v19  ;;  %v10343_v19 = vrot.slane %v10224_v47, %v10211_v28 }
0x1361   :  { %v3274_v55 = vpop.xlane.xlu0 %3273 }
0x1362   :  { %v3284_v51 = vmul.f32 0.015625, %v3274_v55  ;;  %v3684_v55 = vld [vmem:[%s11486_s6 + $0xb8] sm:$0xff] }
0x1364   :  { %v3288_v57 = vadd.f32 1e-05, %v3284_v51  ;;  %v8783_v51 = vpack.c.bf16 %v3684_v55, %v3683_v58 }
0x1365   :  { %v3277_v59 = vpop.xlane.xlu1 %3276  ;;  %v3256_v49 = vpop.xlane.xlu0 %3255 }
0x1366   :  { %9297 = vrsqrt.f32 %v3288_v57  ;;  %v3285_v22 = vmul.f32 0.015625, %v3277_v59  ;;  %v3262_v1 = vmul.f32 0.015625, %v3256_v49  ;;  %v3667_v57 = vld [vmem:[%s11486_s6 + $0x30] sm:$0xff]  ;;  %v3668_v59 = vld [vmem:[%s11486_s6 + $0x38] sm:$0xff] }
0x1367   :  { %v8785_v49 = vpack.c.bf16 %v3668_v59, %v3667_v57 }
0x1368   :  { %v3289_v42 = vadd.f32 1e-05, %v3285_v22  ;;  %v10326_v2 = vsub.f32 %v10261_v9, %v3262_v1  ;;  %v3685_v22 = vld [vmem:[%s11486_s6 + $0xc0] sm:$0xff]  ;;  %v3686_v1 = vld [vmem:[%s11486_s6 + $0xc8] sm:$0xff] }
0x1369   :  { %v3259_v37 = vpop.xlane.xlu1 %3258 }
0x136a   :  { %9299 = vrsqrt.f32 %v3289_v42  ;;  %v3263_v14 = vmul.f32 0.015625, %v3259_v37  ;;  %v3270_v15 = vmul.f32 %v10326_v2, %v10326_v2  ;;  %v8787_v42 = vpack.c.bf16 %v3686_v1, %v3685_v22  ;;  %v3669_v37 = vld [vmem:[%s11486_s6 + $0x40] sm:$0xff] }
0x136c   :  { %v10331_v5 = vsub.f32 %v10270_v12, %v3263_v14  ;;  %v3278_v8 = vsel %vm371_vm3, %v3270_v15, 0.0  ;;  %v3670_v14 = vld [vmem:[%s11486_s6 + $0x48] sm:$0xff] }
0x136d   :  { %3279 = vadd.xlane.f32.xlu0 %v3278_v8  ;;  %v8789_v15 = vpack.c.bf16 %v3670_v14, %v3669_v37  ;;  %v3687_v8 = vld [vmem:[%s11486_s6 + $0xd0] sm:$0xff] }
0x136e   :  { %v3271_v11 = vmul.f32 %v10331_v5, %v10331_v5 }
0x1370   :  { %v9298_v3 = vpop.eup %9297  ;;  %v3281_v17 = vsel %vm371_vm3, %v3271_v11, 0.0  ;;  %v3688_v11 = vld [vmem:[%s11486_s6 + $0xd8] sm:$0xff] }
0x1371   :  { %v3296_v13 = vmul.f32 %v9298_v3, %v10256_v36  ;;  %3282 = vadd.xlane.f32.xlu1 %v3281_v17  ;;  %v3677_v36 = vld [vmem:[%s11486_s6 + $0x80] sm:$0xff]  ;;  %v8791_v3 = vpack.c.bf16 %v3688_v11, %v3687_v8  ;;  %v3671_v17 = vld [vmem:[%s11486_s6 + $0x50] sm:$0xff] }
0x1373   :  { %v3304_v18 = vmul.f32 %v10338_v53, %v3296_v13  ;;  %v3672_v13 = vld [vmem:[%s11486_s6 + $0x58] sm:$0xff] }
0x1374   :  { %v9300_v21 = vpop.eup %9299 }
0x1375   :  { %v3312_v30 = vadd.f32 %v10343_v19, %v3304_v18  ;;  %v3297_v32 = vmul.f32 %v9300_v21, %v10264_v10  ;;  %v3678_v10 = vld [vmem:[%s11486_s6 + $0x88] sm:$0xff]  ;;  %v8793_v18 = vpack.c.bf16 %v3672_v13, %v3671_v17  ;;  %v3689_v21 = vld [vmem:[%s11486_s6 + $0xe0] sm:$0xff] }
0x1376   :  { %v8771_v26 = vpack.c.bf16 %v3678_v10, %v3677_v36  ;;  %v3691_v10 = vld [vmem:[%s11486_s6 + $0xf0] sm:$0xff] }
0x1377   :  { %7490 = vmatmul.mubr.msk.f32.vlgmr.msra.gmra.mrb[28].mxu1 %vm371_vm3, %v3312_v30  ;;  %v3305_v35 = vmul.f32 %v10338_v53, %v3297_v32  ;;  %v3690_v30 = vld [vmem:[%s11486_s6 + $0xe8] sm:$0xff] }
0x1378   :  { %3426 = vmatprep.mubr.f32.mxu1 %v9467_v4  ;;  %8772 = vmatprep.subr.bf16.mxu0 %v8771_v26  ;;  %v8795_v32 = vpack.c.bf16 %v3690_v30, %v3689_v21  ;;  %v3692_v26 = vld [vmem:[%s11486_s6 + $0xf8] sm:$0xff] }
0x1379   :  { %v3313_v60 = vadd.f32 %v10343_v19, %v3305_v35  ;;  %8774 = vmatpush3.bf16.msra.mxu0 %v8773_v40  ;;  %v3673_v35 = vld [vmem:[%s11486_s6 + $0x60] sm:$0xff]  ;;  %v8799_v27 = vpack.c.bf16 %v3692_v26, %v3691_v10  ;;  %v3676_v40 = vld [vmem:[%s11486_s6 + $0x78] sm:$0xff] }
0x137a   :  { %8776 = vmatprep.subr.bf16.mxu0 %v8775_v61  ;;  %v8801_v43 = vpack.c.bf16 %v3676_v40, %v3675_v46 }
0x137b   :  { %7491 = vmatmul.mubr.msk.f32.gmra.mrb[30].mxu1 %vm371_vm3, %v3313_v60  ;;  %v3674_v60 = vld [vmem:[%s11486_s6 + $0x68] sm:$0xff] }
0x137c   :  { %3432 = vmatprep.mubr.f32.mxu1 %v9467_v4  ;;  %v8797_v36 = vpack.c.bf16 %v3674_v60, %v3673_v35 }
0x137d   :  { %8778 = vmatpush3.bf16.msra.mxu0 %v8777_v52 }
0x137e   :  { %8780 = vmatprep.subr.bf16.mxu0 %v8779_v34 }
0x1381   :  { %8782 = vmatpush3.bf16.msra.mxu0 %v8781_v24 }
0x1382   :  { %8784 = vmatprep.subr.bf16.mxu0 %v8783_v51 }
0x1385   :  { %8786 = vmatpush3.bf16.msra.mxu0 %v8785_v49 }
0x1386   :  { %8788 = vmatprep.subr.bf16.mxu0 %v8787_v42 }
0x1389   :  { %8790 = vmatpush3.bf16.msra.mxu0 %v8789_v15 }
0x138a   :  { %8792 = vmatprep.subr.bf16.mxu0 %v8791_v3 }
0x138d   :  { %8794 = vmatpush3.bf16.msra.mxu0 %v8793_v18 }
0x138e   :  { %8796 = vmatprep.subr.bf16.mxu0 %v8795_v32 }
0x1391   :  { %8798 = vmatpush3.bf16.msra.mxu0 %v8797_v36 }
0x1392   :  { %8800 = vmatprep.subr.bf16.mxu0 %v8799_v27 }
0x1395   :  { %8802 = vmatpush3.bf16.msra.mxu0 %v8801_v43 }
0x13fa   :  { %v3280_v41 = vpop.xlane.xlu0 %3279 }
0x13fb   :  { %v3286_v61 = vmul.f32 0.015625, %v3280_v41 }
0x13fd   :  { %v3290_v45 = vadd.f32 1e-05, %v3286_v61 }
0x13fe   :  { %v3283_v25 = vpop.xlane.xlu1 %3282 }
0x13ff   :  { %9301 = vrsqrt.f32 %v3290_v45  ;;  %v3287_v52 = vmul.f32 0.015625, %v3283_v25 }
0x1401   :  { %v3291_v48 = vadd.f32 1e-05, %v3287_v52 }
0x1403   :  { %9303 = vrsqrt.f32 %v3291_v48 }
0x1409   :  { %v9302_v7 = vpop.eup %9301 }
0x140a   :  { %v3298_v34 = vmul.f32 %v9302_v7, %v10326_v2  ;;  %v3332_v2 = vld [vmem:[%s11487_s4] sm:$0x3] }
0x140b   :  { %v10465_v57 = vrot.slane %v3332_v2, %v9761_v31 }
0x140c   :  { %v3306_v50 = vmul.f32 %v10338_v53, %v3298_v34 }
0x140d   :  { %v9304_v54 = vpop.eup %9303 }
0x140e   :  { %v3314_v24 = vadd.f32 %v10343_v19, %v3306_v50  ;;  %v3299_v58 = vmul.f32 %v9304_v54, %v10331_v5  ;;  %v10468_v5 = vrot.slane %v3332_v2, %v9767_v33 }
0x1410   :  { %7492 = vmatmul.mubr.msk.f32.gmra.mrb[32].mxu1 %vm371_vm3, %v3314_v24  ;;  %v3307_v55 = vmul.f32 %v10338_v53, %v3299_v58 }
0x1411   :  { %3438 = vmatprep.mubr.f32.mxu1 %v9467_v4 }
0x1412   :  { %v3315_v51 = vadd.f32 %v10343_v19, %v3307_v55 }
0x1414   :  { %7493 = vmatmul.mubr.msk.f32.gmra.mrb[34].mxu1 %vm371_vm3, %v3315_v51 }
0x1415   :  { %3963 = vmatprep.mubr.f32.mxu1 %v9467_v4 }
0x144a   :  { %v3422_v59 = vpop.f32.mrb[28].mxu1 }
0x144b   :  { %v10471_v53 = vadd.f32 %v3422_v59, %v10465_v57  ;;  %v3424_v49 = vpop.f32.mrb[29].mxu1 }
0x144c   :  { %v10474_v19 = vadd.f32 %v3424_v49, %v10468_v5 }
0x144d   :  { %v10477_v22 = vmul.f32 0.70710677, %v10471_v53 }
0x144e   :  { %v10480_v1 = vmul.f32 0.70710677, %v10474_v19  ;;  %v3428_v42 = vpop.f32.mrb[30].mxu1 }
0x144f   :  { %v3461_v37 = vand.u32 2147483647, %v10477_v22  ;;  %v10484_v14 = vadd.f32 %v3428_v42, %v10465_v57  ;;  %v3430_v15 = vpop.f32.mrb[31].mxu1  ;;  %vm3621_vm8 = vcmp.lt.f32.partialorder %v10477_v22, 0.0 }
0x1450   :  { %v3462_v8 = vand.u32 2147483647, %v10480_v1  ;;  %v10488_v11 = vadd.f32 %v3430_v15, %v10468_v5  ;;  %vm3622_vm9 = vcmp.lt.f32.partialorder %v10480_v1, 0.0 }
0x1451   :  { %v3469_v3 = vmul.f32 0.3275911, %v3461_v37  ;;  %v10491_v17 = vmul.f32 0.70710677, %v10484_v14  ;;  %v3573_v27 = vsub.f32 0.0, %v3461_v37 }
0x1452   :  { %v3470_v13 = vmul.f32 0.3275911, %v3462_v8  ;;  %v10494_v18 = vmul.f32 0.70710677, %v10488_v11  ;;  %v3574_v46 = vsub.f32 0.0, %v3462_v8 }
0x1453   :  { %v3477_v21 = vadd.f32 1.0, %v3469_v3  ;;  %v3463_v30 = vand.u32 2147483647, %v10491_v17  ;;  %v3581_v41 = vmul.f32 %v3573_v27, %v3461_v37  ;;  %vm3623_vm10 = vcmp.lt.f32.partialorder %v10491_v17, 0.0 }
0x1454   :  { %v3478_v32 = vadd.f32 1.0, %v3470_v13  ;;  %v3464_v35 = vand.u32 2147483647, %v10494_v18  ;;  %v3582_v25 = vmul.f32 %v3574_v46, %v3462_v8  ;;  %vm3624_vm11 = vcmp.lt.f32.partialorder %v10494_v18, 0.0 }
0x1455   :  { %9305 = vrcp.f32 %v3477_v21  ;;  %v3471_v60 = vmul.f32 0.3275911, %v3463_v30  ;;  %v3575_v43 = vsub.f32 0.0, %v3463_v30  ;;  %v3589_v50 = vmul.f32 1.442695, %v3581_v41 }
0x1456   :  { %9307 = vrcp.f32 %v3478_v32  ;;  %v3472_v36 = vmul.f32 0.3275911, %v3464_v35  ;;  %v3576_v52 = vsub.f32 0.0, %v3464_v35  ;;  %v3591_v51 = vmul.f32 1.442695, %v3582_v25 }
0x1457   :  { %v3479_v10 = vadd.f32 1.0, %v3471_v60  ;;  %v3583_v54 = vmul.f32 %v3575_v43, %v3463_v30 }
0x1458   :  { %v3480_v26 = vadd.f32 1.0, %v3472_v36  ;;  %v3584_v2 = vmul.f32 %v3576_v52, %v3464_v35 }
0x1459   :  { %9309 = vrcp.f32 %v3479_v10  ;;  %v3593_v3 = vmul.f32 1.442695, %v3583_v54 }
0x145a   :  { %9311 = vrcp.f32 %v3480_v26  ;;  %v3595_v32 = vmul.f32 1.442695, %v3584_v2 }
0x145b   :  { %9313 = vpow2.f32 %v3589_v50 }
0x145c   :  { %9315 = vpow2.f32 %v3591_v51 }
0x145d   :  { %9317 = vpow2.f32 %v3593_v3 }
0x145e   :  { %9319 = vpow2.f32 %v3595_v32 }
0x145f   :  { %v9306_v40 = vpop.eup %9305 }
0x1460   :  { %v9308_v61 = vpop.eup %9307  ;;  %v3501_v45 = vmul.f32 1.0614054, %v9306_v40 }
0x1461   :  { %v3502_v48 = vmul.f32 1.0614054, %v9308_v61 }
0x1462   :  { %v3509_v7 = vadd.f32 -1.4531521, %v3501_v45 }
0x1463   :  { %v9310_v34 = vpop.eup %9309  ;;  %v3510_v24 = vadd.f32 -1.4531521, %v3502_v48 }
0x1464   :  { %v9312_v58 = vpop.eup %9311  ;;  %v3517_v55 = vmul.f32 %v9306_v40, %v3509_v7  ;;  %v3503_v59 = vmul.f32 1.0614054, %v9310_v34 }
0x1465   :  { %v3518_v49 = vmul.f32 %v9308_v61, %v3510_v24  ;;  %v3504_v42 = vmul.f32 1.0614054, %v9312_v58  ;;  %v9314_v24 = vpop.eup %9313 }
0x1466   :  { %v3525_v15 = vadd.f32 1.4214138, %v3517_v55  ;;  %v3511_v37 = vadd.f32 -1.4531521, %v3503_v59  ;;  %v9316_v2 = vpop.eup %9315 }
0x1467   :  { %v3526_v13 = vadd.f32 1.4214138, %v3518_v49  ;;  %v3512_v8 = vadd.f32 -1.4531521, %v3504_v42 }
0x1468   :  { %v3533_v21 = vmul.f32 %v9306_v40, %v3525_v15  ;;  %v3519_v60 = vmul.f32 %v9310_v34, %v3511_v37 }
0x1469   :  { %v3534_v36 = vmul.f32 %v9308_v61, %v3526_v13  ;;  %v3520_v30 = vmul.f32 %v9312_v58, %v3512_v8  ;;  %v9318_v13 = vpop.eup %9317 }
0x146a   :  { %v3541_v10 = vadd.f32 -0.28449672, %v3533_v21  ;;  %v3527_v26 = vadd.f32 1.4214138, %v3519_v60  ;;  %v9320_v32 = vpop.eup %9319 }
0x146b   :  { %v3542_v27 = vadd.f32 -0.28449672, %v3534_v36  ;;  %v3528_v35 = vadd.f32 1.4214138, %v3520_v30 }
0x146c   :  { %v3549_v46 = vmul.f32 %v9306_v40, %v3541_v10  ;;  %v3535_v41 = vmul.f32 %v9310_v34, %v3527_v26 }
0x146d   :  { %v3550_v43 = vmul.f32 %v9308_v61, %v3542_v27  ;;  %v3536_v45 = vmul.f32 %v9312_v58, %v3528_v35 }
0x146e   :  { %v3557_v25 = vadd.f32 0.2548296, %v3549_v46  ;;  %v3543_v52 = vadd.f32 -0.28449672, %v3535_v41  ;;  %v3446_v46 = vmul.f32 0.5, %v10474_v19  ;;  %v3447_v19 = vmul.f32 0.5, %v10484_v14 }
0x146f   :  { %v3558_v48 = vadd.f32 0.2548296, %v3550_v43  ;;  %v3544_v7 = vadd.f32 -0.28449672, %v3536_v45 }
0x1470   :  { %v3565_v50 = vmul.f32 %v9306_v40, %v3557_v25  ;;  %v3551_v54 = vmul.f32 %v9310_v34, %v3543_v52 }
0x1471   :  { %v3566_v55 = vmul.f32 %v9308_v61, %v3558_v48  ;;  %v3552_v51 = vmul.f32 %v9312_v58, %v3544_v7  ;;  %v3448_v48 = vmul.f32 0.5, %v10488_v11 }
0x1472   :  { %v3605_v59 = vmul.f32 %v9314_v24, %v3565_v50  ;;  %v3559_v49 = vadd.f32 0.2548296, %v3551_v54 }
0x1473   :  { %v3606_v42 = vmul.f32 %v9316_v2, %v3566_v55  ;;  %v3560_v15 = vadd.f32 0.2548296, %v3552_v51 }
0x1474   :  { %v3613_v37 = vsub.f32 1.0, %v3605_v59  ;;  %v3567_v3 = vmul.f32 %v9310_v34, %v3559_v49 }
0x1475   :  { %v3614_v8 = vsub.f32 1.0, %v3606_v42  ;;  %v3568_v21 = vmul.f32 %v9312_v58, %v3560_v15  ;;  %v3445_v58 = vmul.f32 0.5, %v10471_v53 }
0x1476   :  { %v3629_v60 = vsub.f32 0.0, %v3613_v37  ;;  %v3607_v36 = vmul.f32 %v9318_v13, %v3567_v3 }
0x1477   :  { %v3630_v40 = vsub.f32 0.0, %v3614_v8  ;;  %v3608_v30 = vmul.f32 %v9320_v32, %v3568_v21 }
0x1478   :  { %v3637_v10 = vsel %vm3621_vm8, %v3629_v60, %v3613_v37  ;;  %v3615_v61 = vsub.f32 1.0, %v3607_v36 }
0x1479   :  { %v3645_v26 = vadd.f32 1.0, %v3637_v10  ;;  %v3638_v27 = vsel %vm3622_vm9, %v3630_v40, %v3614_v8  ;;  %v3616_v35 = vsub.f32 1.0, %v3608_v30 }
0x147a   :  { %v3646_v34 = vadd.f32 1.0, %v3638_v27  ;;  %v3631_v41 = vsub.f32 0.0, %v3615_v61 }
0x147b   :  { %v3632_v43 = vsub.f32 0.0, %v3616_v35  ;;  %v3653_v25 = vmul.f32 %v3645_v26, %v3445_v58 }
0x147c   :  { %v3654_v22 = vmul.f32 %v3646_v34, %v3446_v46  ;;  %v3639_v45 = vsel %vm3623_vm10, %v3631_v41, %v3615_v61 }
0x147d   :  { %v3640_v52 = vsel %vm3624_vm11, %v3632_v43, %v3616_v35  ;;  %v3647_v1 = vadd.f32 1.0, %v3639_v45 }
0x147e   :  { %3761 = vmatprep.mubr.f32.mxu0 %v3654_v22  ;;  %v3648_v7 = vadd.f32 1.0, %v3640_v52 }
0x147f   :  { %3762 = vmatmul.mubr.f32.vlgmr.msra.gmra.mrb[32].mxu0 %v3653_v25  ;;  %v3655_v54 = vmul.f32 %v3647_v1, %v3447_v19 }
0x1480   :  { %v3656_v50 = vmul.f32 %v3648_v7, %v3448_v48 }
0x1482   :  { %3766 = vmatprep.mubr.f32.mxu0 %v3656_v50 }
0x1483   :  { %3767 = vmatmul.mubr.f32.gmra.mrb[34].mxu0 %v3655_v54 }
0x14e3   :  { %v3434_v53 = vpop.f32.mrb[32].mxu1 }
0x14e4   :  { %v10507_v17 = vadd.f32 %v3434_v53, %v10465_v57  ;;  %v3436_v18 = vpop.f32.mrb[33].mxu1 }
0x14e5   :  { %v10510_v24 = vadd.f32 %v3436_v18, %v10468_v5 }
0x14e6   :  { %v10513_v55 = vmul.f32 0.70710677, %v10507_v17 }
0x14e7   :  { %v10516_v11 = vmul.f32 0.70710677, %v10510_v24  ;;  %v3440_v14 = vpop.f32.mrb[34].mxu1 }
0x14e8   :  { %v3465_v51 = vand.u32 2147483647, %v10513_v55  ;;  %v10520_v2 = vadd.f32 %v3440_v14, %v10465_v57  ;;  %v3442_v59 = vpop.f32.mrb[35].mxu1  ;;  %vm3625_vm12 = vcmp.lt.f32.partialorder %v10513_v55, 0.0 }
0x14e9   :  { %v3466_v49 = vand.u32 2147483647, %v10516_v11  ;;  %v10524_v42 = vadd.f32 %v3442_v59, %v10468_v5  ;;  %vm3626_vm13 = vcmp.lt.f32.partialorder %v10516_v11, 0.0 }
0x14ea   :  { %v3473_v15 = vmul.f32 0.3275911, %v3465_v51  ;;  %v10527_v37 = vmul.f32 0.70710677, %v10520_v2  ;;  %v3577_v30 = vsub.f32 0.0, %v3465_v51 }
0x14eb   :  { %v3474_v3 = vmul.f32 0.3275911, %v3466_v49  ;;  %v10530_v13 = vmul.f32 0.70710677, %v10524_v42  ;;  %v3578_v10 = vsub.f32 0.0, %v3466_v49 }
0x14ec   :  { %v3481_v8 = vadd.f32 1.0, %v3473_v15  ;;  %v3467_v21 = vand.u32 2147483647, %v10527_v37  ;;  %v3585_v26 = vmul.f32 %v3577_v30, %v3465_v51  ;;  %vm3627_vm14 = vcmp.lt.f32.partialorder %v10527_v37, 0.0 }
0x14ed   :  { %v3482_v32 = vadd.f32 1.0, %v3474_v3  ;;  %v3468_v57 = vand.u32 2147483647, %v10530_v13  ;;  %v3586_v46 = vmul.f32 %v3578_v10, %v3466_v49  ;;  %vm3628_vm15 = vcmp.lt.f32.partialorder %v10530_v13, 0.0 }
0x14ee   :  { %9321 = vrcp.f32 %v3481_v8  ;;  %v3475_v60 = vmul.f32 0.3275911, %v3467_v21  ;;  %v3579_v27 = vsub.f32 0.0, %v3467_v21  ;;  %v3597_v45 = vmul.f32 1.442695, %v3585_v26 }
0x14ef   :  { %9323 = vrcp.f32 %v3482_v32  ;;  %v3476_v36 = vmul.f32 0.3275911, %v3468_v57  ;;  %v3580_v34 = vsub.f32 0.0, %v3468_v57  ;;  %v3599_v48 = vmul.f32 1.442695, %v3586_v46 }
0x14f0   :  { %v3483_v5 = vadd.f32 1.0, %v3475_v60  ;;  %v3587_v25 = vmul.f32 %v3579_v27, %v3467_v21  ;;  %v3696_v37 = vrot.slane %v10224_v47, %v10216_v44 }
0x14f1   :  { %v3484_v40 = vadd.f32 1.0, %v3476_v36  ;;  %v3588_v7 = vmul.f32 %v3580_v34, %v3468_v57 }
0x14f2   :  { %9325 = vrcp.f32 %v3483_v5  ;;  %v3601_v51 = vmul.f32 1.442695, %v3587_v25 }
0x14f3   :  { %9327 = vrcp.f32 %v3484_v40  ;;  %v3603_v15 = vmul.f32 1.442695, %v3588_v7 }
0x14f4   :  { %9329 = vpow2.f32 %v3597_v45 }
0x14f5   :  { %9331 = vpow2.f32 %v3599_v48 }
0x14f6   :  { %9333 = vpow2.f32 %v3601_v51 }
0x14f7   :  { %9335 = vpow2.f32 %v3603_v15 }
0x14f8   :  { %v9322_v61 = vpop.eup %9321 }
0x14f9   :  { %v9324_v35 = vpop.eup %9323  ;;  %v3505_v41 = vmul.f32 1.0614054, %v9322_v61 }
0x14fa   :  { %v3506_v58 = vmul.f32 1.0614054, %v9324_v35 }
0x14fb   :  { %v3513_v43 = vadd.f32 -1.4531521, %v3505_v41 }
0x14fc   :  { %v9326_v22 = vpop.eup %9325  ;;  %v3514_v52 = vadd.f32 -1.4531521, %v3506_v58 }
0x14fd   :  { %v9328_v1 = vpop.eup %9327  ;;  %v3521_v19 = vmul.f32 %v9322_v61, %v3513_v43  ;;  %v3507_v50 = vmul.f32 1.0614054, %v9326_v22 }
0x14fe   :  { %v3522_v54 = vmul.f32 %v9324_v35, %v3514_v52  ;;  %v3508_v53 = vmul.f32 1.0614054, %v9328_v1  ;;  %v9330_v45 = vpop.eup %9329 }
0x14ff   :  { %v3529_v18 = vadd.f32 1.4214138, %v3521_v19  ;;  %v3515_v14 = vadd.f32 -1.4531521, %v3507_v50  ;;  %v9332_v48 = vpop.eup %9331 }
0x1500   :  { %v3530_v59 = vadd.f32 1.4214138, %v3522_v54  ;;  %v3516_v49 = vadd.f32 -1.4531521, %v3508_v53 }
0x1501   :  { %v3537_v3 = vmul.f32 %v9322_v61, %v3529_v18  ;;  %v3523_v8 = vmul.f32 %v9326_v22, %v3515_v14  ;;  %v9334_v14 = vpop.eup %9333 }
0x1502   :  { %v3538_v32 = vmul.f32 %v9324_v35, %v3530_v59  ;;  %v3524_v21 = vmul.f32 %v9328_v1, %v3516_v49  ;;  %v9336_v49 = vpop.eup %9335 }
0x1503   :  { %v3545_v60 = vadd.f32 -0.28449672, %v3537_v3  ;;  %v3531_v36 = vadd.f32 1.4214138, %v3523_v8 }
0x1504   :  { %v3546_v57 = vadd.f32 -0.28449672, %v3538_v32  ;;  %v3532_v5 = vadd.f32 1.4214138, %v3524_v21 }
0x1505   :  { %v3553_v40 = vmul.f32 %v9322_v61, %v3545_v60  ;;  %v3539_v30 = vmul.f32 %v9326_v22, %v3531_v36 }
0x1506   :  { %v3554_v10 = vmul.f32 %v9324_v35, %v3546_v57  ;;  %v3540_v26 = vmul.f32 %v9328_v1, %v3532_v5  ;;  %v3450_v57 = vmul.f32 0.5, %v10510_v24  ;;  %v3451_v24 = vmul.f32 0.5, %v10520_v2 }
0x1507   :  { %v3561_v27 = vadd.f32 0.2548296, %v3553_v40  ;;  %v3547_v46 = vadd.f32 -0.28449672, %v3539_v30 }
0x1508   :  { %v3562_v34 = vadd.f32 0.2548296, %v3554_v10  ;;  %v3548_v41 = vadd.f32 -0.28449672, %v3540_v26 }
0x1509   :  { %v3569_v58 = vmul.f32 %v9322_v61, %v3561_v27  ;;  %v3555_v43 = vmul.f32 %v9326_v22, %v3547_v46  ;;  %v3452_v27 = vmul.f32 0.5, %v10524_v42 }
0x150a   :  { %v3570_v25 = vmul.f32 %v9324_v35, %v3562_v34  ;;  %v3556_v52 = vmul.f32 %v9328_v1, %v3548_v41 }
0x150b   :  { %v3609_v7 = vmul.f32 %v9330_v45, %v3569_v58  ;;  %v3563_v19 = vadd.f32 0.2548296, %v3555_v43 }
0x150c   :  { %v3610_v50 = vmul.f32 %v9332_v48, %v3570_v25  ;;  %v3564_v54 = vadd.f32 0.2548296, %v3556_v52 }
0x150d   :  { %v3617_v53 = vsub.f32 1.0, %v3609_v7  ;;  %v3571_v18 = vmul.f32 %v9326_v22, %v3563_v19 }
0x150e   :  { %v3618_v51 = vsub.f32 1.0, %v3610_v50  ;;  %v3572_v59 = vmul.f32 %v9328_v1, %v3564_v54  ;;  %v3449_v1 = vmul.f32 0.5, %v10507_v17 }
0x150f   :  { %v3633_v15 = vsub.f32 0.0, %v3617_v53  ;;  %v3611_v3 = vmul.f32 %v9334_v14, %v3571_v18 }
0x1510   :  { %v3634_v61 = vsub.f32 0.0, %v3618_v51  ;;  %v3612_v8 = vmul.f32 %v9336_v49, %v3572_v59 }
0x1511   :  { %v3641_v35 = vsel %vm3625_vm12, %v3633_v15, %v3617_v53  ;;  %v3619_v32 = vsub.f32 1.0, %v3611_v3 }
0x1512   :  { %v3642_v21 = vsel %vm3626_vm13, %v3634_v61, %v3618_v51  ;;  %v3649_v60 = vadd.f32 1.0, %v3641_v35  ;;  %v3620_v36 = vsub.f32 1.0, %v3612_v8 }
0x1513   :  { %v3650_v22 = vadd.f32 1.0, %v3642_v21  ;;  %v3635_v5 = vsub.f32 0.0, %v3619_v32 }
0x1514   :  { %v3636_v40 = vsub.f32 0.0, %v3620_v36  ;;  %v3657_v10 = vmul.f32 %v3649_v60, %v3449_v1 }
0x1515   :  { %v3658_v55 = vmul.f32 %v3650_v22, %v3450_v57  ;;  %v3643_v30 = vsel %vm3627_vm14, %v3635_v5, %v3619_v32  ;;  %v7499_v5 = vld [vmem:[%s11477_s8 + $0x98] sm:$0xff] }
0x1516   :  { %v3644_v11 = vsel %vm3628_vm15, %v3636_v40, %v3620_v36  ;;  %v3651_v26 = vadd.f32 1.0, %v3643_v30  ;;  %v7496_v40 = vld [vmem:[%s11477_s8 + $0x80] sm:$0xff]  ;;  %v7501_v30 = vld [vmem:[%s11477_s8 + $0xa8] sm:$0xff] }
0x1517   :  { %3771 = vmatprep.mubr.f32.mxu0 %v3658_v55  ;;  %v3652_v46 = vadd.f32 1.0, %v3644_v11 }
0x1518   :  { %3772 = vmatmul.mubr.f32.gmra.mrb[36].mxu0 %v3657_v10  ;;  %v3659_v41 = vmul.f32 %v3651_v26, %v3451_v24  ;;  %v7503_v10 = vld [vmem:[%s11477_s8 + $0xb8] sm:$0xff]  ;;  %v7500_v26 = vld [vmem:[%s11477_s8 + $0xa0] sm:$0xff]  ;;  %v7505_v24 = vld [vmem:[%s11477_s8 + $0xc8] sm:$0xff] }
0x1519   :  { %v3660_v34 = vmul.f32 %v3652_v46, %v3452_v27  ;;  %v8807_v11 = vpack.c.bf16 %v7503_v10, %v7501_v30  ;;  %v7502_v27 = vld [vmem:[%s11477_s8 + $0xb0] sm:$0xff] }
0x151a   :  { %v8809_v46 = vpack.c.bf16 %v7502_v27, %v7500_v26 }
0x151b   :  { %3776 = vmatprep.mubr.f32.mxu0 %v3660_v34  ;;  %v7507_v34 = vld [vmem:[%s11477_s8 + $0xd8] sm:$0xff] }
0x151c   :  { %3777 = vmatmul.mubr.f32.gmra.mrb[38].mxu0 %v3659_v41  ;;  %v8811_v41 = vpack.c.bf16 %v7507_v34, %v7505_v24 }
0x1552   :  { %v7859_v17 = vpop.f32.mrb[32].mxu0 }
0x1553   :  { %v7860_v13 = vpop.f32.mrb[33].mxu0 }
0x1554   :  { %v7861_v58 = vadd.f32 %v7860_v13, %v7859_v17  ;;  %v7504_v17 = vld [vmem:[%s11477_s8 + $0xc0] sm:$0xff] }
0x1556   :  { %v3764_v43 = vadd.f32 %v7861_v58, %v3696_v37  ;;  %v7862_v45 = vpop.f32.mrb[34].mxu0  ;;  %v7509_v58 = vld [vmem:[%s11477_s8 + $0xe8] sm:$0xff] }
0x1557   :  { %v7863_v25 = vpop.f32.mrb[35].mxu0 }
0x1558   :  { %v10545_v42 = vadd.f32 %v10249_v63, %v3764_v43  ;;  %v7864_v52 = vadd.f32 %v7863_v25, %v7862_v45  ;;  %v7511_v43 = vld [vmem:[%s11477_s8 + $0xf8] sm:$0xff]  ;;  %v7508_v25 = vld [vmem:[%s11477_s8 + $0xe0] sm:$0xff] }
0x1559   :  { %v8815_v45 = vpack.c.bf16 %v7511_v43, %v7509_v58  ;;  %v7512_v43 = vld [vmem:[%s11479_s7 + $0x2] sm:$0x3] }
0x155a   :  { %v3769_v48 = vadd.f32 %v7864_v52, %v3696_v37  ;;  %v3789_v2 = vsel %vm371_vm3, %v10545_v42, 0.0  ;;  %v7510_v52 = vld [vmem:[%s11477_s8 + $0xf0] sm:$0xff] }
0x155b   :  { %3790 = vadd.xlane.f32.xlu0 %v3789_v2 }
0x155c   :  { %v10550_v7 = vadd.f32 %v10247_v6, %v3769_v48  ;;  %v8817_v48 = vpack.c.bf16 %v7510_v52, %v7508_v25 }
0x155e   :  { %v3792_v47 = vsel %vm371_vm3, %v10550_v7, 0.0 }
0x155f   :  { %3793 = vadd.xlane.f32.xlu1 %v3792_v47 }
0x15e8   :  { %v3791_v19 = vpop.xlane.xlu0 %3790 }
0x15e9   :  { %v3801_v50 = vmul.f32 0.015625, %v3791_v19 }
0x15eb   :  { %v10555_v54 = vsub.f32 %v10545_v42, %v3801_v50  ;;  %v7865_v63 = vpop.f32.mrb[36].mxu0 }
0x15ec   :  { %v3794_v53 = vpop.xlane.xlu1 %3793  ;;  %v7866_v18 = vpop.f32.mrb[37].mxu0 }
0x15ed   :  { %v3802_v14 = vmul.f32 0.015625, %v3794_v53  ;;  %v7867_v51 = vadd.f32 %v7866_v18, %v7865_v63  ;;  %v3809_v59 = vmul.f32 %v10555_v54, %v10555_v54 }
0x15ef   :  { %v10560_v6 = vsub.f32 %v10550_v7, %v3802_v14  ;;  %v3774_v49 = vadd.f32 %v7867_v51, %v3696_v37  ;;  %v7868_v15 = vpop.f32.mrb[38].mxu0  ;;  %v3813_v3 = vsel %vm371_vm3, %v3809_v59, 0.0 }
0x15f0   :  { %v7869_v61 = vpop.f32.mrb[39].mxu0  ;;  %3814 = vadd.xlane.f32.xlu0 %v3813_v3 }
0x15f1   :  { %v10564_v8 = vadd.f32 %v10261_v9, %v3774_v49  ;;  %v7870_v35 = vadd.f32 %v7869_v61, %v7868_v15  ;;  %v3810_v32 = vmul.f32 %v10560_v6, %v10560_v6  ;;  %v7497_v9 = vld [vmem:[%s11477_s8 + $0x88] sm:$0xff] }
0x15f2   :  { %v8803_v1 = vpack.c.bf16 %v7499_v5, %v7497_v9 }
0x15f3   :  { %v3779_v21 = vadd.f32 %v7870_v35, %v3696_v37  ;;  %v3816_v60 = vsel %vm371_vm3, %v3810_v32, 0.0  ;;  %v3795_v36 = vsel %vm371_vm3, %v10564_v8, 0.0  ;;  %v7506_v37 = vld [vmem:[%s11477_s8 + $0xd0] sm:$0xff] }
0x15f4   :  { %3817 = vadd.xlane.f32.xlu1 %v3816_v60  ;;  %3796 = vadd.xlane.f32.xlu0 %v3795_v36  ;;  %v8813_v13 = vpack.c.bf16 %v7506_v37, %v7504_v17  ;;  %v10630_v35 = vld [vmem:[%s11478_s10 + $0x10] sm:$0xff] }
0x15f5   :  { %v10572_v57 = vadd.f32 %v10270_v12, %v3779_v21  ;;  %v7498_v12 = vld [vmem:[%s11477_s8 + $0x90] sm:$0xff]  ;;  %8804 = vmatprep.subr.bf16.mxu1 %v8803_v1  ;;  %v3844_v21 = vrot.slane %v10630_v35, %v9761_v31 }
0x15f6   :  { %v8805_v55 = vpack.c.bf16 %v7498_v12, %v7496_v40 }
0x15f7   :  { %v3798_v22 = vsel %vm371_vm3, %v10572_v57, 0.0 }
0x15f8   :  { %3799 = vadd.xlane.f32.xlu1 %v3798_v22  ;;  %8806 = vmatpush1.bf16.msra.mxu1 %v8805_v55  ;;  %v3852_v22 = vrot.slane %v10630_v35, %v9767_v33 }
0x15f9   :  { %8808 = vmatprep.subr.bf16.mxu1 %v8807_v11 }
0x15fc   :  { %8810 = vmatpush1.bf16.msra.mxu1 %v8809_v46 }
0x15fd   :  { %8812 = vmatprep.subr.bf16.mxu1 %v8811_v41 }
0x1600   :  { %8814 = vmatpush1.bf16.msra.mxu1 %v8813_v13 }
0x1601   :  { %8816 = vmatprep.subr.bf16.mxu1 %v8815_v45  ;;  %v3880_v45 = vrot.slane %v7512_v43, %v9761_v31 }
0x1604   :  { %8818 = vmatpush1.bf16.msra.mxu1 %v8817_v48 }
0x167d   :  { %v3815_v2 = vpop.xlane.xlu0 %3814 }
0x167e   :  { %v3825_v47 = vmul.f32 0.015625, %v3815_v2  ;;  %v3884_v2 = vrot.slane %v7512_v43, %v9767_v33 }
0x1680   :  { %v3829_v19 = vadd.f32 1e-05, %v3825_v47 }
0x1681   :  { %v3818_v50 = vpop.xlane.xlu1 %3817  ;;  %v3797_v63 = vpop.xlane.xlu0 %3796 }
0x1682   :  { %9337 = vrsqrt.f32 %v3829_v19  ;;  %v3826_v53 = vmul.f32 0.015625, %v3818_v50  ;;  %v3803_v18 = vmul.f32 0.015625, %v3797_v63 }
0x1684   :  { %v3830_v14 = vadd.f32 1e-05, %v3826_v53  ;;  %v3807_v51 = vsub.f32 %v10564_v8, %v3803_v18 }
0x1685   :  { %v3800_v59 = vpop.xlane.xlu1 %3799 }
0x1686   :  { %9339 = vrsqrt.f32 %v3830_v14  ;;  %v3804_v49 = vmul.f32 0.015625, %v3800_v59  ;;  %v3811_v15 = vmul.f32 %v3807_v51, %v3807_v51 }
0x1688   :  { %v3808_v3 = vsub.f32 %v10572_v57, %v3804_v49  ;;  %v3819_v61 = vsel %vm371_vm3, %v3811_v15, 0.0 }
0x1689   :  { %3820 = vadd.xlane.f32.xlu0 %v3819_v61 }
0x168a   :  { %v3812_v32 = vmul.f32 %v3808_v3, %v3808_v3 }
0x168c   :  { %v9338_v60 = vpop.eup %9337  ;;  %v3822_v36 = vsel %vm371_vm3, %v3812_v32, 0.0 }
0x168d   :  { %v3837_v9 = vmul.f32 %v9338_v60, %v10555_v54  ;;  %3823 = vadd.xlane.f32.xlu1 %v3822_v36 }
0x168f   :  { %v3845_v5 = vmul.f32 %v3844_v21, %v3837_v9 }
0x1690   :  { %v9340_v1 = vpop.eup %9339 }
0x1691   :  { %v3853_v40 = vadd.f32 %v3852_v22, %v3845_v5  ;;  %v3838_v12 = vmul.f32 %v9340_v1, %v10560_v6 }
0x1693   :  { %7513 = vmatmul.mubr.msk.f32.vlgmr.msra.gmra.mrb[36].mxu1 %vm371_vm3, %v3853_v40  ;;  %v3846_v55 = vmul.f32 %v3844_v21, %v3838_v12 }
0x1694   :  { %3969 = vmatprep.mubr.f32.mxu1 %v9467_v4 }
0x1695   :  { %v3854_v30 = vadd.f32 %v3852_v22, %v3846_v55 }
0x1697   :  { %7514 = vmatmul.mubr.msk.f32.gmra.mrb[38].mxu1 %vm371_vm3, %v3854_v30 }
0x1698   :  { %3975 = vmatprep.mubr.f32.mxu1 %v9467_v4 }
0x1716   :  { %v3821_v10 = vpop.xlane.xlu0 %3820 }
0x1717   :  { %v3827_v11 = vmul.f32 0.015625, %v3821_v10 }
0x1719   :  { %v3831_v26 = vadd.f32 1e-05, %v3827_v11 }
0x171a   :  { %v3824_v54 = vpop.xlane.xlu1 %3823 }
0x171b   :  { %9341 = vrsqrt.f32 %v3831_v26  ;;  %v3828_v27 = vmul.f32 0.015625, %v3824_v54 }
0x171d   :  { %v3832_v46 = vadd.f32 1e-05, %v3828_v27 }
0x171f   :  { %9343 = vrsqrt.f32 %v3832_v46 }
0x1725   :  { %v9342_v24 = vpop.eup %9341 }
0x1726   :  { %v3839_v6 = vmul.f32 %v9342_v24, %v3807_v51 }
0x1728   :  { %v3847_v34 = vmul.f32 %v3844_v21, %v3839_v6 }
0x1729   :  { %v9344_v41 = vpop.eup %9343 }
0x172a   :  { %v3855_v17 = vadd.f32 %v3852_v22, %v3847_v34  ;;  %v3840_v37 = vmul.f32 %v9344_v41, %v3808_v3 }
0x172c   :  { %7515 = vmatmul.mubr.msk.f32.gmra.mrb[40].mxu1 %vm371_vm3, %v3855_v17  ;;  %v3848_v13 = vmul.f32 %v3844_v21, %v3840_v37 }
0x172d   :  { %3981 = vmatprep.mubr.f32.mxu1 %v9467_v4 }
0x172e   :  { %v3856_v58 = vadd.f32 %v3852_v22, %v3848_v13 }
0x1730   :  { %7516 = vmatmul.mubr.msk.f32.gmra.mrb[42].mxu1 %vm371_vm3, %v3856_v58 }
0x1766   :  { %v3965_v25 = vpop.f32.mrb[36].mxu1 }
0x1767   :  { %v3966_v52 = vadd.f32 %v3965_v25, %v3880_v45  ;;  %v3967_v48 = vpop.f32.mrb[37].mxu1 }
0x1768   :  { %v3968_v53 = vadd.f32 %v3967_v48, %v3884_v2 }
0x1769   :  { %v10651_v47 = vmul.f32 0.25, %v3966_v52 }
0x176a   :  { %v3971_v19 = vpop.f32.mrb[38].mxu1 }
0x176b   :  { %v3972_v50 = vadd.f32 %v3971_v19, %v3880_v45  ;;  %v3973_v63 = vpop.f32.mrb[39].mxu1  ;;  %8324 = vmatprep.mubr.msk.f32.mxu1 %vm258_vm2, %v10651_v47 }
0x176c   :  { %v3974_v18 = vadd.f32 %v3973_v63, %v3884_v2 }
0x176d   :  { %v10655_v14 = vpack.i.bf16 %v3972_v50, %v3966_v52  ;;  %v10665_v49 = vmul.f32 0.25, %v3972_v50 }
0x176e   :  { %v8825_v51 = vpack.c.bf16 %v3974_v18, %v3968_v53  ;;  %v10657_v59 = vpack.i.bf16 %v3974_v18, %v3968_v53 }
0x176f   :  { %9159 = vrot.lane.b32.xlu1 %v10655_v14, %s9473_s25  ;;  %9154 = vrot.lane.b32.xlu0 %v10655_v14, %s9468_s15 }
0x1773   :  { %4195 = vrot.lane.b32.xlu1 %v10651_v47, %s9471_s30 }
0x1777   :  { %4197 = vrot.lane.b32.xlu1 %v10665_v49, %s9471_s30 }
0x17e1   :  { %v9160_v15 = vpop.permute.xlu1 %9159  ;;  %v9155_v3 = vpop.permute.xlu0 %9154 }
0x17e2   :  { %v9162_v61 = vunpack.i.h.bf16 %v9160_v15  ;;  %v9161_v32 = vunpack.i.l.bf16 %v9160_v15  ;;  %v9157_v21 = vunpack.i.h.bf16 %v9155_v3  ;;  %v9156_v60 = vunpack.i.l.bf16 %v9155_v3 }
0x17e4   :  { %v8829_v36 = vpack.c.bf16 %v9162_v61, %v9161_v32  ;;  %v8819_v22 = vpack.c.bf16 %v9157_v21, %v9156_v60 }
0x17e5   :  { %v4196_v9 = vpop.permute.xlu1 %4195 }
0x17e6   :  { %8821 = vmatprep.subr.msk.bf16.mxu1 %vm9806_vm4, %v8819_v22  ;;  %8831 = vmatprep.subr.msk.bf16.mxu0 %vm9806_vm4, %v8829_v36 }
0x17e7   :  { %8338 = vmatprep.mubr.msk.f32.mxu0 %vm258_vm2, %v4196_v9  ;;  %8824 = vmatpush3.bf16.xpose.msk.msra.mxu1 %vm9806_vm4, %v8819_v22 }
0x17e8   :  { %8834 = vmatpush3.bf16.xpose.msk.msra.mxu0 %vm9806_vm4, %v8829_v36  ;;  %8826 = vmatprep.subr.bf16.mxu1 %v8825_v51 }
0x17e9   :  { %v4198_v5 = vpop.permute.xlu1 %4197 }
0x17ee   :  { %8325 = vmatmul.mubr.msk.f32.vlgmr.msra.gmra.mrb[44].mxu1 %vm258_vm2, %v10665_v49 }
0x17ef   :  { %8339 = vmatmul.mubr.msk.f32.vlgmr.msra.gmra.mrb[40].mxu0 %vm258_vm2, %v4198_v5  ;;  %8828 = vmatpush3.bf16.msra.mxu1 %v8825_v51 }
0x17ff   :  { %v3977_v1 = vpop.f32.mrb[40].mxu1 }
0x1800   :  { %v3979_v40 = vpop.f32.mrb[41].mxu1  ;;  %v10681_v55 = vadd.f32 %v3977_v1, %v3880_v45 }
0x1801   :  { %v3980_v11 = vadd.f32 %v3979_v40, %v3884_v2 }
0x1803   :  { %v3983_v12 = vpop.f32.mrb[42].mxu1 }
0x1804   :  { %v10683_v30 = vadd.f32 %v3983_v12, %v3880_v45  ;;  %v3985_v10 = vpop.f32.mrb[43].mxu1 }
0x1805   :  { %v3986_v26 = vadd.f32 %v3985_v10, %v3884_v2 }
0x1806   :  { %v10687_v54 = vpack.i.bf16 %v10683_v30, %v10681_v55 }
0x1807   :  { %v10689_v27 = vpack.c.bf16 %v3986_v26, %v3980_v11  ;;  %v10691_v46 = vpack.i.bf16 %v3986_v26, %v3980_v11 }
0x18c1   :  { %v8326_v24 = vpop.f32.mrb[44].mxu1 }
0x18c2   :  { %v8340_v6 = vpop.f32.mrb[40].mxu0  ;;  %v4083_v34 = vpop.f32.mrb[45].mxu1  ;;  %v4095_v41 = vsel %vm258_vm2, %v8326_v24, -inf }
0x18c3   :  { %v4277_v17 = vpop.f32.mrb[41].mxu0  ;;  %4096 = vmax.xlane.f32.xlu1 %v4095_v41  ;;  %v4092_v37 = vsel %vm258_vm2, %v4083_v34, -inf  ;;  %v4289_v58 = vsel %vm258_vm2, %v8340_v6, -inf }
0x18c4   :  { %4093 = vmax.xlane.f32.xlu0 %v4092_v37  ;;  %v4286_v13 = vsel %vm258_vm2, %v4277_v17, -inf }
0x18c8   :  { %4287 = vmax.xlane.f32.xlu0 %v4286_v13 }
0x18cc   :  { %4290 = vmax.xlane.f32.xlu0 %v4289_v58 }
0x1950   :  { %v4097_v43 = vpop.xlane.xlu1 %4096 }
0x1951   :  { %v4099_v45 = vsub.f32 %v8326_v24, %v4097_v43  ;;  %v4094_v25 = vpop.xlane.xlu0 %4093 }
0x1952   :  { %v4098_v52 = vsub.f32 %v4083_v34, %v4094_v25 }
0x1953   :  { %v4102_v48 = vmul.f32 1.442695, %v4099_v45 }
0x1954   :  { %v4100_v2 = vmul.f32 1.442695, %v4098_v52 }
0x1955   :  { %9345 = vpow2.f32 %v4102_v48  ;;  %v4288_v19 = vpop.xlane.xlu0 %4287 }
0x1956   :  { %9347 = vpow2.f32 %v4100_v2  ;;  %v4292_v50 = vsub.f32 %v4277_v17, %v4288_v19 }
0x1958   :  { %v4294_v63 = vmul.f32 1.442695, %v4292_v50 }
0x1959   :  { %v4291_v53 = vpop.xlane.xlu0 %4290 }
0x195a   :  { %9349 = vpow2.f32 %v4294_v63  ;;  %v4293_v18 = vsub.f32 %v8340_v6, %v4291_v53  ;;  %v10731_v53 = vmul.f32 0.25, %v10681_v55  ;;  %v7517_v55 = vld [vmem:[%s11480_s9 + $0x100] sm:$0xff] }
0x195c   :  { %v4296_v51 = vmul.f32 1.442695, %v4293_v18  ;;  %v7519_v18 = vld [vmem:[%s11480_s9 + $0x110] sm:$0xff] }
0x195e   :  { %9351 = vpow2.f32 %v4296_v51  ;;  %v7520_v51 = vld [vmem:[%s11480_s9 + $0x118] sm:$0xff] }
0x195f   :  { %v9346_v15 = vpop.eup %9345 }
0x1960   :  { %v9348_v3 = vpop.eup %9347  ;;  %v4107_v61 = vsel %vm258_vm2, %v9346_v15, 0.0 }
0x1961   :  { %4108 = vadd.xlane.f32.xlu1 %v4107_v61  ;;  %v4104_v32 = vsel %vm258_vm2, %v9348_v3, 0.0 }
0x1962   :  { %4105 = vadd.xlane.f32.xlu0 %v4104_v32 }
0x1964   :  { %v9350_v21 = vpop.eup %9349 }
0x1965   :  { %v4298_v60 = vsel %vm258_vm2, %v9350_v21, 0.0 }
0x1966   :  { %4299 = vadd.xlane.f32.xlu0 %v4298_v60 }
0x1968   :  { %v9352_v36 = vpop.eup %9351 }
0x1969   :  { %v4301_v22 = vsel %vm258_vm2, %v9352_v36, 0.0 }
0x196a   :  { %4302 = vadd.xlane.f32.xlu1 %v4301_v22 }
0x197b   :  { %9169 = vrot.lane.b32.xlu1 %v10655_v14, %s9469_s28 }
0x197c   :  { %9164 = vrot.lane.b32.xlu0 %v10657_v59, %s9471_s30 }
0x197f   :  { %4559 = vrot.lane.b32.xlu1 %v10651_v47, %s9470_s19 }
0x1980   :  { %9174 = vrot.lane.b32.xlu0 %v10655_v14, %s9474_s1 }
0x1983   :  { %4561 = vrot.lane.b32.xlu1 %v10665_v49, %s9470_s19 }
0x1984   :  { %4844 = vrot.lane.b32.xlu0 %v10665_v49, %s9472_s24 }
0x1987   :  { %4842 = vrot.lane.b32.xlu1 %v10651_v47, %s9472_s24 }
0x19ee   :  { %v4109_v9 = vpop.xlane.xlu1 %4108 }
0x19ef   :  { %9353 = vrcp.f32 %v4109_v9  ;;  %v4106_v5 = vpop.xlane.xlu0 %4105 }
0x19f0   :  { %9355 = vrcp.f32 %v4106_v5 }
0x19f3   :  { %v4300_v1 = vpop.xlane.xlu0 %4299 }
0x19f4   :  { %9357 = vrcp.f32 %v4300_v1 }
0x19f7   :  { %v4303_v40 = vpop.xlane.xlu1 %4302  ;;  %v9165_v12 = vpop.permute.xlu0 %9164 }
0x19f8   :  { %9359 = vrcp.f32 %v4303_v40  ;;  %v9167_v10 = vunpack.i.h.bf16 %v9165_v12  ;;  %v9166_v14 = vunpack.i.l.bf16 %v9165_v12 }
0x19f9   :  { %v9354_v11 = vpop.eup %9353 }
0x19fa   :  { %v9356_v26 = vpop.eup %9355  ;;  %v8835_v24 = vpack.c.bf16 %v9167_v10, %v9166_v14  ;;  %v4113_v49 = vmul.f32 %v9354_v11, %v9346_v15  ;;  %v10742_v15 = vpack.c.bf16 %v7520_v51, %v7519_v18  ;;  %v10771_v10 = vmul.f32 0.25, %v10683_v30 }
0x19fb   :  { %v9170_v6 = vpop.permute.xlu1 %9169  ;;  %v4112_v34 = vmul.f32 %v9356_v26, %v9348_v3  ;;  %v9175_v58 = vpop.permute.xlu0 %9174  ;;  %v7518_v3 = vld [vmem:[%s11480_s9 + $0x108] sm:$0xff] }
0x19fc   :  { %v9172_v41 = vunpack.i.h.bf16 %v9170_v6  ;;  %v9171_v17 = vunpack.i.l.bf16 %v9170_v6  ;;  %8836 = vmatprep.subr.bf16.mxu1 %v8835_v24  ;;  %v9177_v25 = vunpack.i.h.bf16 %v9175_v58  ;;  %v9176_v52 = vunpack.i.l.bf16 %v9175_v58  ;;  %8840 = vmatprep.subr.bf16.mxu0 %v10742_v15 }
0x19fd   :  { %8331 = vmatprep.mubr.msk.f32.mxu1 %vm258_vm2, %v4112_v34  ;;  %8842 = vmatpush3.bf16.msra.mxu0 %v10742_v15  ;;  %v10752_v61 = vpack.c.bf16 %v7518_v3, %v7517_v55 }
0x19fe   :  { %v9358_v47 = vpop.eup %9357  ;;  %v8847_v37 = vpack.c.bf16 %v9172_v41, %v9171_v17  ;;  %8332 = vmatmul.mubr.msk.f32.vlgmr.msra.gmra.mrb[46].mxu1 %vm258_vm2, %v4113_v49  ;;  %v8861_v2 = vpack.c.bf16 %v9177_v25, %v9176_v52 }
0x19ff   :  { %8838 = vmatpush3.bf16.msra.mxu1 %v8835_v24  ;;  %v4306_v13 = vmul.f32 %v9358_v47, %v9350_v21  ;;  %v4560_v48 = vpop.permute.xlu1 %4559  ;;  %v4845_v63 = vpop.permute.xlu0 %4844  ;;  %8844 = vmatprep.subr.bf16.mxu0 %v10752_v61 }
0x1a00   :  { %8849 = vmatprep.subr.msk.bf16.mxu1 %vm9806_vm4, %v8847_v37 }
0x1a01   :  { %8345 = vmatprep.mubr.msk.f32.mxu1 %vm258_vm2, %v4306_v13 }
0x1a02   :  { %v9360_v43 = vpop.eup %9359 }
0x1a03   :  { %v4307_v45 = vmul.f32 %v9360_v43, %v9352_v36  ;;  %v4562_v19 = vpop.permute.xlu1 %4561 }
0x1a05   :  { %8346 = vmatmul.mubr.msk.f32.vlgmr.msra.gmra.mrb[48].mxu1 %vm258_vm2, %v4307_v45 }
0x1a06   :  { %8366 = vmatprep.mubr.msk.f32.mxu1 %vm258_vm2, %v4560_v48 }
0x1a07   :  { %v4843_v50 = vpop.permute.xlu1 %4842 }
0x1a08   :  { %8852 = vmatpush3.bf16.xpose.msk.msra.mxu1 %vm9806_vm4, %v8847_v37 }
0x1a09   :  { %8863 = vmatprep.subr.msk.bf16.mxu1 %vm9806_vm4, %v8861_v2 }
0x1a0f   :  { %8367 = vmatmul.mubr.msk.f32.vlgmr.msra.gmra.mrb[50].mxu1 %vm258_vm2, %v4562_v19 }
0x1a10   :  { %8866 = vmatpush3.bf16.xpose.msk.msra.mxu1 %vm9806_vm4, %v8861_v2  ;;  %8387 = vmatprep.mubr.msk.f32.mxu1 %vm258_vm2, %v4843_v50 }
0x1a17   :  { %8388 = vmatmul.mubr.msk.f32.vlgmr.msra.gmra.mrb[52].mxu1 %vm258_vm2, %v4845_v63 }
0x1a18   :  { %8408 = vmatprep.mubr.msk.f32.mxu1 %vm258_vm2, %v10731_v53 }
0x1ad1   :  { %v8333_v32 = vpop.f32.mrb[46].mxu1 }
0x1ad2   :  { %v4186_v21 = vpop.f32.mrb[47].mxu1 }
0x1ad8   :  { %v8347_v60 = vpop.f32.mrb[48].mxu1 }
0x1ad9   :  { %v4388_v36 = vpop.f32.mrb[49].mxu1 }
0x1ada   :  { %8352 = vmatprep.mubr.msk.f32.mxu0 %vm258_vm2, %v4388_v36 }
0x1adb   :  { %8353 = vmatmul.mubr.msk.f32.vlgmr.msra.gmra.mrb[42].mxu0 %vm258_vm2, %v8347_v60 }
0x1adc   :  { %8359 = vmatprep.mubr.msk.f32.mxu0 %vm258_vm2, %v4186_v21  ;;  %8846 = vmatpush3.bf16.msra.mxu0 %v10752_v61 }
0x1ae2   :  { %v8368_v22 = vpop.f32.mrb[50].mxu1 }
0x1ae3   :  { %v4641_v9 = vpop.f32.mrb[51].mxu1  ;;  %v4653_v5 = vsel %vm258_vm2, %v8368_v22, -inf  ;;  %8360 = vmatmul.mubr.msk.f32.vlgmr.msra.gmra.mrb[42].mxu0 %vm258_vm2, %v8333_v32 }
0x1ae4   :  { %4654 = vmax.xlane.f32.xlu0 %v4653_v5  ;;  %v4650_v1 = vsel %vm258_vm2, %v4641_v9, -inf }
0x1ae5   :  { %4651 = vmax.xlane.f32.xlu1 %v4650_v1 }
0x1aea   :  { %v8389_v40 = vpop.f32.mrb[52].mxu1 }
0x1aeb   :  { %v10762_v12 = vpop.f32.mrb[53].mxu1  ;;  %v4936_v14 = vsel %vm258_vm2, %v8389_v40, -inf }
0x1aec   :  { %v4933_v50 = vsel %vm258_vm2, %v10762_v12, -inf }
0x1af6   :  { %9179 = vrot.lane.b32.xlu1 %v10657_v59, %s9470_s19 }
0x1afa   :  { %9189 = vrot.lane.b32.xlu1 %v10687_v54, %s9473_s25 }
0x1afe   :  { %5319 = vrot.lane.b32.xlu1 %v10731_v53, %s9471_s30 }
0x1b02   :  { %5321 = vrot.lane.b32.xlu1 %v10771_v10, %s9471_s30 }
0x1b26   :  { %4937 = vmax.xlane.f32.xlu1 %v4936_v14 }
0x1b37   :  { %9199 = vrot.lane.b32.xlu1 %v10687_v54, %s9469_s28 }
0x1b3b   :  { %5683 = vrot.lane.b32.xlu1 %v10731_v53, %s9470_s19 }
0x1b3f   :  { %5685 = vrot.lane.b32.xlu1 %v10771_v10, %s9470_s19 }
0x1b71   :  { %v4655_v11 = vpop.xlane.xlu0 %4654 }
0x1b72   :  { %v4657_v26 = vsub.f32 %v8368_v22, %v4655_v11  ;;  %v4652_v24 = vpop.xlane.xlu1 %4651 }
0x1b73   :  { %v4656_v30 = vsub.f32 %v4641_v9, %v4652_v24 }
0x1b74   :  { %v4660_v6 = vmul.f32 1.442695, %v4657_v26 }
0x1b75   :  { %v4658_v34 = vmul.f32 1.442695, %v4656_v30 }
0x1b76   :  { %v9180_v49 = vpop.permute.xlu1 %9179 }
0x1b77   :  { %9361 = vpow2.f32 %v4658_v34  ;;  %v9182_v41 = vunpack.i.h.bf16 %v9180_v49  ;;  %v9181_v17 = vunpack.i.l.bf16 %v9180_v49 }
0x1b78   :  { %9363 = vpow2.f32 %v4660_v6 }
0x1b79   :  { %v8853_v47 = vpack.c.bf16 %v9182_v41, %v9181_v17 }
0x1b7a   :  { %v9190_v45 = vpop.permute.xlu1 %9189 }
0x1b7b   :  { %8854 = vmatprep.subr.bf16.mxu0 %v8853_v47  ;;  %v9192_v32 = vunpack.i.h.bf16 %v9190_v45  ;;  %v9191_v21 = vunpack.i.l.bf16 %v9190_v45 }
0x1b7c   :  { %8856 = vmatpush3.bf16.msra.mxu0 %v8853_v47 }
0x1b7d   :  { %v8885_v1 = vpack.c.bf16 %v9192_v32, %v9191_v21 }
0x1b7e   :  { %v5320_v25 = vpop.permute.xlu1 %5319 }
0x1b81   :  { %v9362_v37 = vpop.eup %9361 }
0x1b82   :  { %v4662_v13 = vsel %vm258_vm2, %v9362_v37, 0.0  ;;  %v9364_v58 = vpop.eup %9363  ;;  %v5322_v52 = vpop.permute.xlu1 %5321 }
0x1b83   :  { %4663 = vadd.xlane.f32.xlu0 %v4662_v13  ;;  %v4665_v43 = vsel %vm258_vm2, %v9364_v58, 0.0  ;;  %v7521_v13 = vld [vmem:[%s11480_s9 + $0x120] sm:$0xff] }
0x1b87   :  { %4666 = vadd.xlane.f32.xlu0 %v4665_v43 }
0x1b9d   :  { %9184 = vrot.lane.b32.xlu0 %v10687_v54, %s9468_s15 }
0x1bb3   :  { %v4938_v48 = vpop.xlane.xlu1 %4937 }
0x1bb4   :  { %v4940_v2 = vsub.f32 %v8389_v40, %v4938_v48 }
0x1bb6   :  { %v4943_v19 = vmul.f32 1.442695, %v4940_v2 }
0x1bb7   :  { %v9200_v40 = vpop.permute.xlu1 %9199 }
0x1bb8   :  { %9365 = vpow2.f32 %v4943_v19  ;;  %v9202_v26 = vunpack.i.h.bf16 %v9200_v40  ;;  %v9201_v24 = vunpack.i.l.bf16 %v9200_v40  ;;  %v7523_v19 = vld [vmem:[%s11480_s9 + $0x130] sm:$0xff] }
0x1bba   :  { %v8903_v30 = vpack.c.bf16 %v9202_v26, %v9201_v24 }
0x1bbb   :  { %v5684_v6 = vpop.permute.xlu1 %5683 }
0x1bbc   :  { %4934 = vmax.xlane.f32.xlu0 %v4933_v50  ;;  %v7524_v50 = vld [vmem:[%s11480_s9 + $0x138] sm:$0xff] }
0x1bbf   :  { %v5686_v34 = vpop.permute.xlu1 %5685 }
0x1bc2   :  { %v10788_v63 = vpop.eup %9365 }
0x1bc3   :  { %v4948_v18 = vsel %vm258_vm2, %v10788_v63, 0.0 }
0x1bc4   :  { %4949 = vadd.xlane.f32.xlu0 %v4948_v18 }
0x1c10   :  { %v4664_v51 = vpop.xlane.xlu0 %4663 }
0x1c11   :  { %9367 = vrcp.f32 %v4664_v51 }
0x1c14   :  { %v4667_v55 = vpop.xlane.xlu0 %4666 }
0x1c15   :  { %9369 = vrcp.f32 %v4667_v55  ;;  %v10832_v55 = vpack.c.bf16 %v7524_v50, %v7523_v19 }
0x1c18   :  { %v9185_v3 = vpop.permute.xlu0 %9184 }
0x1c19   :  { %v9187_v60 = vunpack.i.h.bf16 %v9185_v3  ;;  %v9186_v36 = vunpack.i.l.bf16 %v9185_v3 }
0x1c1b   :  { %v9368_v22 = vpop.eup %9367  ;;  %v8875_v9 = vpack.c.bf16 %v9187_v60, %v9186_v36 }
0x1c1c   :  { %v4670_v5 = vmul.f32 %v9368_v22, %v9362_v37 }
0x1c1d   :  { %8877 = vmatprep.subr.msk.bf16.mxu1 %vm9806_vm4, %v8875_v9 }
0x1c1e   :  { %8373 = vmatprep.mubr.msk.f32.mxu0 %vm258_vm2, %v4670_v5  ;;  %8880 = vmatpush3.bf16.xpose.msk.msra.mxu1 %vm9806_vm4, %v8875_v9 }
0x1c1f   :  { %v9370_v14 = vpop.eup %9369  ;;  %8887 = vmatprep.subr.msk.bf16.mxu1 %vm9806_vm4, %v8885_v1 }
0x1c20   :  { %v4671_v11 = vmul.f32 %v9370_v14, %v9364_v58  ;;  %v7522_v58 = vld [vmem:[%s11480_s9 + $0x128] sm:$0xff] }
0x1c21   :  { %v10820_v43 = vpack.c.bf16 %v7522_v58, %v7521_v13 }
0x1c22   :  { %8374 = vmatmul.mubr.msk.f32.vlgmr.msra.gmra.mrb[44].mxu0 %vm258_vm2, %v4671_v11 }
0x1c23   :  { %8858 = vmatprep.subr.bf16.mxu0 %v10820_v43 }
0x1c24   :  { %8860 = vmatpush3.bf16.msra.mxu0 %v10820_v43 }
0x1c25   :  { %8409 = vmatmul.mubr.msk.f32.vlgmr.msra.gmra.mrb[54].mxu1 %vm258_vm2, %v10771_v10 }
0x1c26   :  { %8890 = vmatpush3.bf16.xpose.msk.msra.mxu1 %vm9806_vm4, %v8885_v1  ;;  %8422 = vmatprep.mubr.msk.f32.mxu1 %vm258_vm2, %v5320_v25 }
0x1c27   :  { %8905 = vmatprep.subr.msk.bf16.mxu1 %vm9806_vm4, %v8903_v30 }
0x1c2d   :  { %8423 = vmatmul.mubr.msk.f32.vlgmr.msra.gmra.mrb[56].mxu1 %vm258_vm2, %v5322_v52 }
0x1c2e   :  { %8908 = vmatpush3.bf16.xpose.msk.msra.mxu1 %vm9806_vm4, %v8903_v30  ;;  %8450 = vmatprep.mubr.msk.f32.mxu1 %vm258_vm2, %v5684_v6 }
0x1c35   :  { %8451 = vmatmul.mubr.msk.f32.vlgmr.msra.gmra.mrb[58].mxu1 %vm258_vm2, %v5686_v34 }
0x1c49   :  { %v4935_v49 = vpop.xlane.xlu0 %4934 }
0x1c4a   :  { %v4939_v41 = vsub.f32 %v10762_v12, %v4935_v49 }
0x1c4c   :  { %v4941_v17 = vmul.f32 1.442695, %v4939_v41 }
0x1c4e   :  { %9371 = vpow2.f32 %v4941_v17 }
0x1c51   :  { %v4950_v12 = vpop.xlane.xlu0 %4949 }
0x1c58   :  { %v9372_v47 = vpop.eup %9371 }
0x1c59   :  { %v4945_v37 = vsel %vm258_vm2, %v9372_v47, 0.0 }
0x1c5a   :  { %4946 = vadd.xlane.f32.xlu0 %v4945_v37 }
0x1c70   :  { %9194 = vrot.lane.b32.xlu0 %v10657_v59, %s9472_s24 }
0x1ce7   :  { %v4947_v45 = vpop.xlane.xlu0 %4946 }
0x1ce8   :  { %9373 = vrcp.f32 %v4947_v45 }
0x1ce9   :  { %9375 = vrcp.f32 %v4950_v12 }
0x1ceb   :  { %v9195_v25 = vpop.permute.xlu0 %9194 }
0x1cec   :  { %v9197_v52 = vunpack.i.h.bf16 %v9195_v25  ;;  %v9196_v48 = vunpack.i.l.bf16 %v9195_v25 }
0x1cee   :  { %v8867_v2 = vpack.c.bf16 %v9197_v52, %v9196_v48 }
0x1cf0   :  { %8868 = vmatprep.subr.bf16.mxu0 %v8867_v2 }
0x1cf2   :  { %v9374_v18 = vpop.eup %9373 }
0x1cf3   :  { %v9376_v3 = vpop.eup %9375  ;;  %v4953_v32 = vmul.f32 %v9374_v18, %v9372_v47 }
0x1cf4   :  { %v4954_v22 = vmul.f32 %v9376_v3, %v10788_v63 }
0x1cf5   :  { %v8375_v51 = vpop.f32.mrb[44].mxu0 }
0x1cf6   :  { %v4750_v59 = vpop.f32.mrb[45].mxu0 }
0x1cf7   :  { %8380 = vmatprep.mubr.msk.f32.mxu0 %vm258_vm2, %v4750_v59 }
0x1cf8   :  { %8381 = vmatmul.mubr.msk.f32.vlgmr.msra.gmra.mrb[42].mxu0 %vm258_vm2, %v8375_v51  ;;  %v8410_v21 = vpop.f32.mrb[54].mxu1 }
0x1cf9   :  { %8870 = vmatpush3.bf16.msra.mxu0 %v8867_v2  ;;  %8394 = vmatprep.mubr.msk.f32.mxu0 %vm258_vm2, %v4953_v32  ;;  %v5207_v60 = vpop.f32.mrb[55].mxu1  ;;  %v5219_v36 = vsel %vm258_vm2, %v8410_v21, -inf }
0x1cfa   :  { %5220 = vmax.xlane.f32.xlu1 %v5219_v36  ;;  %v5216_v9 = vsel %vm258_vm2, %v5207_v60, -inf  ;;  %8872 = vmatprep.subr.bf16.mxu0 %v10832_v55 }
0x1cfb   :  { %5217 = vmax.xlane.f32.xlu0 %v5216_v9 }
0x1cfc   :  { %8395 = vmatmul.mubr.msk.f32.vlgmr.msra.gmra.mrb[46].mxu0 %vm258_vm2, %v4954_v22 }
0x1cfd   :  { %8874 = vmatpush3.bf16.msra.mxu0 %v10832_v55 }
0x1cfe   :  { %8882 = vmatprep.subr.bf16.mxu0 %v10689_v27 }
0x1d00   :  { %v8424_v5 = vpop.f32.mrb[56].mxu1 }
0x1d01   :  { %v5401_v1 = vpop.f32.mrb[57].mxu1  ;;  %v5413_v14 = vsel %vm258_vm2, %v8424_v5, -inf }
0x1d02   :  { %v5410_v40 = vsel %vm258_vm2, %v5401_v1, -inf }
0x1d03   :  { %5411 = vmax.xlane.f32.xlu0 %v5410_v40 }
0x1d07   :  { %5414 = vmax.xlane.f32.xlu0 %v5413_v14 }
0x1d08   :  { %v10846_v63 = vpop.f32.mrb[58].mxu1 }
0x1d09   :  { %v10848_v11 = vpop.f32.mrb[59].mxu1  ;;  %v5777_v59 = vsel %vm258_vm2, %v10846_v63, -inf }
0x1d87   :  { %v5221_v26 = vpop.xlane.xlu1 %5220 }
0x1d88   :  { %v5223_v24 = vsub.f32 %v8410_v21, %v5221_v26  ;;  %v5218_v30 = vpop.xlane.xlu0 %5217 }
0x1d89   :  { %v5222_v6 = vsub.f32 %v5207_v60, %v5218_v30 }
0x1d8a   :  { %v5226_v34 = vmul.f32 1.442695, %v5223_v24 }
0x1d8b   :  { %v5224_v49 = vmul.f32 1.442695, %v5222_v6 }
0x1d8c   :  { %9377 = vpow2.f32 %v5226_v34 }
0x1d8d   :  { %9379 = vpow2.f32 %v5224_v49 }
0x1d90   :  { %v5412_v41 = vpop.xlane.xlu0 %5411 }
0x1d91   :  { %v5416_v17 = vsub.f32 %v5401_v1, %v5412_v41  ;;  %v7589_v41 = vld [vmem:[%s11480_s9 + $0x140] sm:$0xff] }
0x1d93   :  { %v5418_v47 = vmul.f32 1.442695, %v5416_v17  ;;  %v7590_v17 = vld [vmem:[%s11480_s9 + $0x148] sm:$0xff] }
0x1d94   :  { %v5415_v37 = vpop.xlane.xlu0 %5414 }
0x1d95   :  { %9381 = vpow2.f32 %v5418_v47  ;;  %v5417_v13 = vsub.f32 %v8424_v5, %v5415_v37  ;;  %v8932_v37 = vpack.c.bf16 %v7590_v17, %v7589_v41 }
0x1d96   :  { %v9378_v58 = vpop.eup %9377 }
0x1d97   :  { %v9380_v12 = vpop.eup %9379  ;;  %v5420_v45 = vmul.f32 1.442695, %v5417_v13  ;;  %v5231_v25 = vsel %vm258_vm2, %v9378_v58, 0.0  ;;  %v7592_v13 = vld [vmem:[%s11480_s9 + $0x158] sm:$0xff] }
0x1d98   :  { %5232 = vadd.xlane.f32.xlu1 %v5231_v25  ;;  %v5228_v52 = vsel %vm258_vm2, %v9380_v12, 0.0 }
0x1d99   :  { %9383 = vpow2.f32 %v5420_v45  ;;  %5229 = vadd.xlane.f32.xlu0 %v5228_v52  ;;  %v7593_v45 = vld [vmem:[%s11480_s9 + $0x160] sm:$0xff]  ;;  %v7595_v52 = vld [vmem:[%s11480_s9 + $0x170] sm:$0xff] }
0x1d9f   :  { %v9382_v48 = vpop.eup %9381 }
0x1da0   :  { %v5422_v2 = vsel %vm258_vm2, %v9382_v48, 0.0 }
0x1da1   :  { %5423 = vadd.xlane.f32.xlu0 %v5422_v2 }
0x1da3   :  { %v9384_v19 = vpop.eup %9383 }
0x1da4   :  { %v5425_v50 = vsel %vm258_vm2, %v9384_v19, 0.0 }
0x1da5   :  { %5426 = vadd.xlane.f32.xlu1 %v5425_v50 }
0x1db6   :  { %9209 = vrot.lane.b32.xlu1 %v10687_v54, %s9474_s1  ;;  %v5774_v54 = vsel %vm258_vm2, %v10848_v11, -inf }
0x1db7   :  { %9204 = vrot.lane.b32.xlu0 %v10691_v46, %s9471_s30 }
0x1dba   :  { %5966 = vrot.lane.b32.xlu1 %v10731_v53, %s9472_s24 }
0x1dbe   :  { %5968 = vrot.lane.b32.xlu1 %v10771_v10, %s9472_s24 }
0x1dcf   :  { %v8396_v18 = vpop.f32.mrb[46].mxu0 }
0x1dd0   :  { %v5033_v51 = vpop.f32.mrb[47].mxu0 }
0x1dd1   :  { %8401 = vmatprep.mubr.msk.f32.mxu0 %vm258_vm2, %v5033_v51 }
0x1dd2   :  { %8402 = vmatmul.mubr.msk.f32.vlgmr.msra.gmra.mrb[42].mxu0 %vm258_vm2, %v8396_v18 }
0x1dd3   :  { %8884 = vmatpush3.bf16.msra.mxu0 %v10689_v27 }
0x1dd6   :  { %5775 = vmax.xlane.f32.xlu0 %v5774_v54 }
0x1de2   :  { %5778 = vmax.xlane.f32.xlu1 %v5777_v59 }
0x1e25   :  { %v5233_v53 = vpop.xlane.xlu1 %5232 }
0x1e26   :  { %9385 = vrcp.f32 %v5233_v53  ;;  %v5230_v3 = vpop.xlane.xlu0 %5229 }
0x1e27   :  { %9387 = vrcp.f32 %v5230_v3 }
0x1e2e   :  { %v5424_v10 = vpop.xlane.xlu0 %5423 }
0x1e2f   :  { %9389 = vrcp.f32 %v5424_v10 }
0x1e30   :  { %v9386_v32 = vpop.eup %9385 }
0x1e31   :  { %v9388_v21 = vpop.eup %9387  ;;  %v5237_v27 = vmul.f32 %v9386_v32, %v9378_v58  ;;  %v6354_v32 = vrot.slane %v10630_v35, %v2941_v56 }
0x1e32   :  { %v5427_v60 = vpop.xlane.xlu1 %5426  ;;  %v9205_v36 = vpop.permute.xlu0 %9204  ;;  %v5236_v22 = vmul.f32 %v9388_v21, %v9380_v12  ;;  %v8935_v12 = vpack.c.bf16 %v7592_v13, %v7591_v38 }
0x1e33   :  { %9391 = vrcp.f32 %v5427_v60  ;;  %v9207_v9 = vunpack.i.h.bf16 %v9205_v36  ;;  %v9206_v5 = vunpack.i.l.bf16 %v9205_v36 }
0x1e34   :  { %8415 = vmatprep.mubr.msk.f32.mxu0 %vm258_vm2, %v5236_v22 }
0x1e35   :  { %v8891_v1 = vpack.c.bf16 %v9207_v9, %v9206_v5  ;;  %8416 = vmatmul.mubr.msk.f32.vlgmr.msra.gmra.mrb[48].mxu0 %vm258_vm2, %v5237_v27 }
0x1e36   :  { %v9210_v40 = vpop.permute.xlu1 %9209 }
0x1e37   :  { %v9212_v14 = vunpack.i.h.bf16 %v9210_v40  ;;  %v9211_v26 = vunpack.i.l.bf16 %v9210_v40  ;;  %8892 = vmatprep.subr.bf16.mxu0 %v8891_v1 }
0x1e38   :  { %8894 = vmatpush3.bf16.msra.mxu0 %v8891_v1 }
0x1e39   :  { %v9390_v24 = vpop.eup %9389  ;;  %v8917_v30 = vpack.c.bf16 %v9212_v14, %v9211_v26  ;;  %8896 = vmatprep.subr.bf16.mxu0 %v10742_v15 }
0x1e3a   :  { %v5967_v6 = vpop.permute.xlu1 %5966  ;;  %v5430_v34 = vmul.f32 %v9390_v24, %v9382_v48  ;;  %v7596_v48 = vld [vmem:[%s11480_s9 + $0x178] sm:$0xff] }
0x1e3b   :  { %8919 = vmatprep.subr.msk.bf16.mxu1 %vm9806_vm4, %v8917_v30  ;;  %8471 = vmatprep.mubr.msk.f32.mxu1 %vm258_vm2, %v5967_v6  ;;  %v8941_v2 = vpack.c.bf16 %v7596_v48, %v7595_v52 }
0x1e3c   :  { %8429 = vmatprep.mubr.msk.f32.mxu0 %vm258_vm2, %v5430_v34  ;;  %8922 = vmatpush3.bf16.xpose.msk.msra.mxu1 %vm9806_vm4, %v8917_v30 }
0x1e3d   :  { %v9392_v49 = vpop.eup %9391  ;;  %8931 = vmatprep.subr.bf16.mxu1 %v9465_v0 }
0x1e3e   :  { %v5431_v47 = vmul.f32 %v9392_v49, %v9384_v19  ;;  %v5969_v58 = vpop.permute.xlu1 %5968 }
0x1e40   :  { %8430 = vmatmul.mubr.msk.f32.vlgmr.msra.gmra.mrb[50].mxu0 %vm258_vm2, %v5431_v47 }
0x1e41   :  { %8898 = vmatpush3.bf16.msra.mxu0 %v10742_v15  ;;  %v7594_v15 = vld [vmem:[%s11480_s9 + $0x168] sm:$0xff] }
0x1e42   :  { %8900 = vmatprep.subr.bf16.mxu0 %v10752_v61  ;;  %v8938_v25 = vpack.c.bf16 %v7594_v15, %v7593_v45 }
0x1e43   :  { %8472 = vmatmul.mubr.msk.f32.vlgmr.msra.gmra.mrb[60].mxu1 %vm258_vm2, %v5969_v58 }
0x1e44   :  { %8933 = vmatpush3.bf16.msra.mxu1 %v8932_v37  ;;  %8504 = vmatprep.mubr.msk.f32.mxu1 %vm9466_vm0, %v9467_v4 }
0x1e45   :  { %8934 = vmatprep.subr.bf16.mxu1 %v9465_v0 }
0x1e48   :  { %8936 = vmatpush3.bf16.msra.mxu1 %v8935_v12 }
0x1e49   :  { %8937 = vmatprep.subr.bf16.mxu1 %v9465_v0 }
0x1e4c   :  { %8939 = vmatpush3.bf16.msra.mxu1 %v8938_v25 }
0x1e4d   :  { %8940 = vmatprep.subr.bf16.mxu1 %v9465_v0 }
0x1e50   :  { %8942 = vmatpush3.bf16.msra.mxu1 %v8941_v2 }
0x1e51   :  { %8955 = vmatprep.subr.bf16.mxu1 %v9465_v0 }
0x1e53   :  { %8505 = vmatmul.mubr.msk.f32.vlgmr.msra.gmra.mrb[62].mxu1 %vm371_vm3, %v10070_v23 }
0x1e54   :  { %8542 = vmatprep.mubr.msk.f32.mxu1 %vm9466_vm0, %v9467_v4 }
0x1e63   :  { %v5776_v19 = vpop.xlane.xlu0 %5775 }
0x1e64   :  { %v5780_v50 = vsub.f32 %v10848_v11, %v5776_v19  ;;  %v7599_v11 = vld [vmem:[%s11483_s3 + $0x1] ss:$0 sm:$0xff] }
0x1e66   :  { %v5782_v54 = vmul.f32 1.442695, %v5780_v50 }
0x1e6f   :  { %v5779_v18 = vpop.xlane.xlu1 %5778 }
0x1e70   :  { %v5781_v51 = vsub.f32 %v10846_v63, %v5779_v18  ;;  %v6350_v63 = vmul.f32 %v7599_v11, %v10105_v62 }
0x1e72   :  { %v5784_v59 = vmul.f32 1.442695, %v5781_v51  ;;  %v6355_v21 = vadd.f32 %v6354_v32, %v6350_v63 }
0x1e74   :  { %9393 = vpow2.f32 %v5784_v59  ;;  %v6356_v60 = vsel %vm2944_vm5, %v6355_v21, 0.0 }
0x1e75   :  { %9395 = vpow2.f32 %v5782_v54 }
0x1e7e   :  { %v9394_v53 = vpop.eup %9393 }
0x1e7f   :  { %v5789_v3 = vsel %vm258_vm2, %v9394_v53, 0.0  ;;  %v9396_v10 = vpop.eup %9395 }
0x1e80   :  { %5790 = vadd.xlane.f32.xlu0 %v5789_v3  ;;  %v5786_v23 = vsel %vm258_vm2, %v9396_v10, 0.0 }
0x1e84   :  { %5787 = vadd.xlane.f32.xlu0 %v5786_v23 }
0x1e9a   :  { %9214 = vrot.lane.b32.xlu0 %v10691_v46, %s9470_s19 }
0x1eb9   :  { %6357 = vadd.xlane.f32.xlu0 %v6356_v60  ;;  %v7610_v60 = vld [vmem:[%s11480_s9 + $0x1c8] sm:$0xff] }
0x1f08   :  { %v8417_v36 = vpop.f32.mrb[48].mxu0 }
0x1f09   :  { %v5310_v22 = vpop.f32.mrb[49].mxu0 }
0x1f0d   :  { %v5791_v27 = vpop.xlane.xlu0 %5790 }
0x1f11   :  { %v5788_v9 = vpop.xlane.xlu0 %5787 }
0x1f12   :  { %9397 = vrcp.f32 %v5788_v9  ;;  %v7613_v9 = vld [vmem:[%s11480_s9 + $0x1e0] sm:$0xff] }
0x1f13   :  { %9399 = vrcp.f32 %v5791_v27  ;;  %v8431_v5 = vpop.f32.mrb[50].mxu0  ;;  %v7612_v27 = vld [vmem:[%s11480_s9 + $0x1d8] sm:$0xff] }
0x1f14   :  { %v5512_v1 = vpop.f32.mrb[51].mxu0 }
0x1f15   :  { %v9215_v40 = vpop.permute.xlu0 %9214  ;;  %8436 = vmatprep.mubr.msk.f32.mxu0 %vm258_vm2, %v5512_v1 }
0x1f16   :  { %v9217_v62 = vunpack.i.h.bf16 %v9215_v40  ;;  %v9216_v14 = vunpack.i.l.bf16 %v9215_v40  ;;  %8437 = vmatmul.mubr.msk.f32.vlgmr.msra.gmra.mrb[52].mxu0 %vm258_vm2, %v8431_v5  ;;  %v8473_v56 = vpop.f32.mrb[60].mxu1  ;;  %v7614_v5 = vld [vmem:[%s11480_s9 + $0x1e8] sm:$0xff] }
0x1f17   :  { %8443 = vmatprep.mubr.msk.f32.mxu0 %vm258_vm2, %v5310_v22  ;;  %v6048_v35 = vpop.f32.mrb[61].mxu1  ;;  %8902 = vmatpush3.bf16.msra.mxu0 %v10752_v61  ;;  %v6060_v6 = vsel %vm258_vm2, %v8473_v56, -inf  ;;  %v8962_v1 = vpack.c.bf16 %v7614_v5, %v7613_v9 }
0x1f18   :  { %v8909_v26 = vpack.c.bf16 %v9217_v62, %v9216_v14  ;;  %v6057_v24 = vsel %vm258_vm2, %v6048_v35, -inf }
0x1f19   :  { %6058 = vmax.xlane.f32.xlu1 %v6057_v24 }
0x1f1a   :  { %8910 = vmatprep.subr.bf16.mxu0 %v8909_v26 }
0x1f1c   :  { %v9398_v30 = vpop.eup %9397 }
0x1f1d   :  { %v9400_v34 = vpop.eup %9399  ;;  %6061 = vmax.xlane.f32.xlu1 %v6060_v6  ;;  %v5794_v49 = vmul.f32 %v9398_v30, %v9396_v10  ;;  %v7602_v6 = vld [vmem:[%s11480_s9 + $0x190] sm:$0xff] }
0x1f1e   :  { %8444 = vmatmul.mubr.msk.f32.vlgmr.msra.gmra.mrb[52].mxu0 %vm258_vm2, %v8417_v36  ;;  %v5795_v41 = vmul.f32 %v9400_v34, %v9394_v53  ;;  %v7611_v36 = vld [vmem:[%s11480_s9 + $0x1d0] sm:$0xff]  ;;  %v7603_v34 = vld [vmem:[%s11480_s9 + $0x198] sm:$0xff] }
0x1f1f   :  { %8912 = vmatpush3.bf16.msra.mxu0 %v8909_v26  ;;  %8457 = vmatprep.mubr.msk.f32.mxu0 %vm258_vm2, %v5794_v49  ;;  %v8947_v49 = vpack.c.bf16 %v7603_v34, %v7602_v6 }
0x1f20   :  { %8914 = vmatprep.subr.bf16.mxu0 %v10820_v43 }
0x1f22   :  { %8458 = vmatmul.mubr.msk.f32.vlgmr.msra.gmra.mrb[54].mxu0 %vm258_vm2, %v5795_v41  ;;  %v7604_v41 = vld [vmem:[%s11480_s9 + $0x1a0] sm:$0xff] }
0x1f23   :  { %8916 = vmatpush3.bf16.msra.mxu0 %v10820_v43 }
0x1f26   :  { %v10942_v61 = vpop.f32.mrb[62].mxu1 }
0x1f27   :  { %v8506_v17 = vpop.f32.mrb[63].mxu1 }
0x1f28   :  { %v7605_v17 = vld [vmem:[%s11480_s9 + $0x1a8] sm:$0xff] }
0x1f46   :  { %v6358_v43 = vpop.xlane.xlu0 %6357 }
0x1f47   :  { %v6359_v48 = vmul.f32 0.015625, %v6358_v43 }
0x1f49   :  { %v10948_v2 = vsub.f32 %v6355_v21, %v6359_v48  ;;  %v7609_v21 = vld [vmem:[%s11480_s9 + $0x1c0] sm:$0xff] }
0x1f4a   :  { %v8956_v22 = vpack.c.bf16 %v7610_v60, %v7609_v21  ;;  %v9461_v48 = vld [vmem:[%s11484_s11] sm:$0xff] }
0x1f4b   :  { %v6361_v19 = vmul.f32 %v10948_v2, %v10948_v2 }
0x1f4c   :  { %8957 = vmatpush3.bf16.msra.mxu1 %v8956_v22 }
0x1f4d   :  { %v6362_v50 = vsel %vm2944_vm5, %v6361_v19, 0.0  ;;  %8958 = vmatprep.subr.bf16.mxu1 %v9465_v0 }
0x1fa6   :  { %v6059_v47 = vpop.xlane.xlu1 %6058 }
0x1fa7   :  { %v6063_v37 = vsub.f32 %v6048_v35, %v6059_v47  ;;  %v7601_v35 = vld [vmem:[%s11480_s9 + $0x188] sm:$0xff] }
0x1fa9   :  { %v6065_v58 = vmul.f32 1.442695, %v6063_v37  ;;  %v8950_v37 = vpack.c.bf16 %v7605_v17, %v7604_v41 }
0x1faa   :  { %v6062_v38 = vpop.xlane.xlu1 %6061 }
0x1fab   :  { %v6064_v13 = vsub.f32 %v8473_v56, %v6062_v38  ;;  %v7600_v56 = vld [vmem:[%s11480_s9 + $0x180] sm:$0xff] }
0x1fac   :  { %v8944_v24 = vpack.c.bf16 %v7601_v35, %v7600_v56 }
0x1fad   :  { %v6067_v12 = vmul.f32 1.442695, %v6064_v13  ;;  %v7606_v13 = vld [vmem:[%s11480_s9 + $0x1b0] sm:$0xff] }
0x1faf   :  { %9401 = vpow2.f32 %v6067_v12  ;;  %v9460_v12 = vld [vmem:[%s11478_s10 + $0x10] sm:$0xff] }
0x1fb0   :  { %9403 = vpow2.f32 %v6065_v58  ;;  %v7607_v58 = vld [vmem:[%s11480_s9 + $0x1b8] sm:$0xff] }
0x1fb9   :  { %v9402_v45 = vpop.eup %9401 }
0x1fba   :  { %v6072_v15 = vsel %vm258_vm2, %v9402_v45, 0.0  ;;  %v9404_v25 = vpop.eup %9403 }
0x1fbb   :  { %6073 = vadd.xlane.f32.xlu1 %v6072_v15  ;;  %v6069_v52 = vsel %vm258_vm2, %v9404_v25, 0.0  ;;  %v8953_v15 = vpack.c.bf16 %v7607_v58, %v7606_v13 }
0x1fbf   :  { %6070 = vadd.xlane.f32.xlu1 %v6069_v52  ;;  %v6377_v52 = vrot.slane %v9460_v12, %v2965_v20  ;;  %v6391_v20 = vrot.slane %v9460_v12, %v2979_v39 }
0x1fd0   :  { %9219 = vrot.lane.b32.xlu1 %v10691_v46, %s9472_s24 }
0x1ff4   :  { %6363 = vadd.xlane.f32.xlu1 %v6362_v50 }
0x1ff5   :  { %v8459_v18 = vpop.f32.mrb[54].mxu0 }
0x1ff6   :  { %v5874_v51 = vpop.f32.mrb[55].mxu0 }
0x1ff7   :  { %8464 = vmatprep.mubr.msk.f32.mxu0 %vm258_vm2, %v5874_v51  ;;  %v6335_v51 = vrot.slane %v9460_v12, %v10211_v28 }
0x1ff8   :  { %8465 = vmatmul.mubr.msk.f32.vlgmr.msra.gmra.mrb[52].mxu0 %vm258_vm2, %v8459_v18 }
0x2048   :  { %v6074_v54 = vpop.xlane.xlu1 %6073 }
0x2049   :  { %9405 = vrcp.f32 %v6074_v54  ;;  %v6336_v54 = vadd.f32 %v6335_v51, %v10942_v61  ;;  %v9462_v61 = vld [vmem:[%s11484_s11 + $0x8] sm:$0xff] }
0x204c   :  { %v6071_v59 = vpop.xlane.xlu1 %6070 }
0x204d   :  { %9407 = vrcp.f32 %v6071_v59  ;;  %v6340_v59 = vrot.slane %v9460_v12, %v10216_v44 }
0x2050   :  { %v9220_v46 = vpop.permute.xlu1 %9219 }
0x2051   :  { %v9222_v53 = vunpack.i.h.bf16 %v9220_v46  ;;  %v9221_v3 = vunpack.i.l.bf16 %v9220_v46  ;;  %v11040_v46 = vld [vmem:[%s11478_s10 + $0x18] sm:$0xf] }
0x2052   :  { %v6551_v29 = vrot.slane %v11040_v46, %v9761_v31 }
0x2053   :  { %v8923_v10 = vpack.c.bf16 %v9222_v53, %v9221_v3  ;;  %v9406_v23 = vpop.eup %9405  ;;  %v6341_v53 = vadd.f32 %v6340_v59, %v6336_v54  ;;  %v7631_v54 = vld [vmem:[%s11485_s5 + $0xc0] sm:$0xff]  ;;  %v7633_v59 = vld [vmem:[%s11485_s5 + $0xd0] sm:$0xff] }
0x2054   :  { %v6078_v32 = vmul.f32 %v9406_v23, %v9402_v45  ;;  %v6372_v45 = vrot.slane %v9460_v12, %v2960_v16  ;;  %v7615_v16 = vld [vmem:[%s11480_s9 + $0x1f0] sm:$0xff]  ;;  %v7624_v12 = vld [vmem:[%s11485_s5 + $0x88] sm:$0xff] }
0x2055   :  { %8924 = vmatprep.subr.bf16.mxu0 %v8923_v10 }
0x2056   :  { %8926 = vmatpush3.bf16.msra.mxu0 %v8923_v10 }
0x2057   :  { %v9408_v11 = vpop.eup %9407  ;;  %8928 = vmatprep.subr.bf16.mxu0 %v10832_v55 }
0x2058   :  { %v6077_v63 = vmul.f32 %v9408_v11, %v9404_v25  ;;  %v9463_v11 = vld [vmem:[%s11484_s11 + $0x10] sm:$0xff] }
0x205a   :  { %8478 = vmatprep.mubr.msk.f32.mxu0 %vm258_vm2, %v6077_v63  ;;  %v9464_v63 = vld [vmem:[%s11484_s11 + $0x18] sm:$0xff] }
0x205b   :  { %8479 = vmatmul.mubr.msk.f32.vlgmr.msra.gmra.mrb[56].mxu0 %vm258_vm2, %v6078_v32 }
0x205c   :  { %8930 = vmatpush3.bf16.msra.mxu0 %v10832_v55  ;;  %v8959_v55 = vpack.c.bf16 %v7612_v27, %v7611_v36 }
0x205d   :  { %8943 = vmatprep.subr.bf16.mxu0 %v9465_v0 }
0x205e   :  { %8960 = vmatpush3.bf16.msra.mxu1 %v8959_v55 }
0x205f   :  { %8961 = vmatprep.subr.bf16.mxu1 %v9465_v0 }
0x2062   :  { %8963 = vmatpush3.bf16.msra.mxu1 %v8962_v1 }
0x2063   :  { %8964 = vmatprep.subr.bf16.mxu1 %v9465_v0 }
0x2081   :  { %v6364_v40 = vpop.xlane.xlu1 %6363 }
0x2082   :  { %v6365_v62 = vmul.f32 0.015625, %v6364_v40 }
0x2084   :  { %v6366_v14 = vadd.f32 1e-05, %v6365_v62 }
0x2086   :  { %9409 = vrsqrt.f32 %v6366_v14 }
0x2090   :  { %v9410_v47 = vpop.eup %9409 }
0x2091   :  { %v6368_v38 = vmul.f32 %v9410_v47, %v10948_v2 }
0x2093   :  { %v6373_v25 = vmul.f32 %v6372_v45, %v6368_v38  ;;  %v7626_v45 = vld [vmem:[%s11485_s5 + $0x98] sm:$0xff] }
0x2095   :  { %v6378_v43 = vadd.f32 %v6377_v52, %v6373_v25  ;;  %v7623_v25 = vld [vmem:[%s11485_s5 + $0x80] sm:$0xff]  ;;  %v7625_v52 = vld [vmem:[%s11485_s5 + $0x90] sm:$0xff] }
0x212e   :  { %v8480_v26 = vpop.f32.mrb[56].mxu0 }
0x212f   :  { %v6157_v30 = vpop.f32.mrb[57].mxu0 }
0x2130   :  { %8485 = vmatprep.mubr.msk.f32.mxu0 %vm258_vm2, %v6157_v30 }
0x2131   :  { %8486 = vmatmul.mubr.msk.f32.vlgmr.msra.gmra.mrb[52].mxu0 %vm258_vm2, %v8480_v26 }
0x2132   :  { %8945 = vmatpush3.bf16.msra.mxu0 %v8944_v24  ;;  %8523 = vmatprep.mubr.msk.f32.mxu0 %vm9466_vm0, %v9467_v4 }
0x2133   :  { %8946 = vmatprep.subr.bf16.mxu0 %v9465_v0 }
0x2136   :  { %8948 = vmatpush3.bf16.msra.mxu0 %v8947_v49 }
0x2137   :  { %8949 = vmatprep.subr.bf16.mxu0 %v9465_v0 }
0x213a   :  { %8951 = vmatpush3.bf16.msra.mxu0 %v8950_v37 }
0x213b   :  { %8952 = vmatprep.subr.bf16.mxu0 %v9465_v0  ;;  %v7616_v0 = vld [vmem:[%s11480_s9 + $0x1f8] sm:$0xff] }
0x213c   :  { %v8965_v2 = vpack.c.bf16 %v7616_v0, %v7615_v16  ;;  %v7630_v16 = vld [vmem:[%s11485_s5 + $0xb8] sm:$0xff] }
0x213e   :  { %8954 = vmatpush3.bf16.msra.mxu0 %v8953_v15  ;;  %8966 = vmatpush3.bf16.msra.mxu1 %v8965_v2  ;;  %v8967_v15 = vpack.c.bf16 %v7626_v45, %v7624_v12  ;;  %v7627_v2 = vld [vmem:[%s11485_s5 + $0xa0] sm:$0xff]  ;;  %v7661_v45 = vld [vmem:[%s11486_s6 + $0x188] sm:$0xff] }
0x2141   :  { %8524 = vmatmul.mubr.msk.f32.vlgmr.msra.gmra.mrb[58].mxu0 %vm371_vm3, %v6378_v43  ;;  %v8969_v43 = vpack.c.bf16 %v7625_v52, %v7623_v25  ;;  %v7662_v52 = vld [vmem:[%s11486_s6 + $0x190] sm:$0xff] }
0x2142   :  { %8547 = vmatprep.mubr.msk.f32.mxu0 %vm3142_vm6, %v9461_v48  ;;  %v7628_v48 = vld [vmem:[%s11485_s5 + $0xa8] sm:$0xff] }
0x2143   :  { %v8971_v0 = vpack.c.bf16 %v7630_v16, %v7628_v48  ;;  %v7646_v16 = vld [vmem:[%s11486_s6 + $0x110] sm:$0xff] }
0x2214   :  { %v6461_v19 = vpop.f32.mrb[58].mxu0 }
0x2215   :  { %v6462_v50 = vadd.f32 %v6461_v19, %v6391_v20  ;;  %v8525_v18 = vpop.f32.mrb[59].mxu0  ;;  %v7629_v20 = vld [vmem:[%s11485_s5 + $0xb0] sm:$0xff] }
0x2216   :  { %v8973_v19 = vpack.c.bf16 %v7629_v20, %v7627_v2  ;;  %v7634_v18 = vld [vmem:[%s11485_s5 + $0xd8] sm:$0xff]  ;;  %v7664_v20 = vld [vmem:[%s11486_s6 + $0x1a0] sm:$0xff] }
0x2217   :  { %8543 = vmatmul.mubr.msk.f32.vlgmr.msra.gmra.mrb[64].mxu1 %vm371_vm3, %v6462_v50  ;;  %v7632_v50 = vld [vmem:[%s11485_s5 + $0xc8] sm:$0xff] }
0x2218   :  { %v8975_v51 = vpack.c.bf16 %v7634_v18, %v7632_v50  ;;  %v7648_v18 = vld [vmem:[%s11486_s6 + $0x120] sm:$0xff] }
0x22ea   :  { %v6543_v39 = vpop.f32.mrb[64].mxu1 }
0x22eb   :  { %v6547_v3 = vadd.f32 %v6543_v39, %v6341_v53  ;;  %v8544_v10 = vpop.f32.mrb[65].mxu1  ;;  %v8977_v53 = vpack.c.bf16 %v7633_v59, %v7631_v54  ;;  %v7638_v39 = vld [vmem:[%s11485_s5 + $0xf8] sm:$0xff]  ;;  %v7666_v59 = vld [vmem:[%s11486_s6 + $0x1b0] sm:$0xff] }
0x22ec   :  { %v7635_v10 = vld [vmem:[%s11485_s5 + $0xe0] sm:$0xff] }
0x22ed   :  { %v6552_v23 = vadd.f32 %v6551_v29, %v6547_v3  ;;  %v7636_v29 = vld [vmem:[%s11485_s5 + $0xe8] sm:$0xff] }
0x22ee   :  { %v8979_v3 = vpack.c.bf16 %v7638_v39, %v7636_v29  ;;  %v7650_v39 = vld [vmem:[%s11486_s6 + $0x130] sm:$0xff] }
0x22ef   :  { %8545 = vmatprep.subr.msk.mxu0 %vm3155_vm7, %v6552_v23 }
0x22f0   :  { %8546 = vmatpush3.msk.msra.mxu0 %vm3155_vm7, %v6552_v23  ;;  %v7637_v23 = vld [vmem:[%s11485_s5 + $0xf0] sm:$0xff] }
0x22f1   :  { %8548 = vmatmul.mubr.msk.f32.vlgmr.msra.gmra.mrb[42].mxu0 %vm3142_vm6, %v9462_v61  ;;  %8968 = vmatprep.subr.bf16.mxu0 %v8967_v15  ;;  %v8981_v61 = vpack.c.bf16 %v7637_v23, %v7635_v10  ;;  %v7668_v23 = vld [vmem:[%s11486_s6 + $0x1c0] sm:$0xff] }
0x22f2   :  { %8550 = vmatprep.mubr.msk.f32.mxu0 %vm3142_vm6, %v9463_v11  ;;  %8970 = vmatpush1.bf16.msra.mxu0 %v8969_v43  ;;  %v7663_v43 = vld [vmem:[%s11486_s6 + $0x198] sm:$0xff] }
0x22f3   :  { %8972 = vmatprep.subr.bf16.mxu0 %v8971_v0  ;;  %v8987_v48 = vpack.c.bf16 %v7663_v43, %v7662_v52  ;;  %v7647_v0 = vld [vmem:[%s11486_s6 + $0x118] sm:$0xff] }
0x22f4   :  { %v8989_v2 = vpack.c.bf16 %v7647_v0, %v7646_v16 }
0x22f5   :  { %8551 = vmatmul.mubr.msk.f32.gmra.mrb[52].mxu0 %vm3142_vm6, %v9464_v63 }
0x22f6   :  { %6819 = vmatprep.mubr.f32.mxu0 %v9467_v4  ;;  %8974 = vmatpush1.bf16.msra.mxu0 %v8973_v19  ;;  %v7665_v19 = vld [vmem:[%s11486_s6 + $0x1a8] sm:$0xff] }
0x22f7   :  { %8976 = vmatprep.subr.bf16.mxu0 %v8975_v51  ;;  %v8991_v50 = vpack.c.bf16 %v7665_v19, %v7664_v20  ;;  %v7649_v51 = vld [vmem:[%s11486_s6 + $0x128] sm:$0xff] }
0x22f8   :  { %v8993_v54 = vpack.c.bf16 %v7649_v51, %v7648_v18 }
0x22fa   :  { %8978 = vmatpush1.bf16.msra.mxu0 %v8977_v53  ;;  %v7667_v53 = vld [vmem:[%s11486_s6 + $0x1b8] sm:$0xff] }
0x22fb   :  { %8980 = vmatprep.subr.bf16.mxu0 %v8979_v3  ;;  %v8995_v29 = vpack.c.bf16 %v7667_v53, %v7666_v59  ;;  %v7651_v3 = vld [vmem:[%s11486_s6 + $0x138] sm:$0xff] }
0x22fc   :  { %v8997_v10 = vpack.c.bf16 %v7651_v3, %v7650_v39 }
0x22fe   :  { %8982 = vmatpush1.bf16.msra.mxu0 %v8981_v61  ;;  %v7669_v61 = vld [vmem:[%s11486_s6 + $0x1c8] sm:$0xff] }
0x23c4   :  { %v8549_v32 = vpop.f32.mrb[42].mxu0 }
0x23c5   :  { %v6622_v21 = vpop.f32.mrb[43].mxu0  ;;  %v11063_v36 = vadd.f32 %v8549_v32, %v10550_v7 }
0x23c6   :  { %v11060_v60 = vadd.f32 %v6622_v21, %v10545_v42 }
0x23c7   :  { %v6648_v5 = vsel %vm371_vm3, %v11063_v36, 0.0 }
0x23c8   :  { %v8552_v22 = vpop.f32.mrb[52].mxu0  ;;  %v6645_v27 = vsel %vm371_vm3, %v11060_v60, 0.0 }
0x23c9   :  { %6646 = vadd.xlane.f32.xlu0 %v6645_v27  ;;  %v6632_v55 = vpop.f32.mrb[53].mxu0  ;;  %v11073_v1 = vadd.f32 %v8552_v22, %v10572_v57 }
0x23ca   :  { %v11068_v9 = vadd.f32 %v6632_v55, %v10564_v8 }
0x23cb   :  { %v6654_v7 = vsel %vm371_vm3, %v11073_v1, 0.0 }
0x23cc   :  { %v6651_v42 = vsel %vm371_vm3, %v11068_v9, 0.0 }
0x23cd   :  { %6649 = vadd.xlane.f32.xlu0 %v6648_v5 }
0x23d1   :  { %6652 = vadd.xlane.f32.xlu0 %v6651_v42 }
0x23d5   :  { %6655 = vadd.xlane.f32.xlu0 %v6654_v7 }
0x2456   :  { %v6647_v40 = vpop.xlane.xlu0 %6646 }
0x2457   :  { %v6657_v62 = vmul.f32 0.015625, %v6647_v40 }
0x2459   :  { %v11080_v8 = vsub.f32 %v11060_v60, %v6657_v62  ;;  %v6700_v62 = vrot.slane %v11040_v46, %v9767_v33 }
0x245a   :  { %v6650_v14 = vpop.xlane.xlu0 %6649 }
0x245b   :  { %v6658_v56 = vmul.f32 0.015625, %v6650_v14  ;;  %v6665_v35 = vmul.f32 %v11080_v8, %v11080_v8 }
0x245d   :  { %v11085_v57 = vsub.f32 %v11063_v36, %v6658_v56  ;;  %v6669_v26 = vsel %vm371_vm3, %v6665_v35, 0.0  ;;  %v6708_v35 = vrot.slane %v11040_v46, %v10211_v28 }
0x245e   :  { %6670 = vadd.xlane.f32.xlu0 %v6669_v26  ;;  %v6653_v24 = vpop.xlane.xlu0 %6652 }
0x245f   :  { %v6659_v30 = vmul.f32 0.015625, %v6653_v24  ;;  %v6666_v6 = vmul.f32 %v11085_v57, %v11085_v57 }
0x2461   :  { %v11091_v34 = vsub.f32 %v11068_v9, %v6659_v30  ;;  %v6672_v49 = vsel %vm371_vm3, %v6666_v6, 0.0 }
0x2462   :  { %6673 = vadd.xlane.f32.xlu1 %v6672_v49  ;;  %v6656_v41 = vpop.xlane.xlu0 %6655 }
0x2463   :  { %v6660_v17 = vmul.f32 0.015625, %v6656_v41  ;;  %v6667_v47 = vmul.f32 %v11091_v34, %v11091_v34 }
0x2465   :  { %v11097_v37 = vsub.f32 %v11073_v1, %v6660_v17  ;;  %v6675_v38 = vsel %vm371_vm3, %v6667_v47, 0.0 }
0x2466   :  { %6676 = vadd.xlane.f32.xlu0 %v6675_v38 }
0x2467   :  { %v6668_v13 = vmul.f32 %v11097_v37, %v11097_v37 }
0x2469   :  { %v6678_v58 = vsel %vm371_vm3, %v6668_v13, 0.0 }
0x246a   :  { %6679 = vadd.xlane.f32.xlu1 %v6678_v58 }
0x24eb   :  { %v6671_v11 = vpop.xlane.xlu0 %6670 }
0x24ec   :  { %v6681_v63 = vmul.f32 0.015625, %v6671_v11  ;;  %v8999_v11 = vpack.c.bf16 %v7669_v61, %v7668_v23 }
0x24ee   :  { %v6685_v32 = vadd.f32 1e-05, %v6681_v63  ;;  %v7652_v63 = vld [vmem:[%s11486_s6 + $0x140] sm:$0xff] }
0x24ef   :  { %v6674_v21 = vpop.xlane.xlu1 %6673 }
0x24f0   :  { %9411 = vrsqrt.f32 %v6685_v32  ;;  %v6682_v22 = vmul.f32 0.015625, %v6674_v21  ;;  %v7653_v32 = vld [vmem:[%s11486_s6 + $0x148] sm:$0xff] }
0x24f1   :  { %v9001_v21 = vpack.c.bf16 %v7653_v32, %v7652_v63 }
0x24f2   :  { %v6686_v27 = vadd.f32 1e-05, %v6682_v22  ;;  %v7670_v22 = vld [vmem:[%s11486_s6 + $0x1d0] sm:$0xff] }
0x24f3   :  { %v6677_v55 = vpop.xlane.xlu0 %6676 }
0x24f4   :  { %9413 = vrsqrt.f32 %v6686_v27  ;;  %v6683_v5 = vmul.f32 0.015625, %v6677_v55  ;;  %v7671_v27 = vld [vmem:[%s11486_s6 + $0x1d8] sm:$0xff] }
0x24f5   :  { %v9003_v55 = vpack.c.bf16 %v7671_v27, %v7670_v22 }
0x24f6   :  { %v6687_v42 = vadd.f32 1e-05, %v6683_v5  ;;  %v7654_v5 = vld [vmem:[%s11486_s6 + $0x150] sm:$0xff] }
0x24f7   :  { %v6680_v7 = vpop.xlane.xlu1 %6679 }
0x24f8   :  { %9415 = vrsqrt.f32 %v6687_v42  ;;  %v6684_v40 = vmul.f32 0.015625, %v6680_v7  ;;  %v7655_v42 = vld [vmem:[%s11486_s6 + $0x158] sm:$0xff] }
0x24f9   :  { %v9005_v7 = vpack.c.bf16 %v7655_v42, %v7654_v5 }
0x24fa   :  { %v9412_v14 = vpop.eup %9411  ;;  %v6688_v56 = vadd.f32 1e-05, %v6684_v40  ;;  %v7672_v40 = vld [vmem:[%s11486_s6 + $0x1e0] sm:$0xff] }
0x24fb   :  { %v6693_v26 = vmul.f32 %v9412_v14, %v11080_v8  ;;  %v7656_v14 = vld [vmem:[%s11486_s6 + $0x160] sm:$0xff] }
0x24fc   :  { %9417 = vrsqrt.f32 %v6688_v56 }
0x24fd   :  { %v6701_v24 = vmul.f32 %v6700_v62, %v6693_v26  ;;  %v7674_v26 = vld [vmem:[%s11486_s6 + $0x1f0] sm:$0xff] }
0x24fe   :  { %v9414_v30 = vpop.eup %9413 }
0x24ff   :  { %v6709_v6 = vadd.f32 %v6708_v35, %v6701_v24  ;;  %v6694_v49 = vmul.f32 %v9414_v30, %v11085_v57  ;;  %v7675_v24 = vld [vmem:[%s11486_s6 + $0x1f8] sm:$0xff] }
0x2501   :  { %7640 = vmatmul.mubr.msk.f32.vlgmr.msra.gmra.mrb[60].mxu0 %vm371_vm3, %v6709_v6  ;;  %v6702_v41 = vmul.f32 %v6700_v62, %v6694_v49  ;;  %v9011_v6 = vpack.c.bf16 %v7675_v24, %v7674_v26  ;;  %v7658_v49 = vld [vmem:[%s11486_s6 + $0x170] sm:$0xff] }
0x2502   :  { %v9416_v17 = vpop.eup %9415  ;;  %6825 = vmatprep.mubr.f32.mxu0 %v9467_v4 }
0x2503   :  { %v6710_v47 = vadd.f32 %v6708_v35, %v6702_v41  ;;  %v6695_v38 = vmul.f32 %v9416_v17, %v11091_v34  ;;  %v7660_v34 = vld [vmem:[%s11486_s6 + $0x180] sm:$0xff]  ;;  %v7659_v41 = vld [vmem:[%s11486_s6 + $0x178] sm:$0xff] }
0x2504   :  { %v8983_v15 = vpack.c.bf16 %v7661_v45, %v7660_v34  ;;  %v9013_v17 = vpack.c.bf16 %v7659_v41, %v7658_v49 }
0x2505   :  { %7641 = vmatmul.mubr.msk.f32.gmra.mrb[62].mxu0 %vm371_vm3, %v6710_v47  ;;  %v6703_v28 = vmul.f32 %v6700_v62, %v6695_v38  ;;  %v7639_v47 = vld [vmem:[%s11487_s4 + $0x2] sm:$0x3] }
0x2506   :  { %v9418_v13 = vpop.eup %9417  ;;  %6831 = vmatprep.mubr.f32.mxu0 %v9467_v4  ;;  %8984 = vmatprep.subr.bf16.mxu1 %v8983_v15  ;;  %v6736_v38 = vrot.slane %v7639_v47, %v9761_v31 }
0x2507   :  { %v6711_v8 = vadd.f32 %v6708_v35, %v6703_v28  ;;  %v6696_v58 = vmul.f32 %v9418_v13, %v11097_v37  ;;  %v7644_v37 = vld [vmem:[%s11486_s6 + $0x100] sm:$0xff]  ;;  %v6740_v28 = vrot.slane %v7639_v47, %v9767_v33 }
0x2509   :  { %7642 = vmatmul.mubr.msk.f32.gmra.mrb[64].mxu0 %vm371_vm3, %v6711_v8  ;;  %v6704_v57 = vmul.f32 %v6700_v62, %v6696_v58  ;;  %v7673_v62 = vld [vmem:[%s11486_s6 + $0x1e8] sm:$0xff] }
0x250a   :  { %6837 = vmatprep.mubr.f32.mxu0 %v9467_v4  ;;  %v7645_v4 = vld [vmem:[%s11486_s6 + $0x108] sm:$0xff]  ;;  %v9007_v56 = vpack.c.bf16 %v7673_v62, %v7672_v40 }
0x250b   :  { %v6712_v12 = vadd.f32 %v6708_v35, %v6704_v57  ;;  %v8985_v25 = vpack.c.bf16 %v7645_v4, %v7644_v37  ;;  %v7657_v35 = vld [vmem:[%s11486_s6 + $0x168] sm:$0xff] }
0x250c   :  { %v9009_v30 = vpack.c.bf16 %v7657_v35, %v7656_v14 }
0x250d   :  { %7643 = vmatmul.mubr.msk.f32.gmra.mrb[66].mxu0 %vm371_vm3, %v6712_v12  ;;  %8986 = vmatpush3.bf16.msra.mxu1 %v8985_v25 }
0x250e   :  { %8988 = vmatprep.subr.bf16.mxu1 %v8987_v48 }
0x2511   :  { %8990 = vmatpush3.bf16.msra.mxu1 %v8989_v2 }
0x2512   :  { %8992 = vmatprep.subr.bf16.mxu1 %v8991_v50 }
0x2515   :  { %8994 = vmatpush3.bf16.msra.mxu1 %v8993_v54 }
0x2516   :  { %8996 = vmatprep.subr.bf16.mxu1 %v8995_v29 }
0x2519   :  { %8998 = vmatpush3.bf16.msra.mxu1 %v8997_v10 }
0x251a   :  { %9000 = vmatprep.subr.bf16.mxu1 %v8999_v11 }
0x251d   :  { %9002 = vmatpush3.bf16.msra.mxu1 %v9001_v21 }
0x251e   :  { %9004 = vmatprep.subr.bf16.mxu1 %v9003_v55 }
0x2521   :  { %9006 = vmatpush3.bf16.msra.mxu1 %v9005_v7 }
0x2522   :  { %9008 = vmatprep.subr.bf16.mxu1 %v9007_v56 }
0x2525   :  { %9010 = vmatpush3.bf16.msra.mxu1 %v9009_v30 }
0x2526   :  { %9012 = vmatprep.subr.bf16.mxu1 %v9011_v6 }
0x2529   :  { %9014 = vmatpush3.bf16.msra.mxu1 %v9013_v17 }
0x25d4   :  { %v6821_v13 = vpop.f32.mrb[60].mxu0 }
0x25d5   :  { %v11267_v8 = vadd.f32 %v6821_v13, %v6736_v38  ;;  %v6823_v58 = vpop.f32.mrb[61].mxu0 }
0x25d6   :  { %v11269_v57 = vadd.f32 %v6823_v58, %v6740_v28 }
0x25d7   :  { %v11272_v12 = vmul.f32 0.70710677, %v11267_v8 }
0x25d8   :  { %v11275_v34 = vmul.f32 0.70710677, %v11269_v57  ;;  %v6827_v45 = vpop.f32.mrb[62].mxu0 }
0x25d9   :  { %v6860_v15 = vand.u32 2147483647, %v11272_v12  ;;  %v11278_v37 = vadd.f32 %v6827_v45, %v6736_v38  ;;  %v6829_v31 = vpop.f32.mrb[63].mxu0  ;;  %v11323_v45 = vmul.f32 0.5, %v11267_v8  ;;  %vm7020_vm0 = vcmp.lt.f32.partialorder %v11272_v12, 0.0 }
0x25da   :  { %v6861_v33 = vand.u32 2147483647, %v11275_v34  ;;  %v11281_v4 = vadd.f32 %v6829_v31, %v6740_v28  ;;  %vm7021_vm1 = vcmp.lt.f32.partialorder %v11275_v34, 0.0 }
0x25db   :  { %v6868_v25 = vmul.f32 0.3275911, %v6860_v15  ;;  %v11284_v52 = vmul.f32 0.70710677, %v11278_v37  ;;  %v6972_v59 = vsub.f32 0.0, %v6860_v15 }
0x25dc   :  { %v6869_v43 = vmul.f32 0.3275911, %v6861_v33  ;;  %v11287_v48 = vmul.f32 0.70710677, %v11281_v4  ;;  %v6833_v2 = vpop.f32.mrb[64].mxu0  ;;  %v6973_v21 = vsub.f32 0.0, %v6861_v33 }
0x25dd   :  { %v6876_v16 = vadd.f32 1.0, %v6868_v25  ;;  %v6862_v0 = vand.u32 2147483647, %v11284_v52  ;;  %v6835_v50 = vpop.f32.mrb[65].mxu0  ;;  %v11291_v29 = vadd.f32 %v6833_v2, %v6736_v38  ;;  %v6980_v11 = vmul.f32 %v6972_v59, %v6860_v15 }
0x25de   :  { %v6877_v20 = vadd.f32 1.0, %v6869_v43  ;;  %v6863_v19 = vand.u32 2147483647, %v11287_v48  ;;  %v11293_v10 = vadd.f32 %v6835_v50, %v6740_v28  ;;  %v6981_v30 = vmul.f32 %v6973_v21, %v6861_v33 }
0x25df   :  { %9419 = vrcp.f32 %v6876_v16  ;;  %v6870_v18 = vmul.f32 0.3275911, %v6862_v0  ;;  %v11296_v23 = vmul.f32 0.70710677, %v11291_v29  ;;  %v6974_v55 = vsub.f32 0.0, %v6862_v0 }
0x25e0   :  { %v6871_v51 = vmul.f32 0.3275911, %v6863_v19  ;;  %v6839_v54 = vpop.f32.mrb[66].mxu0  ;;  %9421 = vrcp.f32 %v6877_v20  ;;  %v11299_v61 = vmul.f32 0.70710677, %v11293_v10  ;;  %v6975_v56 = vsub.f32 0.0, %v6863_v19 }
0x25e1   :  { %v6878_v53 = vadd.f32 1.0, %v6870_v18  ;;  %v6841_v39 = vpop.f32.mrb[67].mxu0  ;;  %v6864_v63 = vand.u32 2147483647, %v11296_v23  ;;  %v11302_v32 = vadd.f32 %v6839_v54, %v6736_v38  ;;  %v6988_v14 = vmul.f32 1.442695, %v6980_v11 }
0x25e2   :  { %v6879_v3 = vadd.f32 1.0, %v6871_v51  ;;  %v6865_v22 = vand.u32 2147483647, %v11299_v61  ;;  %v11305_v27 = vadd.f32 %v6841_v39, %v6740_v28  ;;  %v6982_v41 = vmul.f32 %v6974_v55, %v6862_v0 }
0x25e3   :  { %9423 = vrcp.f32 %v6878_v53  ;;  %v6872_v5 = vmul.f32 0.3275911, %v6864_v63  ;;  %v11308_v42 = vmul.f32 0.70710677, %v11302_v32  ;;  %v6976_v17 = vsub.f32 0.0, %v6864_v63 }
0x25e4   :  { %9425 = vrcp.f32 %v6879_v3  ;;  %v6873_v7 = vmul.f32 0.3275911, %v6865_v22  ;;  %v11311_v40 = vmul.f32 0.70710677, %v11305_v27  ;;  %v6983_v15 = vmul.f32 %v6975_v56, %v6863_v19 }
0x25e5   :  { %v6880_v35 = vadd.f32 1.0, %v6872_v5  ;;  %v6866_v26 = vand.u32 2147483647, %v11308_v42  ;;  %v6977_v31 = vsub.f32 0.0, %v6865_v22  ;;  %v6990_v16 = vmul.f32 1.442695, %v6981_v30 }
0x25e6   :  { %v6881_v6 = vadd.f32 1.0, %v6873_v7  ;;  %v6867_v49 = vand.u32 2147483647, %v11311_v40  ;;  %v6992_v2 = vmul.f32 1.442695, %v6982_v41  ;;  %v6984_v20 = vmul.f32 %v6976_v17, %v6864_v63 }
0x25e7   :  { %9427 = vrcp.f32 %v6880_v35  ;;  %v6874_v47 = vmul.f32 0.3275911, %v6866_v26  ;;  %v6994_v51 = vmul.f32 1.442695, %v6983_v15  ;;  %v6985_v54 = vmul.f32 %v6977_v31, %v6865_v22 }
0x25e8   :  { %9429 = vrcp.f32 %v6881_v6  ;;  %v6875_v13 = vmul.f32 0.3275911, %v6867_v49  ;;  %v6979_v59 = vsub.f32 0.0, %v6867_v49  ;;  %v11333_v3 = vmul.f32 0.5, %v11269_v57 }
0x25e9   :  { %v11313_v62 = vpop.eup %9419  ;;  %v6882_v33 = vadd.f32 1.0, %v6874_v47  ;;  %9431 = vpow2.f32 %v6988_v14  ;;  %v6996_v21 = vmul.f32 1.442695, %v6984_v20  ;;  %v6978_v55 = vsub.f32 0.0, %v6866_v26 }
0x25ea   :  { %v6900_v24 = vmul.f32 1.0614054, %v11313_v62  ;;  %v11318_v38 = vpop.eup %9421  ;;  %v6883_v0 = vadd.f32 1.0, %v6875_v13  ;;  %v6998_v35 = vmul.f32 1.442695, %v6985_v54  ;;  %vm7022_vm2 = vcmp.lt.f32.partialorder %v11284_v52, 0.0 }
0x25eb   :  { %9433 = vrcp.f32 %v6882_v33  ;;  %v6901_v50 = vmul.f32 1.0614054, %v11318_v38  ;;  %vm7023_vm4 = vcmp.lt.f32.partialorder %v11287_v48, 0.0  ;;  %vm7024_vm5 = vcmp.lt.f32.partialorder %v11296_v23, 0.0 }
0x25ec   :  { %v6908_v28 = vadd.f32 -1.4531521, %v6900_v24  ;;  %9435 = vrcp.f32 %v6883_v0  ;;  %v6987_v24 = vmul.f32 %v6979_v59, %v6867_v49  ;;  %vm7025_vm6 = vcmp.lt.f32.partialorder %v11299_v61, 0.0 }
0x25ed   :  { %v11320_v58 = vpop.eup %9423  ;;  %v6909_v53 = vadd.f32 -1.4531521, %v6901_v50  ;;  %9437 = vpow2.f32 %v6990_v16  ;;  %v6848_v23 = vmul.f32 0.5, %v11291_v29  ;;  %vm7027_vm7 = vcmp.lt.f32.partialorder %v11311_v40, 0.0 }
0x25ee   :  { %v11325_v25 = vpop.eup %9425  ;;  %v6916_v43 = vmul.f32 %v11313_v62, %v6908_v28  ;;  %v6902_v19 = vmul.f32 1.0614054, %v11320_v58  ;;  %9439 = vpow2.f32 %v6992_v2  ;;  %v6986_v28 = vmul.f32 %v6978_v55, %v6866_v26 }
0x25ef   :  { %v6903_v8 = vmul.f32 1.0614054, %v11325_v25  ;;  %v6917_v5 = vmul.f32 %v11318_v38, %v6909_v53  ;;  %9441 = vpow2.f32 %v6994_v51  ;;  %v7002_v2 = vmul.f32 1.442695, %v6987_v24 }
0x25f0   :  { %v6924_v18 = vadd.f32 1.4214138, %v6916_v43  ;;  %v6910_v63 = vadd.f32 -1.4531521, %v6902_v19  ;;  %9443 = vpow2.f32 %v6996_v21  ;;  %vm7026_vm8 = vcmp.lt.f32.partialorder %v11308_v42, 0.0 }
0x25f1   :  { %v6911_v11 = vadd.f32 -1.4531521, %v6903_v8  ;;  %v11338_v56 = vpop.eup %9427  ;;  %v6925_v57 = vadd.f32 1.4214138, %v6917_v5  ;;  %9445 = vpow2.f32 %v6998_v35 }
0x25f2   :  { %v6932_v39 = vmul.f32 %v11313_v62, %v6924_v18  ;;  %v6918_v22 = vmul.f32 %v11320_v58, %v6910_v63  ;;  %v11340_v30 = vpop.eup %9429  ;;  %v6904_v47 = vmul.f32 1.0614054, %v11338_v56  ;;  %9447 = vpow2.f32 %v7002_v2 }
0x25f3   :  { %v6919_v14 = vmul.f32 %v11325_v25, %v6911_v11  ;;  %v6933_v13 = vmul.f32 %v11318_v38, %v6925_v57  ;;  %v6905_v15 = vmul.f32 1.0614054, %v11340_v30  ;;  %v9432_v31 = vpop.eup %9431 }
0x25f4   :  { %v6940_v7 = vadd.f32 -0.28449672, %v6932_v39  ;;  %v6926_v17 = vadd.f32 1.4214138, %v6918_v22  ;;  %v6912_v16 = vadd.f32 -1.4531521, %v6904_v47 }
0x25f5   :  { %v6927_v41 = vadd.f32 1.4214138, %v6919_v14  ;;  %v11348_v0 = vpop.eup %9433  ;;  %v6941_v20 = vadd.f32 -0.28449672, %v6933_v13  ;;  %v6913_v50 = vadd.f32 -1.4531521, %v6905_v15 }
0x25f6   :  { %v6948_v6 = vmul.f32 %v11313_v62, %v6940_v7  ;;  %v6934_v49 = vmul.f32 %v11320_v58, %v6926_v17  ;;  %v11351_v26 = vpop.eup %9435  ;;  %v6920_v51 = vmul.f32 %v11338_v56, %v6912_v16  ;;  %v6906_v39 = vmul.f32 1.0614054, %v11348_v0 }
0x25f7   :  { %v6935_v43 = vmul.f32 %v11325_v25, %v6927_v41  ;;  %v6949_v54 = vmul.f32 %v11318_v38, %v6941_v20  ;;  %v6921_v59 = vmul.f32 %v11340_v30, %v6913_v50  ;;  %v6907_v53 = vmul.f32 1.0614054, %v11351_v26  ;;  %v9438_v5 = vpop.eup %9437 }
0x25f8   :  { %v6956_v33 = vadd.f32 0.2548296, %v6948_v6  ;;  %v6942_v19 = vadd.f32 -0.28449672, %v6934_v49  ;;  %v6928_v55 = vadd.f32 1.4214138, %v6920_v51  ;;  %v9440_v22 = vpop.eup %9439 }
0x25f9   :  { %v6943_v8 = vadd.f32 -0.28449672, %v6935_v43  ;;  %v6929_v7 = vadd.f32 1.4214138, %v6921_v59  ;;  %v6915_v14 = vadd.f32 -1.4531521, %v6907_v53  ;;  %v9442_v41 = vpop.eup %9441 }
0x25fa   :  { %v6964_v18 = vmul.f32 %v11313_v62, %v6956_v33  ;;  %v6950_v21 = vmul.f32 %v11320_v58, %v6942_v19  ;;  %v6957_v62 = vadd.f32 0.2548296, %v6949_v54  ;;  %v6936_v6 = vmul.f32 %v11338_v56, %v6928_v55  ;;  %v9444_v16 = vpop.eup %9443 }
0x25fb   :  { %v6951_v63 = vmul.f32 %v11325_v25, %v6943_v8  ;;  %v6937_v47 = vmul.f32 %v11340_v30, %v6929_v7  ;;  %v6923_v13 = vmul.f32 %v11351_v26, %v6915_v14  ;;  %v6914_v15 = vadd.f32 -1.4531521, %v6906_v39  ;;  %v9446_v54 = vpop.eup %9445 }
0x25fc   :  { %v7004_v11 = vmul.f32 %v9432_v31, %v6964_v18  ;;  %v6958_v57 = vadd.f32 0.2548296, %v6950_v21  ;;  %v6965_v17 = vmul.f32 %v11318_v38, %v6957_v62  ;;  %v6944_v49 = vadd.f32 -0.28449672, %v6936_v6 }
0x25fd   :  { %v6959_v24 = vadd.f32 0.2548296, %v6951_v63  ;;  %v6945_v20 = vadd.f32 -0.28449672, %v6937_v47  ;;  %v6931_v50 = vadd.f32 1.4214138, %v6923_v13  ;;  %v6922_v18 = vmul.f32 %v11348_v0, %v6914_v15 }
0x25fe   :  { %v7012_v35 = vsub.f32 1.0, %v7004_v11  ;;  %v6966_v43 = vmul.f32 %v11320_v58, %v6958_v57  ;;  %v7005_v2 = vmul.f32 %v9438_v5, %v6965_v17  ;;  %v6952_v51 = vmul.f32 %v11338_v56, %v6944_v49 }
0x25ff   :  { %v6967_v33 = vmul.f32 %v11325_v25, %v6959_v24  ;;  %v7000_v59 = vmul.f32 1.442695, %v6986_v28  ;;  %v6953_v25 = vmul.f32 %v11340_v30, %v6945_v20  ;;  %v6939_v58 = vmul.f32 %v11351_v26, %v6931_v50  ;;  %v9448_v28 = vpop.eup %9447 }
0x2600   :  { %v7028_v31 = vsub.f32 0.0, %v7012_v35  ;;  %v7006_v19 = vmul.f32 %v9440_v22, %v6966_v43  ;;  %v7013_v53 = vsub.f32 1.0, %v7005_v2  ;;  %v6960_v63 = vadd.f32 0.2548296, %v6952_v51 }
0x2601   :  { %v7007_v8 = vmul.f32 %v9442_v41, %v6967_v33  ;;  %v6930_v21 = vadd.f32 1.4214138, %v6922_v18  ;;  %v6961_v62 = vadd.f32 0.2548296, %v6953_v25  ;;  %v6947_v12 = vadd.f32 -0.28449672, %v6939_v58 }
0x2602   :  { %v7036_v38 = vsel %vm7020_vm0, %v7028_v31, %v7012_v35  ;;  %v7014_v11 = vsub.f32 1.0, %v7006_v19  ;;  %v7029_v5 = vsub.f32 0.0, %v7013_v53  ;;  %v6968_v22 = vmul.f32 %v11338_v56, %v6960_v63 }
0x2603   :  { %v7015_v39 = vsub.f32 1.0, %v7007_v8  ;;  %v7044_v55 = vadd.f32 1.0, %v7036_v38  ;;  %v6938_v35 = vmul.f32 %v11348_v0, %v6930_v21  ;;  %9449 = vpow2.f32 %v7000_v59 }
0x2604   :  { %v7030_v14 = vsub.f32 0.0, %v7014_v11  ;;  %v7037_v24 = vsel %vm7021_vm1, %v7029_v5, %v7013_v53  ;;  %v6969_v57 = vmul.f32 %v11340_v30, %v6961_v62  ;;  %v6955_v6 = vmul.f32 %v11351_v26, %v6947_v12 }
0x2605   :  { %v7031_v7 = vsub.f32 0.0, %v7015_v39  ;;  %v7045_v41 = vadd.f32 1.0, %v7037_v24  ;;  %v7008_v13 = vmul.f32 %v9444_v16, %v6968_v22  ;;  %v6847_v56 = vmul.f32 0.5, %v11281_v4 }
0x2606   :  { %v7038_v47 = vsel %vm7022_vm2, %v7030_v14, %v7014_v11  ;;  %v7009_v31 = vmul.f32 %v9446_v54, %v6969_v57  ;;  %v6963_v33 = vadd.f32 0.2548296, %v6955_v6  ;;  %v7052_v34 = vmul.f32 %v7044_v55, %v11323_v45 }
0x2607   :  { %v7039_v17 = vsel %vm7023_vm4, %v7031_v7, %v7015_v39  ;;  %v7053_v43 = vmul.f32 %v7045_v41, %v11333_v3  ;;  %v7016_v30 = vsub.f32 1.0, %v7008_v13  ;;  %v6946_v49 = vadd.f32 -0.28449672, %v6938_v35 }
0x2608   :  { %v7047_v15 = vadd.f32 1.0, %v7039_v17  ;;  %v7046_v20 = vadd.f32 1.0, %v7038_v47  ;;  %v7017_v50 = vsub.f32 1.0, %v7009_v31  ;;  %v6971_v48 = vmul.f32 %v11351_v26, %v6963_v33 }
0x2609   :  { %7161 = vmatprep.mubr.f32.mxu1 %v7053_v43  ;;  %v7032_v52 = vsub.f32 0.0, %v7016_v30  ;;  %v6954_v16 = vmul.f32 %v11348_v0, %v6946_v49  ;;  %v6846_v4 = vmul.f32 0.5, %v11278_v37  ;;  %v6849_v54 = vmul.f32 0.5, %v11293_v10 }
0x260a   :  { %v7055_v2 = vmul.f32 %v7047_v15, %v6847_v56  ;;  %7162 = vmatmul.mubr.f32.vlgmr.msra.gmra.mrb[66].mxu1 %v7052_v34  ;;  %v7033_v18 = vsub.f32 0.0, %v7017_v50  ;;  %v7011_v45 = vmul.f32 %v9448_v28, %v6971_v48  ;;  %v6851_v63 = vmul.f32 0.5, %v11305_v27 }
0x260b   :  { %v7040_v3 = vsel %vm7024_vm5, %v7032_v52, %v7016_v30  ;;  %v6962_v38 = vadd.f32 0.2548296, %v6954_v16  ;;  %v7054_v8 = vmul.f32 %v7046_v20, %v6846_v4  ;;  %v7096_v7 = vrot.slane %v11040_v46, %v10216_v44 }
0x260c   :  { %7166 = vmatprep.mubr.f32.mxu1 %v7055_v2  ;;  %v7041_v19 = vsel %vm7025_vm6, %v7033_v18, %v7017_v50  ;;  %v7048_v51 = vadd.f32 1.0, %v7040_v3  ;;  %v7019_v26 = vsub.f32 1.0, %v7011_v45 }
0x260d   :  { %v7049_v59 = vadd.f32 1.0, %v7041_v19  ;;  %v6970_v53 = vmul.f32 %v11348_v0, %v6962_v38  ;;  %v9450_v37 = vpop.eup %9449  ;;  %v6850_v0 = vmul.f32 0.5, %v11302_v32 }
0x260e   :  { %7167 = vmatmul.mubr.f32.gmra.mrb[68].mxu1 %v7054_v8  ;;  %v7035_v25 = vsub.f32 0.0, %v7019_v26  ;;  %v7056_v39 = vmul.f32 %v7048_v51, %v6848_v23  ;;  %v7263_v23 = vld [vmem:[%s11488_s17 + $0x18] sm:$0xff] }
0x260f   :  { %v7057_v61 = vmul.f32 %v7049_v59, %v6849_v54  ;;  %v7010_v58 = vmul.f32 %v9450_v37, %v6970_v53  ;;  %v7260_v54 = vld [vmem:[%s11488_s17] sm:$0xff]  ;;  %v7261_v59 = vld [vmem:[%s11488_s17 + $0x8] sm:$0xff]  ;;  %v7262_v37 = vld [vmem:[%s11488_s17 + $0x10] sm:$0xff] }
0x2610   :  { %v7043_v11 = vsel %vm7027_vm7, %v7035_v25, %v7019_v26  ;;  %v9015_v53 = vpack.c.bf16 %v7261_v59, %v7260_v54  ;;  %v9019_v25 = vpack.c.bf16 %v7263_v23, %v7262_v37 }
0x2611   :  { %7171 = vmatprep.mubr.f32.mxu1 %v7057_v61  ;;  %v7051_v21 = vadd.f32 1.0, %v7043_v11  ;;  %v7018_v55 = vsub.f32 1.0, %v7010_v58  ;;  %v7264_v61 = vld [vmem:[%s11488_s17 + $0x20] sm:$0xff]  ;;  %v7265_v58 = vld [vmem:[%s11488_s17 + $0x28] sm:$0xff] }
0x2612   :  { %7172 = vmatmul.mubr.f32.gmra.mrb[70].mxu1 %v7056_v39  ;;  %9016 = vmatprep.subr.bf16.mxu0 %v9015_v53  ;;  %v7266_v39 = vld [vmem:[%s11488_s17 + $0x30] sm:$0xff]  ;;  %v9023_v11 = vpack.c.bf16 %v7265_v58, %v7264_v61 }
0x2613   :  { %v7059_v10 = vmul.f32 %v7051_v21, %v6851_v63  ;;  %v7034_v5 = vsub.f32 0.0, %v7018_v55  ;;  %9018 = vmatpush3.bf16.msra.mxu0 %v9015_v53  ;;  %v7267_v63 = vld [vmem:[%s11488_s17 + $0x38] sm:$0xff] }
0x2614   :  { %9020 = vmatprep.subr.bf16.mxu0 %v9019_v25  ;;  %v9027_v21 = vpack.c.bf16 %v7267_v63, %v7266_v39 }
0x2615   :  { %7176 = vmatprep.mubr.f32.mxu1 %v7059_v10  ;;  %v7042_v29 = vsel %vm7026_vm8, %v7034_v5, %v7018_v55 }
0x2616   :  { %v7050_v62 = vadd.f32 1.0, %v7042_v29 }
0x2617   :  { %9022 = vmatpush3.bf16.msra.mxu0 %v9019_v25 }
0x2618   :  { %v7058_v40 = vmul.f32 %v7050_v62, %v6850_v0  ;;  %9024 = vmatprep.subr.bf16.mxu0 %v9023_v11 }
0x261a   :  { %7177 = vmatmul.mubr.f32.gmra.mrb[72].mxu1 %v7058_v40 }
0x261b   :  { %9026 = vmatpush3.bf16.msra.mxu0 %v9023_v11 }
0x261c   :  { %9028 = vmatprep.subr.bf16.mxu0 %v9027_v21 }
0x261f   :  { %9030 = vmatpush3.bf16.msra.mxu0 %v9027_v21 }
0x26dd   :  { %v8031_v12 = vpop.f32.mrb[66].mxu1 }
0x26de   :  { %v8032_v27 = vpop.f32.mrb[67].mxu1 }
0x26df   :  { %v8033_v14 = vadd.f32 %v8032_v27, %v8031_v12 }
0x26e1   :  { %v7164_v22 = vadd.f32 %v8033_v14, %v7096_v7  ;;  %v8034_v35 = vpop.f32.mrb[68].mxu1  ;;  %v7676_v14 = vld [vmem:[%s11489_s13] ss:$0 sm:$0xff] }
0x26e2   :  { %v8035_v28 = vpop.f32.mrb[69].mxu1 }
0x26e3   :  { %v8036_v24 = vadd.f32 %v8035_v28, %v8034_v35  ;;  %v7182_v57 = vadd.f32 %v11060_v60, %v7164_v22 }
0x26e5   :  { %v7169_v42 = vadd.f32 %v8036_v24, %v7096_v7  ;;  %v8037_v6 = vpop.f32.mrb[70].mxu1  ;;  %v7188_v41 = vsel %vm371_vm3, %v7182_v57, 0.0  ;;  %v7677_v24 = vld [vmem:[%s11490_s12] ss:$0 sm:$0xff] }
0x26e6   :  { %7189 = vadd.xlane.f32.xlu0 %v7188_v41  ;;  %v8038_v32 = vpop.f32.mrb[71].mxu1 }
0x26e7   :  { %v8039_v17 = vadd.f32 %v8038_v32, %v8037_v6  ;;  %v7183_v47 = vadd.f32 %v11063_v36, %v7169_v42 }
0x26e9   :  { %v7174_v13 = vadd.f32 %v8039_v17, %v7096_v7  ;;  %v7191_v44 = vsel %vm371_vm3, %v7183_v47, 0.0 }
0x26ea   :  { %7192 = vadd.xlane.f32.xlu1 %v7191_v44 }
0x26eb   :  { %v7184_v46 = vadd.f32 %v11068_v9, %v7174_v13 }
0x26ed   :  { %v8040_v56 = vpop.f32.mrb[72].mxu1  ;;  %v7194_v15 = vsel %vm371_vm3, %v7184_v46, 0.0 }
0x26ee   :  { %v8041_v31 = vpop.f32.mrb[73].mxu1  ;;  %7195 = vadd.xlane.f32.xlu0 %v7194_v15 }
0x26ef   :  { %v8042_v60 = vadd.f32 %v8041_v31, %v8040_v56 }
0x26f1   :  { %v7179_v33 = vadd.f32 %v8042_v60, %v7096_v7 }
0x26f3   :  { %v7185_v34 = vadd.f32 %v11073_v1, %v7179_v33 }
0x26f5   :  { %v7197_v43 = vsel %vm371_vm3, %v7185_v34, 0.0 }
0x26f6   :  { %7198 = vadd.xlane.f32.xlu1 %v7197_v43 }
0x2773   :  { %v7190_v30 = vpop.xlane.xlu0 %7189 }
0x2774   :  { %v7200_v36 = vmul.f32 0.015625, %v7190_v30 }
0x2776   :  { %v7204_v49 = vsub.f32 %v7182_v57, %v7200_v36 }
0x2777   :  { %v7193_v2 = vpop.xlane.xlu1 %7192 }
0x2778   :  { %v7201_v20 = vmul.f32 0.015625, %v7193_v2  ;;  %v7208_v50 = vmul.f32 %v7204_v49, %v7204_v49 }
0x277a   :  { %v7205_v48 = vsub.f32 %v7183_v47, %v7201_v20  ;;  %v7212_v9 = vsel %vm371_vm3, %v7208_v50, 0.0 }
0x277b   :  { %7213 = vadd.xlane.f32.xlu0 %v7212_v9  ;;  %v7196_v52 = vpop.xlane.xlu0 %7195 }
0x277c   :  { %v7202_v16 = vmul.f32 0.015625, %v7196_v52  ;;  %v7209_v4 = vmul.f32 %v7205_v48, %v7205_v48 }
0x277e   :  { %v11412_v18 = vsub.f32 %v7184_v46, %v7202_v16  ;;  %v7215_v1 = vsel %vm371_vm3, %v7209_v4, 0.0 }
0x277f   :  { %7216 = vadd.xlane.f32.xlu1 %v7215_v1 }
0x2780   :  { %v7210_v45 = vmul.f32 %v11412_v18, %v11412_v18 }
0x2782   :  { %v7218_v3 = vsel %vm371_vm3, %v7210_v45, 0.0 }
0x2783   :  { %v7199_v38 = vpop.xlane.xlu1 %7198  ;;  %7219 = vadd.xlane.f32.xlu0 %v7218_v3 }
0x2784   :  { %v7203_v8 = vmul.f32 0.015625, %v7199_v38 }
0x2786   :  { %v7207_v19 = vsub.f32 %v7185_v34, %v7203_v8  ;;  %v7678_v34 = vld [vmem:[%s11491_s16] ss:$0 sm:$0xff] }
0x2788   :  { %v7211_v51 = vmul.f32 %v7207_v19, %v7207_v19 }
0x278a   :  { %v7221_v26 = vsel %vm371_vm3, %v7211_v51, 0.0 }
0x278b   :  { %7222 = vadd.xlane.f32.xlu1 %v7221_v26 }
0x2808   :  { %v7214_v55 = vpop.xlane.xlu0 %7213 }
0x2809   :  { %v7224_v10 = vmul.f32 0.015625, %v7214_v55 }
0x280b   :  { %v7228_v5 = vadd.f32 1e-05, %v7224_v10 }
0x280c   :  { %v7217_v29 = vpop.xlane.xlu1 %7216 }
0x280d   :  { %9451 = vrsqrt.f32 %v7228_v5  ;;  %v7225_v0 = vmul.f32 0.015625, %v7217_v29 }
0x280f   :  { %v7229_v62 = vadd.f32 1e-05, %v7225_v0 }
0x2810   :  { %v7220_v40 = vpop.xlane.xlu0 %7219 }
0x2811   :  { %9453 = vrsqrt.f32 %v7229_v62  ;;  %v7226_v12 = vmul.f32 0.015625, %v7220_v40 }
0x2813   :  { %v7230_v7 = vadd.f32 1e-05, %v7226_v12 }
0x2815   :  { %9455 = vrsqrt.f32 %v7230_v7 }
0x2817   :  { %v9452_v27 = vpop.eup %9451 }
0x2818   :  { %v7223_v22 = vpop.xlane.xlu1 %7222  ;;  %v7236_v35 = vmul.f32 %v9452_v27, %v7204_v49 }
0x2819   :  { %v7227_v28 = vmul.f32 0.015625, %v7223_v22 }
0x281a   :  { %v7246_v57 = vmul.f32 %v7676_v14, %v7236_v35 }
0x281b   :  { %v9454_v42 = vpop.eup %9453  ;;  %v7231_v6 = vadd.f32 1e-05, %v7227_v28 }
0x281c   :  { %v7237_v41 = vmul.f32 %v9454_v42, %v7205_v48  ;;  %v7256_v32 = vadd.f32 %v7677_v24, %v7246_v57 }
0x281d   :  { %9457 = vrsqrt.f32 %v7231_v6 }
0x281e   :  { %v7247_v17 = vmul.f32 %v7676_v14, %v7237_v41  ;;  %8569 = vmatprep.mubr.msk.f32.mxu0 %vm371_vm3, %v7256_v32 }
0x281f   :  { %v9456_v47 = vpop.eup %9455 }
0x2820   :  { %v7257_v13 = vadd.f32 %v7677_v24, %v7247_v17  ;;  %v7238_v44 = vmul.f32 %v9456_v47, %v11412_v18 }
0x2822   :  { %8570 = vmatmul.mubr.msk.f32.vlgmr.msra.gmra.mrb[68].mxu0 %vm371_vm3, %v7257_v13  ;;  %v7248_v46 = vmul.f32 %v7676_v14, %v7238_v44 }
0x2824   :  { %v7258_v56 = vadd.f32 %v7677_v24, %v7248_v46 }
0x2826   :  { %8572 = vmatprep.mubr.msk.f32.mxu0 %vm371_vm3, %v7258_v56 }
0x2827   :  { %v9458_v15 = vpop.eup %9457 }
0x2828   :  { %v7239_v31 = vmul.f32 %v9458_v15, %v7207_v19 }
0x282a   :  { %v7249_v60 = vmul.f32 %v7676_v14, %v7239_v31 }
0x282c   :  { %v7259_v33 = vadd.f32 %v7677_v24, %v7249_v60 }
0x282e   :  { %8573 = vmatmul.mubr.msk.f32.gmra.mrb[70].mxu0 %vm371_vm3, %v7259_v33 }
0x28f5   :  { %v8571_v43 = vpop.f32.mrb[68].mxu0 }
0x28f6   :  { %v7359_v30 = vadd.f32 %v8571_v43, %v7678_v34  ;;  %v7353_v36 = vpop.f32.mrb[69].mxu0 }
0x28f7   :  { %v7354_v49 = vadd.f32 %v7678_v34, %v7353_v36 }
0x28f8   :  { %7373 = vst [vmem:[%s11492_s23 + $0x8] sm:$0xff] %v7359_v30 }
0x28f9   :  { %7372 = vst [vmem:[%s11492_s23] sm:$0xff] %v7354_v49 }
0x2901   :  { %v8574_v2 = vpop.f32.mrb[70].mxu0 }
0x2902   :  { %v7369_v20 = vadd.f32 %v8574_v2, %v7678_v34  ;;  %v7363_v50 = vpop.f32.mrb[71].mxu0 }
0x2903   :  { %v7364_v48 = vadd.f32 %v7678_v34, %v7363_v50 }
0x2904   :  { %7375 = vst [vmem:[%s11492_s23 + $0x18] sm:$0xff] %v7369_v20 }
0x2905   :  { %7374 = vst [vmem:[%s11492_s23 + $0x10] sm:$0xff] %v7364_v48 }

</bundles_post_ra>
